<compile_context>
chip_gen: v6e
topology: v6e:2x2x1
jax: 0.10.0
libtpu: 0.0.40
codegen_flags: <defaults>
</compile_context>

<pallas_src>
from functools import partial

import jax
import jax.numpy as jnp
from jax.experimental import pallas as pl
from jax.experimental.pallas import tpu as pltpu


# ----------------------------- Fused Pallas kernel -----------------------------

def _bottleneck_kernel(x_ref, w1_ref, b1_ref, w2_ref, b2_ref, w3_ref, b3_ref,
                       o_ref, h1p_ref, *, H, W):
    # x_ref:   (H*W, Cin)      one batch element, NHWC flattened row-major
    # w1_ref:  (Cin, width)    BN1 scale already folded in
    # w2_ref:  (3, 3, width, width)  HWIO, BN2 scale folded in
    # w3_ref:  (width, cout)   BN3 scale folded in
    # b*_ref:  (1, C)          folded BN biases
    # o_ref:   (H*W, cout)
    # h1p_ref: (H*W + 4*W, width) VMEM scratch: flat conv1 output with zero halo
    HW = H * W
    pad = 2 * W                      # sublane-aligned offset of the real data

    x2d = x_ref[...]                                     # (HW, Cin)

    # ---- conv1 (1x1) + bn1 + ReLU — stays in VMEM --------------------------
    h1 = jnp.dot(x2d, w1_ref[...], preferred_element_type=jnp.float32)
    h1 = jnp.maximum(h1 + b1_ref[...], 0.0)              # (HW, width)

    # ---- zero-halo flat buffer (replaces the HBM jnp.pad pass) -------------
    h1p_ref[...] = jnp.zeros_like(h1p_ref)
    h1p_ref[pl.ds(pad, HW), :] = h1
    h1f = h1p_ref[...]                                   # (HW + 4W, width)

    # column index of every output pixel (hoisted out of the tap loop)
    col = jax.lax.broadcasted_iota(jnp.int32, (HW, 1), 0) % W

    # ---- conv2 (3x3, stride 1, pad 1) + bn2 + ReLU --------------------------
    # A tap (dh, dw) of the 3x3 kernel is a row shift of dh*W + dw in the flat
    # layout; the H-boundary is handled by the zero halo, the W-boundary (row
    # wrap-around) by masking the dw = +/-1 taps.
    acc = jnp.zeros((HW, w2_ref.shape[3]), jnp.float32)
    for dh in (-1, 0, 1):
        for dw in (-1, 0, 1):
            start = pad + dh * W + dw
            patch = h1f[start:start + HW, :]
            if dw == -1:
                patch = jnp.where(col >= 1, patch, 0.0)
            elif dw == 1:
                patch = jnp.where(col <= W - 2, patch, 0.0)
            acc = acc + jnp.dot(patch, w2_ref[dh + 1, dw + 1],
                                preferred_element_type=jnp.float32)
    h2 = jnp.maximum(acc + b2_ref[...], 0.0)             # (HW, width)

    # ---- conv3 (1x1) + bn3 + identity residual + ReLU -----------------------
    y = jnp.dot(h2, w3_ref[...], preferred_element_type=jnp.float32)
    o_ref[...] = jnp.maximum(y + b3_ref[...] + x2d, 0.0).astype(o_ref.dtype)


# ----------------------------- Wrapper -----------------------------

def bottleneck_forward(x_nhwc, p):
    N, H, W, Cin = x_nhwc.shape
    width = p["w1"].shape[1]
    cout = p["w3"].shape[1]
    assert cout == Cin, "identity residual requires in_channel == out_channel*expansion"
    HW = H * W

    # Fold eval-mode BN scale into the conv weights once on the host.
    w1s = p["w1"] * p["s1"][None, :]
    w2s = p["w2"] * p["s2"][None, None, None, :]
    w3s = p["w3"] * p["s3"][None, :]
    b1 = p["b1"].reshape(1, -1)
    b2 = p["b2"].reshape(1, -1)
    b3 = p["b3"].reshape(1, -1)

    x2d = x_nhwc.reshape(N * HW, Cin)        # contiguous, metadata-only reshape

    out = pl.pallas_call(
        partial(_bottleneck_kernel, H=H, W=W),
        out_shape=jax.ShapeDtypeStruct((N * HW, cout), jnp.float32),
        grid=(N,),
        in_specs=[
            pl.BlockSpec((HW, Cin), lambda n: (n, 0)),
            pl.BlockSpec((Cin, width), lambda n: (0, 0)),
            pl.BlockSpec((1, width), lambda n: (0, 0)),
            pl.BlockSpec((3, 3, width, width), lambda n: (0, 0, 0, 0)),
            pl.BlockSpec((1, width), lambda n: (0, 0)),
            pl.BlockSpec((width, cout), lambda n: (0, 0)),
            pl.BlockSpec((1, cout), lambda n: (0, 0)),
        ],
        out_specs=pl.BlockSpec((HW, cout), lambda n: (n, 0)),
        scratch_shapes=[pltpu.VMEM((HW + 4 * W, width), jnp.float32)],
        compiler_params=pltpu.CompilerParams(
            dimension_semantics=("parallel",)),
    )(x2d, w1s, b1, w2s, b2, w3s, b3)

    return out.reshape(N, H, W, cout)


# ----------------------------- Params & reference -----------------------------

def make_params(in_channel, out_channel, key, groups=1, width_per_group=64,
                expansion=4, eps=1e-5):
    width = int(out_channel * (width_per_group / 64.0)) * groups
    cout = out_channel * expansion
    ks = jax.random.split(key, 15)

    def conv_w(k, shape, fan_in):
        return jax.random.normal(k, shape, jnp.float32) * (2.0 / fan_in) ** 0.5

    def bn_fold(kg, kb, km, kv, c):
        gamma = 1.0 + 0.1 * jax.random.normal(kg, (c,), jnp.float32)
        beta = 0.1 * jax.random.normal(kb, (c,), jnp.float32)
        mean = 0.1 * jax.random.normal(km, (c,), jnp.float32)
        var = 0.5 + jax.random.uniform(kv, (c,), jnp.float32)
        scale = gamma / jnp.sqrt(var + eps)
        bias = beta - mean * scale
        return scale, bias

    w1 = conv_w(ks[0], (in_channel, width), in_channel)       # 1x1 as (Cin, Cout)
    w2 = conv_w(ks[1], (3, 3, width, width), 9 * width)       # 3x3 HWIO
    w3 = conv_w(ks[2], (width, cout), width)                  # 1x1 as (Cin, Cout)
    s1, b1 = bn_fold(ks[3], ks[4], ks[5], ks[6], width)
    s2, b2 = bn_fold(ks[7], ks[8], ks[9], ks[10], width)
    s3, b3 = bn_fold(ks[11], ks[12], ks[13], ks[14], cout)
    return dict(w1=w1, w2=w2, w3=w3, s1=s1, b1=b1, s2=s2, b2=b2, s3=s3, b3=b3)


def ref_forward(x_nhwc, p):
    h = jnp.einsum("nhwc,cd->nhwd", x_nhwc, p["w1"])
    h = jnp.maximum(h * p["s1"] + p["b1"], 0.0)
    h2 = jax.lax.conv_general_dilated(
        h, p["w2"], window_strides=(1, 1), padding="SAME",
        dimension_numbers=("NHWC", "HWIO", "NHWC"))
    h2 = jnp.maximum(h2 * p["s2"] + p["b2"], 0.0)
    h3 = jnp.einsum("nhwc,cd->nhwd", h2, p["w3"])
    h3 = h3 * p["s3"] + p["b3"] + x_nhwc
    return jnp.maximum(h3, 0.0)


# ----------------------------- Main -----------------------------

if __name__ == "__main__":
    # Bottleneck(in_channel=16, out_channel=4), stride=1, downsample=None
    #   => width = 4, output channels = 4 * 4 = 16 (identity residual valid).
    N, C_IN, H, W = 2, 16, 16, 16
    OUT_CHANNEL = 4

    key = jax.random.PRNGKey(0)
    kx, kp = jax.random.split(key)
    x_nchw = jax.random.normal(kx, (N, C_IN, H, W), jnp.float32)  # PyTorch layout
    x_nhwc = jnp.transpose(x_nchw, (0, 2, 3, 1))                  # kernel layout

    params = make_params(C_IN, OUT_CHANNEL, kp)

    out = bottleneck_forward(x_nhwc, params)
    out = jax.block_until_ready(out)

    ref = ref_forward(x_nhwc, params)
    assert out.shape == (N, H, W, OUT_CHANNEL * 4)
    max_err = float(jnp.max(jnp.abs(out - ref)))
    assert jnp.allclose(out, ref, atol=1e-4, rtol=1e-4), max_err

    print("KERNEL_OK")
</pallas_src>

<mosaic_0001>
module attributes {stable_mosaic.version = 11 : i64} {
  func.func @_bottleneck_kernel(%arg0: i32, %arg1: memref<256x16xf32, #tpu.memory_space<vmem>>, %arg2: memref<16x4xf32, #tpu.memory_space<vmem>>, %arg3: memref<1x4xf32, #tpu.memory_space<vmem>>, %arg4: memref<3x3x4x4xf32, #tpu.memory_space<vmem>>, %arg5: memref<1x4xf32, #tpu.memory_space<vmem>>, %arg6: memref<4x16xf32, #tpu.memory_space<vmem>>, %arg7: memref<1x16xf32, #tpu.memory_space<vmem>>, %arg8: memref<256x16xf32, #tpu.memory_space<vmem>>, %arg9: memref<320x4xf32, #tpu.memory_space<vmem>>) attributes {dimension_semantics = [#tpu.dimension_semantics<parallel>], iteration_bounds = array<i64: 2>, scalar_prefetch = 0 : i64, scratch_operands = 1 : i64, tpu.core_type = #tpu.core_type<tc>, window_params = [{transform_indices = @transform_0, window_bounds = array<i64: 256, 16>}, {pipeline_mode = #tpu.pipeline_mode<synchronous>, transform_indices = @transform_1, window_bounds = array<i64: 16, 4>}, {pipeline_mode = #tpu.pipeline_mode<synchronous>, transform_indices = @transform_2, window_bounds = array<i64: 1, 4>}, {pipeline_mode = #tpu.pipeline_mode<synchronous>, transform_indices = @transform_3, window_bounds = array<i64: 3, 3, 4, 4>}, {pipeline_mode = #tpu.pipeline_mode<synchronous>, transform_indices = @transform_4, window_bounds = array<i64: 1, 4>}, {pipeline_mode = #tpu.pipeline_mode<synchronous>, transform_indices = @transform_5, window_bounds = array<i64: 4, 16>}, {pipeline_mode = #tpu.pipeline_mode<synchronous>, transform_indices = @transform_6, window_bounds = array<i64: 1, 16>}, {transform_indices = @transform_7, window_bounds = array<i64: 256, 16>}]} {
    %c0 = arith.constant 0 : index
    %c0_0 = arith.constant 0 : index
    %0 = vector.load %arg1[%c0, %c0_0] : memref<256x16xf32, #tpu.memory_space<vmem>>, vector<256x16xf32>
    %c0_1 = arith.constant 0 : index
    %c0_2 = arith.constant 0 : index
    %1 = vector.load %arg2[%c0_1, %c0_2] : memref<16x4xf32, #tpu.memory_space<vmem>>, vector<16x4xf32>
    %cst = arith.constant dense<0.000000e+00> : vector<256x4xf32>
    %2 = tpu.matmul %0, %1, %cst {dimension_numbers = #tpu.dot_dimension_numbers<[1], [0], [0], [1], [0, 0, 1, 1], [], []>} : vector<256x16xf32>, vector<16x4xf32>, vector<256x4xf32> -> vector<256x4xf32>
    %c0_3 = arith.constant 0 : index
    %c0_4 = arith.constant 0 : index
    %3 = vector.load %arg3[%c0_3, %c0_4] : memref<1x4xf32, #tpu.memory_space<vmem>>, vector<1x4xf32>
    %4 = vector.broadcast %3 : vector<1x4xf32> to vector<256x4xf32>
    %5 = arith.addf %2, %4 : vector<256x4xf32>
    %cst_5 = arith.constant 0.000000e+00 : f32
    %6 = vector.broadcast %cst_5 : f32 to vector<256x4xf32>
    %7 = arith.maximumf %5, %6 : vector<256x4xf32>
    %cst_6 = arith.constant 0.000000e+00 : f32
    %8 = vector.broadcast %cst_6 : f32 to vector<320x4xf32>
    %c0_7 = arith.constant 0 : index
    %c0_8 = arith.constant 0 : index
    %9 = vector.load %arg9[%c0_7, %c0_8] : memref<320x4xf32, #tpu.memory_space<vmem>>, vector<320x4xf32>
    tpu.vector_store %arg9[%c0_7, %c0_8], %8 {strides = array<i32>} : memref<320x4xf32, #tpu.memory_space<vmem>>, vector<320x4xf32>,
    %c32 = arith.constant 32 : index
    %c0_9 = arith.constant 0 : index
    %10 = vector.load %arg9[%c32, %c0_9] : memref<320x4xf32, #tpu.memory_space<vmem>>, vector<256x4xf32>
    tpu.vector_store %arg9[%c32, %c0_9], %7 {strides = array<i32>} : memref<320x4xf32, #tpu.memory_space<vmem>>, vector<256x4xf32>,
    %c0_10 = arith.constant 0 : index
    %c0_11 = arith.constant 0 : index
    %11 = vector.load %arg9[%c0_10, %c0_11] : memref<320x4xf32, #tpu.memory_space<vmem>>, vector<320x4xf32>
    %12 = tpu.iota {dimensions = array<i32: 0>} : vector<256x1xi32>
    %c16_i32 = arith.constant 16 : i32
    %c0_i32 = arith.constant 0 : i32
    %13 = arith.cmpi eq, %c16_i32, %c0_i32 : i32
    %c1_i32 = arith.constant 1 : i32
    %14 = arith.select %13, %c1_i32, %c16_i32 : i32
    %15 = vector.broadcast %14 : i32 to vector<256x1xi32>
    %16 = arith.remsi %12, %15 : vector<256x1xi32>
    %c0_i32_12 = arith.constant 0 : i32
    %17 = vector.broadcast %c0_i32_12 : i32 to vector<256x1xi32>
    %18 = arith.cmpi ne, %16, %17 : vector<256x1xi32>
    %c0_i32_13 = arith.constant 0 : i32
    %19 = vector.broadcast %c0_i32_13 : i32 to vector<256x1xi32>
    %20 = arith.cmpi slt, %16, %19 : vector<256x1xi32>
    %c0_i32_14 = arith.constant 0 : i32
    %21 = arith.cmpi slt, %14, %c0_i32_14 : i32
    %22 = vector.broadcast %21 : i1 to vector<256x1xi1>
    %23 = vector.broadcast %22 : vector<256x1xi1> to vector<256x1xi1>
    %24 = arith.xori %20, %23 : vector<256x1xi1>
    %25 = arith.andi %24, %18 : vector<256x1xi1>
    %26 = vector.broadcast %14 : i32 to vector<256x1xi32>
    %27 = arith.addi %16, %26 : vector<256x1xi32>
    %28 = arith.select %25, %27, %16 : vector<256x1xi1>, vector<256x1xi32>
    %cst_15 = arith.constant 0.000000e+00 : f32
    %29 = vector.broadcast %cst_15 : f32 to vector<256x4xf32>
    %30 = vector.extract_strided_slice %11 {offsets = [15, 0], sizes = [256, 4], strides = [1, 1]} : vector<320x4xf32> to vector<256x4xf32>
    %c1_i32_16 = arith.constant 1 : i32
    %31 = vector.broadcast %c1_i32_16 : i32 to vector<256x1xi32>
    %32 = arith.cmpi sge, %28, %31 : vector<256x1xi32>
    %cst_17 = arith.constant 0.000000e+00 : f32
    %33 = vector.shape_cast %32 : vector<256x1xi1> to vector<256x1xi1>
    %34 = vector.broadcast %33 : vector<256x1xi1> to vector<256x4xi1>
    %35 = vector.broadcast %cst_17 : f32 to vector<256x4xf32>
    %36 = arith.select %34, %30, %35 : vector<256x4xi1>, vector<256x4xf32>
    %c0_18 = arith.constant 0 : index
    %c0_19 = arith.constant 0 : index
    %c0_20 = arith.constant 0 : index
    %c0_21 = arith.constant 0 : index
    %37 = vector.load %arg4[%c0_18, %c0_19, %c0_20, %c0_21] : memref<3x3x4x4xf32, #tpu.memory_space<vmem>>, vector<1x1x4x4xf32>
    %38 = vector.shape_cast %37 : vector<1x1x4x4xf32> to vector<4x4xf32>
    %cst_22 = arith.constant dense<0.000000e+00> : vector<256x4xf32>
    %39 = tpu.matmul %36, %38, %cst_22 {dimension_numbers = #tpu.dot_dimension_numbers<[1], [0], [0], [1], [0, 0, 1, 1], [], []>} : vector<256x4xf32>, vector<4x4xf32>, vector<256x4xf32> -> vector<256x4xf32>
    %40 = arith.addf %29, %39 : vector<256x4xf32>
    %41 = vector.extract_strided_slice %11 {offsets = [16, 0], sizes = [256, 4], strides = [1, 1]} : vector<320x4xf32> to vector<256x4xf32>
    %c0_23 = arith.constant 0 : index
    %c1 = arith.constant 1 : index
    %c0_24 = arith.constant 0 : index
    %c0_25 = arith.constant 0 : index
    %42 = vector.load %arg4[%c0_23, %c1, %c0_24, %c0_25] : memref<3x3x4x4xf32, #tpu.memory_space<vmem>>, vector<1x1x4x4xf32>
    %43 = vector.shape_cast %42 : vector<1x1x4x4xf32> to vector<4x4xf32>
    %cst_26 = arith.constant dense<0.000000e+00> : vector<256x4xf32>
    %44 = tpu.matmul %41, %43, %cst_26 {dimension_numbers = #tpu.dot_dimension_numbers<[1], [0], [0], [1], [0, 0, 1, 1], [], []>} : vector<256x4xf32>, vector<4x4xf32>, vector<256x4xf32> -> vector<256x4xf32>
    %45 = arith.addf %40, %44 : vector<256x4xf32>
    %46 = vector.extract_strided_slice %11 {offsets = [17, 0], sizes = [256, 4], strides = [1, 1]} : vector<320x4xf32> to vector<256x4xf32>
    %c14_i32 = arith.constant 14 : i32
    %47 = vector.broadcast %c14_i32 : i32 to vector<256x1xi32>
    %48 = arith.cmpi sle, %28, %47 : vector<256x1xi32>
    %cst_27 = arith.constant 0.000000e+00 : f32
    %49 = vector.shape_cast %48 : vector<256x1xi1> to vector<256x1xi1>
    %50 = vector.broadcast %49 : vector<256x1xi1> to vector<256x4xi1>
    %51 = vector.broadcast %cst_27 : f32 to vector<256x4xf32>
    %52 = arith.select %50, %46, %51 : vector<256x4xi1>, vector<256x4xf32>
    %c0_28 = arith.constant 0 : index
    %c2 = arith.constant 2 : index
    %c0_29 = arith.constant 0 : index
    %c0_30 = arith.constant 0 : index
    %53 = vector.load %arg4[%c0_28, %c2, %c0_29, %c0_30] : memref<3x3x4x4xf32, #tpu.memory_space<vmem>>, vector<1x1x4x4xf32>
    %54 = vector.shape_cast %53 : vector<1x1x4x4xf32> to vector<4x4xf32>
    %cst_31 = arith.constant dense<0.000000e+00> : vector<256x4xf32>
    %55 = tpu.matmul %52, %54, %cst_31 {dimension_numbers = #tpu.dot_dimension_numbers<[1], [0], [0], [1], [0, 0, 1, 1], [], []>} : vector<256x4xf32>, vector<4x4xf32>, vector<256x4xf32> -> vector<256x4xf32>
    %56 = arith.addf %45, %55 : vector<256x4xf32>
    %57 = vector.extract_strided_slice %11 {offsets = [31, 0], sizes = [256, 4], strides = [1, 1]} : vector<320x4xf32> to vector<256x4xf32>
    %c1_i32_32 = arith.constant 1 : i32
    %58 = vector.broadcast %c1_i32_32 : i32 to vector<256x1xi32>
    %59 = arith.cmpi sge, %28, %58 : vector<256x1xi32>
    %cst_33 = arith.constant 0.000000e+00 : f32
    %60 = vector.shape_cast %59 : vector<256x1xi1> to vector<256x1xi1>
    %61 = vector.broadcast %60 : vector<256x1xi1> to vector<256x4xi1>
    %62 = vector.broadcast %cst_33 : f32 to vector<256x4xf32>
    %63 = arith.select %61, %57, %62 : vector<256x4xi1>, vector<256x4xf32>
    %c1_34 = arith.constant 1 : index
    %c0_35 = arith.constant 0 : index
    %c0_36 = arith.constant 0 : index
    %c0_37 = arith.constant 0 : index
    %64 = vector.load %arg4[%c1_34, %c0_35, %c0_36, %c0_37] : memref<3x3x4x4xf32, #tpu.memory_space<vmem>>, vector<1x1x4x4xf32>
    %65 = vector.shape_cast %64 : vector<1x1x4x4xf32> to vector<4x4xf32>
    %cst_38 = arith.constant dense<0.000000e+00> : vector<256x4xf32>
    %66 = tpu.matmul %63, %65, %cst_38 {dimension_numbers = #tpu.dot_dimension_numbers<[1], [0], [0], [1], [0, 0, 1, 1], [], []>} : vector<256x4xf32>, vector<4x4xf32>, vector<256x4xf32> -> vector<256x4xf32>
    %67 = arith.addf %56, %66 : vector<256x4xf32>
    %68 = vector.extract_strided_slice %11 {offsets = [32, 0], sizes = [256, 4], strides = [1, 1]} : vector<320x4xf32> to vector<256x4xf32>
    %c1_39 = arith.constant 1 : index
    %c1_40 = arith.constant 1 : index
    %c0_41 = arith.constant 0 : index
    %c0_42 = arith.constant 0 : index
    %69 = vector.load %arg4[%c1_39, %c1_40, %c0_41, %c0_42] : memref<3x3x4x4xf32, #tpu.memory_space<vmem>>, vector<1x1x4x4xf32>
    %70 = vector.shape_cast %69 : vector<1x1x4x4xf32> to vector<4x4xf32>
    %cst_43 = arith.constant dense<0.000000e+00> : vector<256x4xf32>
    %71 = tpu.matmul %68, %70, %cst_43 {dimension_numbers = #tpu.dot_dimension_numbers<[1], [0], [0], [1], [0, 0, 1, 1], [], []>} : vector<256x4xf32>, vector<4x4xf32>, vector<256x4xf32> -> vector<256x4xf32>
    %72 = arith.addf %67, %71 : vector<256x4xf32>
    %73 = vector.extract_strided_slice %11 {offsets = [33, 0], sizes = [256, 4], strides = [1, 1]} : vector<320x4xf32> to vector<256x4xf32>
    %c14_i32_44 = arith.constant 14 : i32
    %74 = vector.broadcast %c14_i32_44 : i32 to vector<256x1xi32>
    %75 = arith.cmpi sle, %28, %74 : vector<256x1xi32>
    %cst_45 = arith.constant 0.000000e+00 : f32
    %76 = vector.shape_cast %75 : vector<256x1xi1> to vector<256x1xi1>
    %77 = vector.broadcast %76 : vector<256x1xi1> to vector<256x4xi1>
    %78 = vector.broadcast %cst_45 : f32 to vector<256x4xf32>
    %79 = arith.select %77, %73, %78 : vector<256x4xi1>, vector<256x4xf32>
    %c1_46 = arith.constant 1 : index
    %c2_47 = arith.constant 2 : index
    %c0_48 = arith.constant 0 : index
    %c0_49 = arith.constant 0 : index
    %80 = vector.load %arg4[%c1_46, %c2_47, %c0_48, %c0_49] : memref<3x3x4x4xf32, #tpu.memory_space<vmem>>, vector<1x1x4x4xf32>
    %81 = vector.shape_cast %80 : vector<1x1x4x4xf32> to vector<4x4xf32>
    %cst_50 = arith.constant dense<0.000000e+00> : vector<256x4xf32>
    %82 = tpu.matmul %79, %81, %cst_50 {dimension_numbers = #tpu.dot_dimension_numbers<[1], [0], [0], [1], [0, 0, 1, 1], [], []>} : vector<256x4xf32>, vector<4x4xf32>, vector<256x4xf32> -> vector<256x4xf32>
    %83 = arith.addf %72, %82 : vector<256x4xf32>
    %84 = vector.extract_strided_slice %11 {offsets = [47, 0], sizes = [256, 4], strides = [1, 1]} : vector<320x4xf32> to vector<256x4xf32>
    %c1_i32_51 = arith.constant 1 : i32
    %85 = vector.broadcast %c1_i32_51 : i32 to vector<256x1xi32>
    %86 = arith.cmpi sge, %28, %85 : vector<256x1xi32>
    %cst_52 = arith.constant 0.000000e+00 : f32
    %87 = vector.shape_cast %86 : vector<256x1xi1> to vector<256x1xi1>
    %88 = vector.broadcast %87 : vector<256x1xi1> to vector<256x4xi1>
    %89 = vector.broadcast %cst_52 : f32 to vector<256x4xf32>
    %90 = arith.select %88, %84, %89 : vector<256x4xi1>, vector<256x4xf32>
    %c2_53 = arith.constant 2 : index
    %c0_54 = arith.constant 0 : index
    %c0_55 = arith.constant 0 : index
    %c0_56 = arith.constant 0 : index
    %91 = vector.load %arg4[%c2_53, %c0_54, %c0_55, %c0_56] : memref<3x3x4x4xf32, #tpu.memory_space<vmem>>, vector<1x1x4x4xf32>
    %92 = vector.shape_cast %91 : vector<1x1x4x4xf32> to vector<4x4xf32>
    %cst_57 = arith.constant dense<0.000000e+00> : vector<256x4xf32>
    %93 = tpu.matmul %90, %92, %cst_57 {dimension_numbers = #tpu.dot_dimension_numbers<[1], [0], [0], [1], [0, 0, 1, 1], [], []>} : vector<256x4xf32>, vector<4x4xf32>, vector<256x4xf32> -> vector<256x4xf32>
    %94 = arith.addf %83, %93 : vector<256x4xf32>
    %95 = vector.extract_strided_slice %11 {offsets = [48, 0], sizes = [256, 4], strides = [1, 1]} : vector<320x4xf32> to vector<256x4xf32>
    %c2_58 = arith.constant 2 : index
    %c1_59 = arith.constant 1 : index
    %c0_60 = arith.constant 0 : index
    %c0_61 = arith.constant 0 : index
    %96 = vector.load %arg4[%c2_58, %c1_59, %c0_60, %c0_61] : memref<3x3x4x4xf32, #tpu.memory_space<vmem>>, vector<1x1x4x4xf32>
    %97 = vector.shape_cast %96 : vector<1x1x4x4xf32> to vector<4x4xf32>
    %cst_62 = arith.constant dense<0.000000e+00> : vector<256x4xf32>
    %98 = tpu.matmul %95, %97, %cst_62 {dimension_numbers = #tpu.dot_dimension_numbers<[1], [0], [0], [1], [0, 0, 1, 1], [], []>} : vector<256x4xf32>, vector<4x4xf32>, vector<256x4xf32> -> vector<256x4xf32>
    %99 = arith.addf %94, %98 : vector<256x4xf32>
    %100 = vector.extract_strided_slice %11 {offsets = [49, 0], sizes = [256, 4], strides = [1, 1]} : vector<320x4xf32> to vector<256x4xf32>
    %c14_i32_63 = arith.constant 14 : i32
    %101 = vector.broadcast %c14_i32_63 : i32 to vector<256x1xi32>
    %102 = arith.cmpi sle, %28, %101 : vector<256x1xi32>
    %cst_64 = arith.constant 0.000000e+00 : f32
    %103 = vector.shape_cast %102 : vector<256x1xi1> to vector<256x1xi1>
    %104 = vector.broadcast %103 : vector<256x1xi1> to vector<256x4xi1>
    %105 = vector.broadcast %cst_64 : f32 to vector<256x4xf32>
    %106 = arith.select %104, %100, %105 : vector<256x4xi1>, vector<256x4xf32>
    %c2_65 = arith.constant 2 : index
    %c2_66 = arith.constant 2 : index
    %c0_67 = arith.constant 0 : index
    %c0_68 = arith.constant 0 : index
    %107 = vector.load %arg4[%c2_65, %c2_66, %c0_67, %c0_68] : memref<3x3x4x4xf32, #tpu.memory_space<vmem>>, vector<1x1x4x4xf32>
    %108 = vector.shape_cast %107 : vector<1x1x4x4xf32> to vector<4x4xf32>
    %cst_69 = arith.constant dense<0.000000e+00> : vector<256x4xf32>
    %109 = tpu.matmul %106, %108, %cst_69 {dimension_numbers = #tpu.dot_dimension_numbers<[1], [0], [0], [1], [0, 0, 1, 1], [], []>} : vector<256x4xf32>, vector<4x4xf32>, vector<256x4xf32> -> vector<256x4xf32>
    %110 = arith.addf %99, %109 : vector<256x4xf32>
    %c0_70 = arith.constant 0 : index
    %c0_71 = arith.constant 0 : index
    %111 = vector.load %arg5[%c0_70, %c0_71] : memref<1x4xf32, #tpu.memory_space<vmem>>, vector<1x4xf32>
    %112 = vector.broadcast %111 : vector<1x4xf32> to vector<256x4xf32>
    %113 = arith.addf %110, %112 : vector<256x4xf32>
    %cst_72 = arith.constant 0.000000e+00 : f32
    %114 = vector.broadcast %cst_72 : f32 to vector<256x4xf32>
    %115 = arith.maximumf %113, %114 : vector<256x4xf32>
    %c0_73 = arith.constant 0 : index
    %c0_74 = arith.constant 0 : index
    %116 = vector.load %arg6[%c0_73, %c0_74] : memref<4x16xf32, #tpu.memory_space<vmem>>, vector<4x16xf32>
    %cst_75 = arith.constant dense<0.000000e+00> : vector<256x16xf32>
    %117 = tpu.matmul %115, %116, %cst_75 {dimension_numbers = #tpu.dot_dimension_numbers<[1], [0], [0], [1], [0, 0, 1, 1], [], []>} : vector<256x4xf32>, vector<4x16xf32>, vector<256x16xf32> -> vector<256x16xf32>
    %c0_76 = arith.constant 0 : index
    %c0_77 = arith.constant 0 : index
    %118 = vector.load %arg7[%c0_76, %c0_77] : memref<1x16xf32, #tpu.memory_space<vmem>>, vector<1x16xf32>
    %119 = vector.broadcast %118 : vector<1x16xf32> to vector<256x16xf32>
    %120 = arith.addf %117, %119 : vector<256x16xf32>
    %121 = arith.addf %120, %0 : vector<256x16xf32>
    %cst_78 = arith.constant 0.000000e+00 : f32
    %122 = vector.broadcast %cst_78 : f32 to vector<256x16xf32>
    %123 = arith.maximumf %121, %122 : vector<256x16xf32>
    %c0_79 = arith.constant 0 : index
    %c0_80 = arith.constant 0 : index
    %124 = vector.load %arg8[%c0_79, %c0_80] : memref<256x16xf32, #tpu.memory_space<vmem>>, vector<256x16xf32>
    tpu.vector_store %arg8[%c0_79, %c0_80], %123 {strides = array<i32>} : memref<256x16xf32, #tpu.memory_space<vmem>>, vector<256x16xf32>,
    return
  }
  func.func @transform_0(%arg0: i32) -> (i32, i32) {
    %c0_i32 = arith.constant 0 : i32
    %c0_i32_0 = arith.constant 0 : i32
    return %arg0, %c0_i32 : i32, i32
  }
  func.func @transform_1(%arg0: i32) -> (i32, i32) {
    %c0_i32 = arith.constant 0 : i32
    %c0_i32_0 = arith.constant 0 : i32
    %c0_i32_1 = arith.constant 0 : i32
    return %c0_i32, %c0_i32_0 : i32, i32
  }
  func.func @transform_2(%arg0: i32) -> (i32, i32) {
    %c0_i32 = arith.constant 0 : i32
    %c0_i32_0 = arith.constant 0 : i32
    %c0_i32_1 = arith.constant 0 : i32
    return %c0_i32, %c0_i32_0 : i32, i32
  }
  func.func @transform_3(%arg0: i32) -> (i32, i32, i32, i32) {
    %c0_i32 = arith.constant 0 : i32
    %c0_i32_0 = arith.constant 0 : i32
    %c0_i32_1 = arith.constant 0 : i32
    %c0_i32_2 = arith.constant 0 : i32
    %c0_i32_3 = arith.constant 0 : i32
    return %c0_i32, %c0_i32_0, %c0_i32_1, %c0_i32_2 : i32, i32, i32, i32
  }
  func.func @transform_4(%arg0: i32) -> (i32, i32) {
    %c0_i32 = arith.constant 0 : i32
    %c0_i32_0 = arith.constant 0 : i32
    %c0_i32_1 = arith.constant 0 : i32
    return %c0_i32, %c0_i32_0 : i32, i32
  }
  func.func @transform_5(%arg0: i32) -> (i32, i32) {
    %c0_i32 = arith.constant 0 : i32
    %c0_i32_0 = arith.constant 0 : i32
    %c0_i32_1 = arith.constant 0 : i32
    return %c0_i32, %c0_i32_0 : i32, i32
  }
  func.func @transform_6(%arg0: i32) -> (i32, i32) {
    %c0_i32 = arith.constant 0 : i32
    %c0_i32_0 = arith.constant 0 : i32
    %c0_i32_1 = arith.constant 0 : i32
    return %c0_i32, %c0_i32_0 : i32, i32
  }
  func.func @transform_7(%arg0: i32) -> (i32, i32) {
    %c0_i32 = arith.constant 0 : i32
    %c0_i32_0 = arith.constant 0 : i32
    return %arg0, %c0_i32 : i32, i32
  }
}

</mosaic_0001>

<bundles_post_ra>
// kernel: tpu_custom_call.1
= control target key start
LH: loop header
LB: loop body
LE: loop exit
PB: predicated region body
PF: predicated region fallthrough
CT: control target
= control target key end

     0   :  { %s6765_s24 = smov 0   ;;  %s9700_s0 = inlined_call_operand.vmem [shape: f32[512,16], index: 0, kind: input, shape index: {}]   ;;  %s9701_s1 = inlined_call_operand.vmem [shape: f32[16,4], index: 1, kind: input, shape index: {}]   ;;  %s9702_s2 = inlined_call_operand.vmem [shape: f32[1,4], index: 2, kind: input, shape index: {}]   ;;  %s9703_s3 = inlined_call_operand.vmem [shape: f32[3,3,4,4], index: 3, kind: input, shape index: {}]   ;;  %s9704_s4 = inlined_call_operand.vmem [shape: f32[1,4], index: 4, kind: input, shape index: {}]   ;;  %s9705_s5 = inlined_call_operand.vmem [shape: f32[4,16], index: 5, kind: input, shape index: {}]   ;;  %s9706_s6 = inlined_call_operand.vmem [shape: f32[1,16], index: 6, kind: input, shape index: {}]   ;;  %s9707_s7 = inlined_call_operand.vmem [shape: f32[512,16], index: 7, kind: output, shape index: {}]  }
   0x1 LB: > { %s5344_s25 = sadd.s32 4294967295, %s6722_s24   ;;  %p5348_p0 = scmp.ge.s32.totalorder %s6722_s24, 1  ;;  %s6722_s24 = sphi %s6765_s24, %s17_s24  }
   0x2   : > { %p238_p1 = scmp.lt.s32.totalorder %s6722_s24, 3 }
   0x4   : > { %p239_p2 = pnand %p5348_p0, %p238_p1 }
   0x6   : > { %242 = sbr.rel (%p239_p2) target bundleno = 972 (0x3cc), region = 48 }
   0xb   : > { %v315_v0 = vld [vmem:[%s9701_s1 + $0x8] sm:$0xff]  ;;  %v314_v1 = vld [vmem:[%s9701_s1] sm:$0xff]  ;;  %s5349_s30 = sshll.u32 %s5344_s25, 5  ;;  %vm9737_vm0 = vcmask 1043456   ;;  %vm9736_vm1 = vcmask 130048   ;;  %vm9763_vm2 = vcmask 31744   ;;  %v788_v51 = vlaneseq }
   0xc   : > { %6092 = vmatprep.subr.mxu0 %v315_v0  ;;  %p271_p3 = scmp.lt.s32.totalorder %s5349_s30, 63  ;;  %v5386_v2 = vld [vmem:[%s9703_s3 + $0x4] sm:$0xf]  ;;  %v6724_v35 = vmov 0.0   ;;  %v5453_v40 = vld [vmem:[%s9703_s3 + $0x8] sm:$0xf] }
   0xd   : > { %6093 = vmatpush3.msra.mxu0 %v315_v0  ;;  %6644 = vmatprep.subr.msk.mxu1 %vm9737_vm0, %v5386_v2  ;;  %683 = vst.msk [vmem:[#allocation2 + $0x28] sm:$0xff] %vm9763_vm2, %v6724_v35  ;;  %679 = vst.msk [vmem:[#allocation2 + $0x8] sm:$0xff] %vm9763_vm2, %v6724_v35  ;;  %vm9754_vm3 = vcmask 1046528   ;;  %v6921_v42 = vld [vmem:[%s9703_s3] sm:$0xf]  ;;  %vm9751_vm4 = vcmask 1040384  }
   0xe   : > { %6094 = vmatprep.subr.mxu0 %v314_v1  ;;  %s10869_s30 = smov (!%p271_p3, %s5349_s30), 63  ;;  %6645 = vmatpush3.msk.msra.mxu1 %vm9737_vm0, %v5386_v2  ;;  %680 = vst.msk [vmem:[#allocation2 + $0x10] sm:$0xff] %vm9763_vm2, %v6724_v35  ;;  %681 = vst.msk [vmem:[#allocation2 + $0x18] sm:$0xff] %vm9763_vm2, %v6724_v35  ;;  %v6937_v46 = vld [vmem:[%s9703_s3 + $0x10] sm:$0xf]  ;;  %v6950_v58 = vshrl.u32 %v788_v51, 7 }
   0xf   : > { %6095 = vmatpush3.msra.mxu0 %v314_v1  ;;  %s5350_s10 = sshll.u32 %s10869_s30, 3  ;;  %682 = vst.msk [vmem:[#allocation2 + $0x20] sm:$0xff] %vm9763_vm2, %v6724_v35  ;;  %684 = vst.msk [vmem:[#allocation2 + $0x30] sm:$0xff] %vm9763_vm2, %v6724_v35  ;;  %6194 = vmatprep.subr.msk.mxu1 %vm9737_vm0, %v6921_v42  ;;  %v6944_v47 = vld [vmem:[%s9702_s2] ss:$0 sm:$0xff] }
  0x10   : > { %6144 = vmatprep.subr.msk.mxu0 %vm9737_vm0, %v5386_v2  ;;  %s6793_s13 = scalar_lea.vmem %s9700_s0, %s5350_s10  ;;  %685 = vst.msk [vmem:[#allocation2 + $0x38] sm:$0xff] %vm9763_vm2, %v6724_v35  ;;  %686 = vst.msk [vmem:[#allocation2 + $0x40] sm:$0xff] %vm9763_vm2, %v6724_v35  ;;  %v790_v1 = vadd.s32 8, %v6950_v58  ;;  %v7028_v51 = vadd.s32 64, %v6950_v58  ;;  %s9570_s21 = scalar_lea.vmem %s9707_s7, %s5350_s10 }
  0x11   : > { %v282_v3 = vld [vmem:[%s6793_s13] sm:$0xff]  ;;  %v283_v4 = vld [vmem:[%s6793_s13 + $0x8] sm:$0xff]  ;;  %v284_v5 = vld [vmem:[%s6793_s13 + $0x10] sm:$0xff]  ;;  %687 = vst.msk [vmem:[#allocation2 + $0x48] sm:$0xff] %vm9763_vm2, %v6724_v35 }
  0x12   : > { %6096 = vmatprep.mubr.msk.f32.mxu0 %vm9736_vm1, %v282_v3  ;;  %v285_v6 = vld [vmem:[%s6793_s13 + $0x18] sm:$0xff]  ;;  %v286_v7 = vld [vmem:[%s6793_s13 + $0x20] sm:$0xff]  ;;  %v287_v8 = vld [vmem:[%s6793_s13 + $0x28] sm:$0xff]  ;;  %688 = vst.msk [vmem:[#allocation2 + $0x50] sm:$0xff] %vm9763_vm2, %v6724_v35 }
  0x13   : > { %6097 = vmatmul.mubr.msk.f32.vlgmr.msra.gmra.mxu0 %vm9736_vm1, %v283_v4  ;;  %v288_v9 = vld [vmem:[%s6793_s13 + $0x30] sm:$0xff]  ;;  %v289_v10 = vld [vmem:[%s6793_s13 + $0x38] sm:$0xff]  ;;  %v290_v11 = vld [vmem:[%s6793_s13 + $0x40] sm:$0xff]  ;;  %689 = vst.msk [vmem:[#allocation2 + $0x58] sm:$0xff] %vm9763_vm2, %v6724_v35 }
  0x14   : > { %6099 = vmatprep.mubr.msk.f32.mxu0 %vm9736_vm1, %v284_v5  ;;  %6145 = vmatpush3.msk.msra.mxu0 %vm9737_vm0, %v5386_v2  ;;  %v291_v12 = vld [vmem:[%s6793_s13 + $0x48] sm:$0xff]  ;;  %v292_v13 = vld [vmem:[%s6793_s13 + $0x50] sm:$0xff]  ;;  %v293_v14 = vld [vmem:[%s6793_s13 + $0x58] sm:$0xff]  ;;  %690 = vst.msk [vmem:[#allocation2 + $0x60] sm:$0xff] %vm9763_vm2, %v6724_v35 }
  0x15   : > { %v294_v15 = vld [vmem:[%s6793_s13 + $0x60] sm:$0xff]  ;;  %v295_v16 = vld [vmem:[%s6793_s13 + $0x68] sm:$0xff]  ;;  %v296_v17 = vld [vmem:[%s6793_s13 + $0x70] sm:$0xff]  ;;  %691 = vst.msk [vmem:[#allocation2 + $0x68] sm:$0xff] %vm9763_vm2, %v6724_v35  ;;  %6244 = vmatprep.subr.msk.mxu0 %vm9737_vm0, %v5453_v40 }
  0x16   : > { %v297_v18 = vld [vmem:[%s6793_s13 + $0x78] sm:$0xff]  ;;  %v298_v19 = vld [vmem:[%s6793_s13 + $0x80] sm:$0xff]  ;;  %v299_v20 = vld [vmem:[%s6793_s13 + $0x88] sm:$0xff]  ;;  %692 = vst.msk [vmem:[#allocation2 + $0x70] sm:$0xff] %vm9763_vm2, %v6724_v35 }
  0x17   : > { %6100 = vmatmul.mubr.msk.f32.gmra.mxu0 %vm9736_vm1, %v285_v6  ;;  %v300_v21 = vld [vmem:[%s6793_s13 + $0x90] sm:$0xff]  ;;  %v301_v22 = vld [vmem:[%s6793_s13 + $0x98] sm:$0xff]  ;;  %v302_v23 = vld [vmem:[%s6793_s13 + $0xa0] sm:$0xff]  ;;  %693 = vst.msk [vmem:[#allocation2 + $0x78] sm:$0xff] %vm9763_vm2, %v6724_v35 }
  0x18   : > { %6102 = vmatprep.mubr.msk.f32.mxu0 %vm9736_vm1, %v286_v7  ;;  %v303_v24 = vld [vmem:[%s6793_s13 + $0xa8] sm:$0xff]  ;;  %v304_v25 = vld [vmem:[%s6793_s13 + $0xb0] sm:$0xff]  ;;  %v305_v26 = vld [vmem:[%s6793_s13 + $0xb8] sm:$0xff]  ;;  %694 = vst.msk [vmem:[#allocation2 + $0x80] sm:$0xff] %vm9763_vm2, %v6724_v35 }
  0x19   : > { %v306_v27 = vld [vmem:[%s6793_s13 + $0xc0] sm:$0xff]  ;;  %v307_v28 = vld [vmem:[%s6793_s13 + $0xc8] sm:$0xff]  ;;  %v308_v29 = vld [vmem:[%s6793_s13 + $0xd0] sm:$0xff]  ;;  %695 = vst.msk [vmem:[#allocation2 + $0x88] sm:$0xff] %vm9763_vm2, %v6724_v35 }
  0x1a   : > { %v309_v30 = vld [vmem:[%s6793_s13 + $0xd8] sm:$0xff]  ;;  %v310_v31 = vld [vmem:[%s6793_s13 + $0xe0] sm:$0xff]  ;;  %v311_v32 = vld [vmem:[%s6793_s13 + $0xe8] sm:$0xff]  ;;  %696 = vst.msk [vmem:[#allocation2 + $0x90] sm:$0xff] %vm9763_vm2, %v6724_v35 }
  0x1b   : > { %6103 = vmatmul.mubr.msk.f32.gmra.mxu0 %vm9736_vm1, %v287_v8  ;;  %v312_v33 = vld [vmem:[%s6793_s13 + $0xf0] sm:$0xff]  ;;  %v313_v34 = vld [vmem:[%s6793_s13 + $0xf8] sm:$0xff]  ;;  %697 = vst.msk [vmem:[#allocation2 + $0x98] sm:$0xff] %vm9763_vm2, %v6724_v35  ;;  %698 = vst.msk [vmem:[#allocation2 + $0xa0] sm:$0xff] %vm9763_vm2, %v6724_v35 }
  0x1c   : > { %6105 = vmatprep.mubr.msk.f32.mxu0 %vm9736_vm1, %v288_v9  ;;  %699 = vst.msk [vmem:[#allocation2 + $0xa8] sm:$0xff] %vm9763_vm2, %v6724_v35  ;;  %700 = vst.msk [vmem:[#allocation2 + $0xb0] sm:$0xff] %vm9763_vm2, %v6724_v35  ;;  %v6898_v36 = vld [vmem:[#allocation2 + $0x10] sm:$0xff]  ;;  %v6902_v37 = vld [vmem:[#allocation2 + $0x18] sm:$0xff]  ;;  %v832_v9 = vand.u32 15, %v790_v1 }
  0x1d   : > { %701 = vst.msk [vmem:[#allocation2 + $0xb8] sm:$0xff] %vm9763_vm2, %v6724_v35  ;;  %702 = vst.msk [vmem:[#allocation2 + $0xc0] sm:$0xff] %vm9763_vm2, %v6724_v35  ;;  %v2182_v38 = vrot.slane %v6898_v36, 1  ;;  %v2183_v39 = vrot.slane %v6902_v37, 1  ;;  %v9709_v43 = vrot.slane %v6898_v36, 7  ;;  %v9708_v44 = vrot.slane %v6902_v37, 7 }
  0x1e   : > { %703 = vst.msk [vmem:[#allocation2 + $0xc8] sm:$0xff] %vm9763_vm2, %v6724_v35  ;;  %704 = vst.msk [vmem:[#allocation2 + $0xd0] sm:$0xff] %vm9763_vm2, %v6724_v35  ;;  %vm6981_vm5 = vcmp.le.s32.totalorder %v832_v9, 14  ;;  %v7068_v9 = vadd.s32 104, %v6950_v58 }
  0x1f   : > { %6106 = vmatmul.mubr.msk.f32.gmra.mxu0 %vm9736_vm1, %v289_v10  ;;  %705 = vst.msk [vmem:[#allocation2 + $0xd8] sm:$0xff] %vm9763_vm2, %v6724_v35  ;;  %706 = vst.msk [vmem:[#allocation2 + $0xe0] sm:$0xff] %vm9763_vm2, %v6724_v35  ;;  %v6915_v41 = vsel %vm9754_vm3, %v2182_v38, %v2183_v39  ;;  %v6932_v45 = vsel %vm9751_vm4, %v9709_v43, %v9708_v44  ;;  %v6964_v10 = vadd.s32 16, %v6950_v58  ;;  %v7017_v38 = vadd.s32 56, %v6950_v58 }
  0x20   : > { %6108 = vmatprep.mubr.msk.f32.mxu0 %vm9736_vm1, %v290_v11  ;;  %707 = vst.msk [vmem:[#allocation2 + $0xe8] sm:$0xff] %vm9763_vm2, %v6724_v35  ;;  %708 = vst.msk [vmem:[#allocation2 + $0xf0] sm:$0xff] %vm9763_vm2, %v6724_v35 }
  0x21   : > { %709 = vst.msk [vmem:[#allocation2 + $0xf8] sm:$0xff] %vm9763_vm2, %v6724_v35  ;;  %710 = vst.msk [vmem:[#allocation2 + $0x100] sm:$0xff] %vm9763_vm2, %v6724_v35 }
  0x22   : > { %711 = vst.msk [vmem:[#allocation2 + $0x108] sm:$0xff] %vm9763_vm2, %v6724_v35  ;;  %712 = vst.msk [vmem:[#allocation2 + $0x110] sm:$0xff] %vm9763_vm2, %v6724_v35 }
  0x23   : > { %6109 = vmatmul.mubr.msk.f32.gmra.mxu0 %vm9736_vm1, %v291_v12  ;;  %713 = vst.msk [vmem:[#allocation2 + $0x118] sm:$0xff] %vm9763_vm2, %v6724_v35  ;;  %714 = vst.msk [vmem:[#allocation2 + $0x120] sm:$0xff] %vm9763_vm2, %v6724_v35 }
  0x24   : > { %6111 = vmatprep.mubr.msk.f32.mxu0 %vm9736_vm1, %v292_v13  ;;  %715 = vst.msk [vmem:[#allocation2 + $0x128] sm:$0xff] %vm9763_vm2, %v6724_v35  ;;  %716 = vst.msk [vmem:[#allocation2 + $0x130] sm:$0xff] %vm9763_vm2, %v6724_v35 }
  0x25   : > { %9957 = vst [vmem:[#allocation3_spill] sm:$0xff] %v6950_v58 }
  0x27   : > { %6112 = vmatmul.mubr.msk.f32.gmra.mxu0 %vm9736_vm1, %v293_v14 }
  0x28   : > { %6114 = vmatprep.mubr.msk.f32.mxu0 %vm9736_vm1, %v294_v15  ;;  %v6975_v15 = vadd.s32 24, %v6950_v58 }
  0x2b   : > { %6115 = vmatmul.mubr.msk.f32.gmra.mxu0 %vm9736_vm1, %v295_v16 }
  0x2c   : > { %6117 = vmatprep.mubr.msk.f32.mxu0 %vm9736_vm1, %v296_v17 }
  0x2f   : > { %6118 = vmatmul.mubr.msk.f32.gmra.mxu0 %vm9736_vm1, %v297_v18 }
  0x30   : > { %6120 = vmatprep.mubr.msk.f32.mxu0 %vm9736_vm1, %v298_v19 }
  0x33   : > { %6121 = vmatmul.mubr.msk.f32.gmra.mxu0 %vm9736_vm1, %v299_v20  ;;  %v9959_v20 = vmov 0 }
  0x34   : > { %6123 = vmatprep.mubr.msk.f32.mxu0 %vm9736_vm1, %v300_v21  ;;  %v9960_v20 = vsel %vm6981_vm5, 4294967295, %v9959_v20  ;;  %v9984_v21 = vmov 0 }
  0x35   : > { %9961 = vst [vmem:[#allocation5_spill] sm:$0xff] %v9960_v20 }
  0x37   : > { %6124 = vmatmul.mubr.msk.f32.gmra.mxu0 %vm9736_vm1, %v301_v22  ;;  %v839_v22 = vand.u32 15, %v6964_v10  ;;  %v881_v10 = vand.u32 15, %v7028_v51 }
  0x38   : > { %6126 = vmatprep.mubr.msk.f32.mxu0 %vm9736_vm1, %v302_v23 }
  0x39   : > { %vm7078_vm6 = vcmp.ge.s32.totalorder %v839_v22, 1  ;;  %vm7234_vm12 = vcmp.ge.s32.totalorder %v881_v10, 1  ;;  %v7252_v10 = vld [vmem:[%s9703_s3 + $0x18] sm:$0xf] }
  0x3a   : > { %9997 = vst [vmem:[#allocation27_spill] sm:$0xff] %v7252_v10 }
  0x3b   : > { %6127 = vmatmul.mubr.msk.f32.gmra.mxu0 %vm9736_vm1, %v303_v24 }
  0x3c   : > { %6129 = vmatprep.mubr.msk.f32.mxu0 %vm9736_vm1, %v304_v25 }
  0x3f   : > { %6130 = vmatmul.mubr.msk.f32.gmra.mxu0 %vm9736_vm1, %v305_v26 }
  0x40   : > { %6132 = vmatprep.mubr.msk.f32.mxu0 %vm9736_vm1, %v306_v27 }
  0x43   : > { %6133 = vmatmul.mubr.msk.f32.gmra.mxu0 %vm9736_vm1, %v307_v28 }
  0x44   : > { %6135 = vmatprep.mubr.msk.f32.mxu0 %vm9736_vm1, %v308_v29  ;;  %v846_v29 = vand.u32 15, %v6975_v15 }
  0x46   : > { %vm7130_vm8 = vcmp.le.s32.totalorder %v846_v29, 14 }
  0x47   : > { %6136 = vmatmul.mubr.msk.f32.gmra.mxu0 %vm9736_vm1, %v309_v30  ;;  %v6999_v30 = vadd.s32 40, %v6950_v58 }
  0x48   : > { %6138 = vmatprep.mubr.msk.f32.mxu0 %vm9736_vm1, %v310_v31  ;;  %v7002_v31 = vadd.s32 32, %v6950_v58 }
  0x4b   : > { %6139 = vmatmul.mubr.msk.f32.gmra.mxu0 %vm9736_vm1, %v311_v32  ;;  %v7005_v32 = vadd.s32 48, %v6950_v58 }
  0x4c   : > { %6141 = vmatprep.mubr.msk.f32.mxu0 %vm9736_vm1, %v312_v33 }
  0x4f   : > { %6142 = vmatmul.mubr.msk.f32.gmra.mxu0 %vm9736_vm1, %v313_v34 }
  0x50   : > { %6146 = vmatprep.mubr.msk.f32.mxu0 %vm9763_vm2, %v6898_v36 }
  0x53   : > { %6147 = vmatmul.mubr.msk.f32.vlgmr.msra.gmra.mxu0 %vm9763_vm2, %v6902_v37 }
  0x54   : > { %6245 = vmatpush3.msk.msra.mxu0 %vm9737_vm0, %v5453_v40 }
  0x55   : > { %6344 = vmatprep.subr.msk.mxu0 %vm9737_vm0, %v6937_v46 }
  0xd3   : > { %v6098_v48 = vpop.f32.mrf.mxu0 }
  0xd4   : > { %v492_v49 = vadd.f32 %v6098_v48, %v6944_v47 }
  0xd5   : > { %v486_v50 = vpop.f32.mrf.mxu0 }
  0xd6   : > { %v646_v52 = vmax.f32 %v492_v49, 0.0  ;;  %v487_v53 = vadd.f32 %v6944_v47, %v486_v50  ;;  %v7025_v50 = vadd.s32 72, %v6950_v58  ;;  %v9973_v49 = vmov 0 }
  0xd7   : > { %v6101_v54 = vpop.f32.mrf.mxu0 }
  0xd8   : > { %719 = vst.msk [vmem:[#allocation2 + $0x28] sm:$0xff] %vm9763_vm2, %v646_v52  ;;  %v645_v55 = vmax.f32 %v487_v53, 0.0  ;;  %v502_v56 = vadd.f32 %v6101_v54, %v6944_v47  ;;  %v7031_v52 = vadd.s32 80, %v6950_v58 }
  0xd9   : > { %v496_v57 = vpop.f32.mrf.mxu0 }
  0xda   : > { %718 = vst.msk [vmem:[#allocation2 + $0x20] sm:$0xff] %vm9763_vm2, %v645_v55  ;;  %v648_v59 = vmax.f32 %v502_v56, 0.0  ;;  %v497_v60 = vadd.f32 %v6944_v47, %v496_v57 }
  0xdb   : > { %v6104_v61 = vpop.f32.mrf.mxu0 }
  0xdc   : > { %721 = vst.msk [vmem:[#allocation2 + $0x38] sm:$0xff] %vm9763_vm2, %v648_v59  ;;  %v647_v62 = vmax.f32 %v497_v60, 0.0  ;;  %v512_v63 = vadd.f32 %v6104_v61, %v6944_v47  ;;  %v860_v60 = vand.u32 15, %v6999_v30  ;;  %v7045_v61 = vadd.s32 88, %v6950_v58 }
  0xdd   : > { %v506_v0 = vpop.f32.mrf.mxu0 }
  0xde   : > { %720 = vst.msk [vmem:[#allocation2 + $0x30] sm:$0xff] %vm9763_vm2, %v647_v62  ;;  %v650_v2 = vmax.f32 %v512_v63, 0.0  ;;  %v507_v3 = vadd.f32 %v6944_v47, %v506_v0  ;;  %v853_v62 = vand.u32 15, %v7002_v31  ;;  %v867_v63 = vand.u32 15, %v7005_v32 }
  0xdf   : > { %v6107_v4 = vpop.f32.mrf.mxu0  ;;  %v6970_v13 = vld [vmem:[#allocation2 + $0x28] sm:$0xff]  ;;  %v7090_v31 = vadd.s32 112, %v6950_v58  ;;  %vm7163_vm9 = vcmp.le.s32.totalorder %v860_v60, 14  ;;  %v7181_v60 = vadd.s32 184, %v6950_v58  ;;  %v7184_v32 = vadd.s32 176, %v6950_v58 }
  0xe0   : > { %723 = vst.msk [vmem:[#allocation2 + $0x48] sm:$0xff] %vm9763_vm2, %v650_v2  ;;  %v649_v5 = vmax.f32 %v507_v3, 0.0  ;;  %v522_v6 = vadd.f32 %v6107_v4, %v6944_v47  ;;  %v2187_v24 = vrot.slane %v6970_v13, 1  ;;  %v7059_v3 = vadd.s32 96, %v6950_v58 }
  0xe1   : > { %v516_v7 = vpop.f32.mrf.mxu0  ;;  %v6961_v8 = vld [vmem:[#allocation2 + $0x20] sm:$0xff]  ;;  %vm7117_vm7 = vcmp.ge.s32.totalorder %v853_v62, 1  ;;  %vm7169_vm10 = vcmp.ge.s32.totalorder %v867_v63, 1 }
  0xe2   : > { %9958 = vst [vmem:[#allocation4_spill] sm:$0xff] %v6961_v8  ;;  %722 = vst.msk [vmem:[#allocation2 + $0x40] sm:$0xff] %vm9763_vm2, %v649_v5  ;;  %v652_v11 = vmax.f32 %v522_v6, 0.0  ;;  %v517_v12 = vadd.f32 %v6944_v47, %v516_v7  ;;  %6149 = vmatprep.mubr.msk.f32.mxu0 %vm9763_vm2, %v6961_v8  ;;  %v874_v7 = vand.u32 15, %v7017_v38  ;;  %v9974_v49 = vsel %vm7117_vm7, 4294967295, %v9973_v49 }
  0xe3   : > { %v6110_v14 = vpop.f32.mrf.mxu0  ;;  %6150 = vmatmul.mubr.msk.f32.gmra.mxu0 %vm9763_vm2, %v6970_v13  ;;  %v6992_v26 = vld [vmem:[#allocation2 + $0x38] sm:$0xff]  ;;  %v2185_v43 = vrot.slane %v6961_v8, 1  ;;  %v9985_v21 = vsel %vm7169_vm10, 4294967295, %v9984_v21  ;;  %vm10064_vm10 = vcmask 1046528   ;;  %vm10083_vm7 = vcmask 1046528  }
  0xe4   : > { %725 = vst.msk [vmem:[#allocation2 + $0x58] sm:$0xff] %vm9763_vm2, %v652_v11  ;;  %v651_v16 = vmax.f32 %v517_v12, 0.0  ;;  %v532_v17 = vadd.f32 %v6110_v14, %v6944_v47  ;;  %9962 = vst [vmem:[#allocation6_spill] sm:$0xff] %v6992_v26  ;;  %v9714_v56 = vrot.slane %v6992_v26, 1  ;;  %v9712_v44 = vrot.slane %v6992_v26, 7 }
  0xe5   : > { %v526_v18 = vpop.f32.mrf.mxu0  ;;  %v6979_v19 = vld [vmem:[#allocation2 + $0x30] sm:$0xff]  ;;  %9986 = vst [vmem:[#allocation20_spill] sm:$0xff] %v9985_v21  ;;  %v2186_v30 = vsel %vm9754_vm3, %v2183_v39, %v2185_v43  ;;  %vm7223_vm11 = vcmp.le.s32.totalorder %v874_v7, 14  ;;  %v7245_v38 = vsel %vm9754_vm3, %v2185_v43, %v2187_v24 }
  0xe6   : > { %724 = vst.msk [vmem:[#allocation2 + $0x50] sm:$0xff] %vm9763_vm2, %v651_v16  ;;  %v654_v23 = vmax.f32 %v532_v17, 0.0  ;;  %v527_v25 = vadd.f32 %v6944_v47, %v526_v18  ;;  %6152 = vmatprep.mubr.msk.f32.mxu0 %vm9763_vm2, %v6979_v19  ;;  %v9713_v27 = vrot.slane %v6979_v19, 1  ;;  %v9969_v17 = vmov 0  ;;  %9996 = vst [vmem:[#allocation26_spill] sm:$0xff] %v7245_v38 }
  0xe7   : > { %v6113_v28 = vpop.f32.mrf.mxu0  ;;  %6153 = vmatmul.mubr.msk.f32.gmra.mxu0 %vm9763_vm2, %v6992_v26  ;;  %v7037_v55 = vld [vmem:[#allocation2 + $0x48] sm:$0xff]  ;;  %v9970_v17 = vsel %vm7078_vm6, 4294967295, %v9969_v17  ;;  %v9990_v16 = vmov 0 }
  0xe8   : > { %727 = vst.msk [vmem:[#allocation2 + $0x68] sm:$0xff] %vm9763_vm2, %v654_v23  ;;  %v653_v33 = vmax.f32 %v527_v25, 0.0  ;;  %v542_v34 = vadd.f32 %v6113_v28, %v6944_v47  ;;  %v7014_v35 = vsel %vm9754_vm3, %v2187_v24, %v9713_v27  ;;  %9965 = vst [vmem:[#allocation9_spill] sm:$0xff] %v7037_v55  ;;  %v7087_v28 = vadd.s32 120, %v6950_v58 }
  0xe9   : > { %9963 = vst [vmem:[#allocation7_spill] sm:$0xff] %v7014_v35  ;;  %v536_v40 = vpop.f32.mrf.mxu0  ;;  %v7019_v48 = vld [vmem:[#allocation2 + $0x40] sm:$0xff]  ;;  %v9991_v16 = vsel %vm7223_vm11, 4294967295, %v9990_v16 }
  0xea   : > { %9964 = vst [vmem:[#allocation8_spill] sm:$0xff] %v7019_v48  ;;  %726 = vst.msk [vmem:[#allocation2 + $0x60] sm:$0xff] %vm9763_vm2, %v653_v33  ;;  %v656_v53 = vmax.f32 %v542_v34, 0.0  ;;  %v537_v54 = vadd.f32 %v6944_v47, %v536_v40  ;;  %6155 = vmatprep.mubr.msk.f32.mxu0 %vm9763_vm2, %v7019_v48  ;;  %v9710_v57 = vrot.slane %v7019_v48, 1  ;;  %v7093_v33 = vadd.s32 128, %v6950_v58 }
  0xeb   : > { %v6116_v59 = vpop.f32.mrf.mxu0  ;;  %6156 = vmatmul.mubr.msk.f32.gmra.mxu0 %vm9763_vm2, %v7037_v55  ;;  %v7075_v14 = vld [vmem:[#allocation2 + $0x58] sm:$0xff]  ;;  %v9711_v40 = vrot.slane %v7019_v48, 7  ;;  %9992 = vst [vmem:[#allocation24_spill] sm:$0xff] %v9991_v16 }
  0xec   : > { %729 = vst.msk [vmem:[#allocation2 + $0x78] sm:$0xff] %vm9763_vm2, %v656_v53  ;;  %v655_v0 = vmax.f32 %v537_v54, 0.0  ;;  %v552_v1 = vadd.f32 %v6116_v59, %v6944_v47  ;;  %v7056_v2 = vsel %vm9754_vm3, %v9714_v56, %v9710_v57  ;;  %9968 = vst [vmem:[#allocation12_spill] sm:$0xff] %v7075_v14  ;;  %v9999_v24 = vrot.slane %v7075_v14, 7 }
  0xed   : > { %9966 = vst [vmem:[#allocation10_spill] sm:$0xff] %v7056_v2  ;;  %v546_v4 = vpop.f32.mrf.mxu0  ;;  %v7061_v5 = vld [vmem:[#allocation2 + $0x50] sm:$0xff]  ;;  %v7144_v15 = vsel %vm9751_vm4, %v9712_v44, %v9711_v40 }
  0xee   : > { %9967 = vst [vmem:[#allocation11_spill] sm:$0xff] %v7061_v5  ;;  %728 = vst.msk [vmem:[#allocation2 + $0x70] sm:$0xff] %vm9763_vm2, %v655_v0  ;;  %v658_v11 = vmax.f32 %v552_v1, 0.0  ;;  %v547_v12 = vadd.f32 %v6944_v47, %v546_v4  ;;  %6158 = vmatprep.mubr.msk.f32.mxu0 %vm9763_vm2, %v7061_v5  ;;  %v7103_v1 = vadd.s32 136, %v6950_v58  ;;  %v7106_v4 = vadd.s32 152, %v6950_v58 }
  0xef   : > { %v6119_v23 = vpop.f32.mrf.mxu0  ;;  %6159 = vmatmul.mubr.msk.f32.gmra.mxu0 %vm9763_vm2, %v7075_v14  ;;  %v7115_v6 = vld [vmem:[#allocation2 + $0x68] sm:$0xff]  ;;  %v7123_v0 = vadd.s32 160, %v6950_v58  ;;  %9978 = vst [vmem:[#allocation16_spill] sm:$0xff] %v7144_v15  ;;  %v9715_v29 = vrot.slane %v7061_v5, 7  ;;  %v10019_v15 = vand.u32 15, %v7059_v3  ;;  %v10025_v3 = vand.u32 15, %v7045_v61 }
  0xf0   : > { %731 = vst.msk [vmem:[#allocation2 + $0x88] sm:$0xff] %vm9763_vm2, %v658_v11  ;;  %v657_v22 = vmax.f32 %v547_v12, 0.0  ;;  %v562_v34 = vadd.f32 %v6119_v23, %v6944_v47  ;;  %v7109_v11 = vadd.s32 144, %v6950_v58  ;;  %9972 = vst [vmem:[#allocation14_spill] sm:$0xff] %v7115_v6 }
  0xf1   : > { %v556_v54 = vpop.f32.mrf.mxu0  ;;  %v7099_v59 = vld [vmem:[#allocation2 + $0x60] sm:$0xff]  ;;  %vm7356_vm15 = vcmp.ge.s32.totalorder %v10019_v15, 1  ;;  %vm7372_vm1 = vcmp.le.s32.totalorder %v10025_v3, 14  ;;  %v10026_v15 = vmov 0 }
  0xf2   : > { %9971 = vst [vmem:[#allocation13_spill] sm:$0xff] %v7099_v59  ;;  %730 = vst.msk [vmem:[#allocation2 + $0x80] sm:$0xff] %vm9763_vm2, %v657_v22  ;;  %v660_v12 = vmax.f32 %v562_v34, 0.0  ;;  %v557_v23 = vadd.f32 %v6944_v47, %v556_v54  ;;  %6161 = vmatprep.mubr.msk.f32.mxu0 %vm9763_vm2, %v7099_v59  ;;  %v9975_v34 = vmov 0  ;;  %v9981_v54 = vmov 0 }
  0xf3   : > { %v6122_v22 = vpop.f32.mrf.mxu0  ;;  %6162 = vmatmul.mubr.msk.f32.gmra.mxu0 %vm9763_vm2, %v7115_v6  ;;  %v9976_v34 = vsel %vm7130_vm8, 4294967295, %v9975_v34  ;;  %v7159_v44 = vld [vmem:[#allocation2 + $0x78] sm:$0xff]  ;;  %v9982_v54 = vsel %vm7163_vm9, 4294967295, %v9981_v54  ;;  %v9998_v43 = vrot.slane %v7099_v59, 7  ;;  %v10027_v15 = vsel %vm7372_vm1, 4294967295, %v10026_v15 }
  0xf4   : > { %9977 = vst [vmem:[#allocation15_spill] sm:$0xff] %v9976_v34  ;;  %733 = vst.msk [vmem:[#allocation2 + $0x98] sm:$0xff] %vm9763_vm2, %v660_v12  ;;  %v659_v25 = vmax.f32 %v557_v23, 0.0  ;;  %v572_v57 = vadd.f32 %v6122_v22, %v6944_v47  ;;  %v7152_v12 = vadd.s32 168, %v6950_v58 }
  0xf5   : > { %v566_v53 = vpop.f32.mrf.mxu0  ;;  %v7147_v62 = vld [vmem:[#allocation2 + $0x70] sm:$0xff]  ;;  %9980 = vst [vmem:[#allocation18_spill] sm:$0xff] %v7159_v44  ;;  %9983 = vst [vmem:[#allocation19_spill] sm:$0xff] %v9982_v54  ;;  %v7268_v7 = vsel %vm9751_vm4, %v9999_v24, %v9998_v43  ;;  %v750_v43 = vld [vmem:[#allocation2 + $0x8] sm:$0xff] }
  0xf6   : > { %9979 = vst [vmem:[#allocation17_spill] sm:$0xff] %v7147_v62  ;;  %732 = vst.msk [vmem:[#allocation2 + $0x90] sm:$0xff] %vm9763_vm2, %v659_v25  ;;  %v662_v22 = vmax.f32 %v572_v57, 0.0  ;;  %v567_v40 = vadd.f32 %v6944_v47, %v566_v53  ;;  %6164 = vmatprep.mubr.msk.f32.mxu0 %vm9763_vm2, %v7147_v62  ;;  %v9716_v57 = vrot.slane %v7037_v55, 7 }
  0xf7   : > { %v6125_v53 = vpop.f32.mrf.mxu0  ;;  %6165 = vmatmul.mubr.msk.f32.gmra.mxu0 %vm9763_vm2, %v7159_v44  ;;  %10000 = vst [vmem:[#allocation28_spill] sm:$0xff] %v7268_v7  ;;  %v2201_v7 = vrot.slane %v7099_v59, 1  ;;  %10028 = vst [vmem:[#allocation38_spill] sm:$0xff] %v10027_v15  ;;  %v10030_v59 = vmov 0 }
  0xf8   : > { %735 = vst.msk [vmem:[#allocation2 + $0xa8] sm:$0xff] %vm9763_vm2, %v662_v22  ;;  %v661_v25 = vmax.f32 %v567_v40, 0.0  ;;  %v582_v23 = vadd.f32 %v6125_v53, %v6944_v47  ;;  %6246 = vmatprep.mubr.msk.f32.mxu0 %vm9763_vm2, %v6915_v41  ;;  %v7198_v39 = vsel %vm9751_vm4, %v9716_v57, %v9715_v29  ;;  %v7205_v40 = vadd.s32 200, %v6950_v58  ;;  %v7217_v57 = vld [vmem:[#allocation2 + $0x88] sm:$0xff] }
  0xf9   : > { %9987 = vst [vmem:[#allocation21_spill] sm:$0xff] %v7198_v39  ;;  %v576_v56 = vpop.f32.mrf.mxu0  ;;  %v7201_v18 = vld [vmem:[#allocation2 + $0x80] sm:$0xff]  ;;  %v7208_v53 = vadd.s32 192, %v6950_v58  ;;  %v7211_v41 = vadd.s32 208, %v6950_v58  ;;  %9989 = vst [vmem:[#allocation23_spill] sm:$0xff] %v7217_v57  ;;  %v2280_v22 = vsel %vm6981_vm5, %v2186_v30, 0.0 }
  0xfa   : > { %9988 = vst [vmem:[#allocation22_spill] sm:$0xff] %v7201_v18  ;;  %734 = vst.msk [vmem:[#allocation2 + $0xa0] sm:$0xff] %vm9763_vm2, %v661_v25  ;;  %v664_v63 = vmax.f32 %v582_v23, 0.0  ;;  %v577_v29 = vadd.f32 %v6944_v47, %v576_v56  ;;  %6167 = vmatprep.mubr.msk.f32.mxu1 %vm9763_vm2, %v7201_v18  ;;  %v7230_v23 = vld [vmem:[%s9703_s3 + $0xc] sm:$0xf]  ;;  %v9993_v56 = vmov 0 }
  0xfb   : > { %v9994_v56 = vsel %vm7234_vm12, 4294967295, %v9993_v56  ;;  %v6128_v30 = vpop.f32.mrf.mxu0  ;;  %6168 = vmatmul.mubr.msk.f32.vlgmr.msra.gmra.mxu1 %vm9763_vm2, %v7217_v57  ;;  %6247 = vmatmul.mubr.msk.f32.vlgmr.msra.gmra.mxu0 %vm9763_vm2, %v2280_v22  ;;  %v10033_v3 = vrot.slane %v7201_v18, 7 }
  0xfc   : > { %9995 = vst [vmem:[#allocation25_spill] sm:$0xff] %v9994_v56  ;;  %737 = vst.msk [vmem:[#allocation2 + $0xb8] sm:$0xff] %vm9763_vm2, %v664_v63  ;;  %v663_v22 = vmax.f32 %v577_v29, 0.0  ;;  %v592_v27 = vadd.f32 %v6128_v30, %v6944_v47  ;;  %6195 = vmatpush3.msk.msra.mxu1 %vm9737_vm0, %v6921_v42  ;;  %6249 = vmatprep.mubr.msk.f32.mxu0 %vm9763_vm2, %v7245_v38  ;;  %v7285_v29 = vld [vmem:[#allocation2 + $0x98] sm:$0xff]  ;;  %v10002_v42 = vand.u32 15, %v7025_v50  ;;  %v10003_v30 = vmov 0 }
  0xfd   : > { %v586_v51 = vpop.f32.mrf.mxu0  ;;  %v7271_v63 = vld [vmem:[#allocation2 + $0x90] sm:$0xff]  ;;  %6294 = vmatprep.subr.msk.mxu1 %vm9737_vm0, %v7230_v23  ;;  %6345 = vmatpush3.msk.msra.mxu0 %vm9737_vm0, %v6937_v46  ;;  %v2282_v46 = vsel %vm7130_vm8, %v7014_v35, 0.0  ;;  %v10010_v50 = vrot.slane %v6992_v26, 1  ;;  %v1335_v35 = vrot.slane %v750_v43, 7  ;;  %v10029_v43 = vand.u32 15, %v6950_v58 }
  0xfe   : > { %10001 = vst [vmem:[#allocation29_spill] sm:$0xff] %v7271_v63  ;;  %736 = vst.msk [vmem:[#allocation2 + $0xb0] sm:$0xff] %vm9763_vm2, %v663_v22  ;;  %v666_v24 = vmax.f32 %v592_v27, 0.0  ;;  %v587_v25 = vadd.f32 %v6944_v47, %v586_v51  ;;  %6170 = vmatprep.mubr.msk.f32.mxu1 %vm9763_vm2, %v7271_v63  ;;  %vm7292_vm13 = vcmp.le.s32.totalorder %v10002_v42, 14  ;;  %v10006_v27 = vand.u32 15, %v7031_v52  ;;  %6444 = vmatprep.subr.msk.mxu0 %vm9737_vm0, %v7252_v10 }
  0xff   : > { %v10004_v30 = vsel %vm7292_vm13, 4294967295, %v10003_v30  ;;  %v10007_v51 = vmov 0  ;;  %v6131_v20 = vpop.f32.mrf.mxu0  ;;  %6171 = vmatmul.mubr.msk.f32.gmra.mxu1 %vm9763_vm2, %v7285_v29  ;;  %6250 = vmatmul.mubr.msk.f32.gmra.mxu0 %vm9763_vm2, %v2282_v46  ;;  %v10011_v42 = vrot.slane %v6979_v19, 1  ;;  %v7317_v22 = vadd.s32 216, %v6950_v58  ;;  %v7351_v39 = vld [vmem:[#allocation2 + $0xa8] sm:$0xff] }
 0x100   : > { %10005 = vst [vmem:[#allocation30_spill] sm:$0xff] %v10004_v30  ;;  %vm7298_vm14 = vcmp.ge.s32.totalorder %v10006_v27, 1  ;;  %v2195_v27 = vrot.slane %v7037_v55, 1  ;;  %739 = vst.msk [vmem:[#allocation2 + $0xc8] sm:$0xff] %vm9763_vm2, %v666_v24  ;;  %v665_v38 = vmax.f32 %v587_v25, 0.0  ;;  %v602_v46 = vadd.f32 %v6131_v20, %v6944_v47 }
 0x101   : > { %v10008_v51 = vsel %vm7298_vm14, 4294967295, %v10007_v51  ;;  %v7313_v52 = vsel %vm9754_vm3, %v10011_v42, %v10010_v50  ;;  %v10013_v50 = vrot.slane %v7147_v62, 7  ;;  %v10014_v42 = vrot.slane %v7115_v6, 7  ;;  %v596_v55 = vpop.f32.mrf.mxu0  ;;  %v7334_v21 = vld [vmem:[#allocation2 + $0xa0] sm:$0xff] }
 0x102   : > { %10009 = vst [vmem:[#allocation31_spill] sm:$0xff] %v10008_v51  ;;  %10012 = vst [vmem:[#allocation32_spill] sm:$0xff] %v7313_v52  ;;  %6252 = vmatprep.mubr.msk.f32.mxu0 %vm9763_vm2, %v7313_v52  ;;  %v2284_v25 = vsel %vm7163_vm9, %v7056_v2, 0.0  ;;  %v10017_v20 = vrot.slane %v7061_v5, 1  ;;  %v7345_v52 = vadd.s32 232, %v6950_v58  ;;  %6173 = vmatprep.mubr.msk.f32.mxu1 %vm9763_vm2, %v7334_v21  ;;  %vm7378_vm0 = vcmp.ge.s32.totalorder %v10029_v43, 1 }
 0x103   : > { %v7331_v10 = vsel %vm9751_vm4, %v10014_v42, %v10013_v50  ;;  %10016 = vst [vmem:[#allocation34_spill] sm:$0xff] %v7334_v21  ;;  %738 = vst.msk [vmem:[#allocation2 + $0xc0] sm:$0xff] %vm9763_vm2, %v665_v38  ;;  %v668_v50 = vmax.f32 %v602_v46, 0.0  ;;  %v597_v42 = vadd.f32 %v6944_v47, %v596_v55  ;;  %v6134_v26 = vpop.f32.mrf.mxu0  ;;  %6174 = vmatmul.mubr.msk.f32.gmra.mxu1 %vm9763_vm2, %v7351_v39  ;;  %6253 = vmatmul.mubr.msk.f32.gmra.mxu0 %vm9763_vm2, %v2284_v25  ;;  %v7414_v25 = vld [vmem:[#allocation2 + $0xb8] sm:$0xff]  ;;  %vm10052_vm14 = vcmask 1046528  }
 0x104   : > { %10015 = vst [vmem:[#allocation33_spill] sm:$0xff] %v7331_v10  ;;  %v7342_v24 = vsel %vm9754_vm3, %v2195_v27, %v10017_v20  ;;  %v10020_v20 = vmov 0  ;;  %v10023_v55 = vrot.slane %v7019_v48, 1  ;;  %v2199_v46 = vrot.slane %v7075_v14, 1 }
 0x105   : > { %10018 = vst [vmem:[#allocation35_spill] sm:$0xff] %v7342_v24  ;;  %v10021_v20 = vsel %vm7356_vm15, 4294967295, %v10020_v20  ;;  %v10031_v59 = vsel %vm7378_vm0, 4294967295, %v10030_v59  ;;  %741 = vst.msk [vmem:[#allocation2 + $0xd8] sm:$0xff] %vm9763_vm2, %v668_v50  ;;  %v612_v61 = vadd.f32 %v6134_v26, %v6944_v47  ;;  %v10034_v43 = vrot.slane %v7159_v44, 7  ;;  %v7399_v10 = vld [vmem:[#allocation2 + $0xb0] sm:$0xff] }
 0x106   : > { %10022 = vst [vmem:[#allocation36_spill] sm:$0xff] %v10021_v20  ;;  %v7367_v38 = vsel %vm9754_vm3, %v10023_v55, %v2195_v27  ;;  %10032 = vst [vmem:[#allocation39_spill] sm:$0xff] %v10031_v59  ;;  %v667_v55 = vmax.f32 %v597_v42, 0.0  ;;  %v1340_v58 = vrot.slane %v6961_v8, 7  ;;  %v606_v27 = vpop.f32.mrf.mxu0  ;;  %v2286_v26 = vsel %vm7223_vm11, %v7342_v24, 0.0  ;;  %6176 = vmatprep.mubr.msk.f32.mxu1 %vm9763_vm2, %v7399_v10 }
 0x107   : > { %10024 = vst [vmem:[#allocation37_spill] sm:$0xff] %v7367_v38  ;;  %6255 = vmatprep.mubr.msk.f32.mxu0 %vm9763_vm2, %v7367_v38  ;;  %v7395_v14 = vsel %vm9751_vm4, %v10034_v43, %v10033_v3  ;;  %v10036_v50 = vrot.slane %v6898_v36, 7  ;;  %v670_v3 = vmax.f32 %v612_v61, 0.0  ;;  %v607_v43 = vadd.f32 %v6944_v47, %v606_v27  ;;  %6177 = vmatmul.mubr.msk.f32.gmra.mxu1 %vm9763_vm2, %v7414_v25 }
 0x108   : > { %10035 = vst [vmem:[#allocation40_spill] sm:$0xff] %v7395_v14  ;;  %740 = vst.msk [vmem:[#allocation2 + $0xd0] sm:$0xff] %vm9763_vm2, %v667_v55  ;;  %v7417_v8 = vsel %vm9754_vm3, %v2199_v46, %v2201_v7  ;;  %v10038_v36 = vand.u32 15, %v7068_v9  ;;  %v10043_v55 = vmov 0  ;;  %v6137_v61 = vpop.f32.mrf.mxu0  ;;  %6256 = vmatmul.mubr.msk.f32.gmra.mxu0 %vm9763_vm2, %v2286_v26  ;;  %v10045_v9 = vrot.slane %v7061_v5, 1 }
 0x109   : > { %v7407_v42 = vsel %vm9751_vm4, %v1335_v35, %v10036_v50  ;;  %10037 = vst [vmem:[#allocation41_spill] sm:$0xff] %v7417_v8  ;;  %v10039_v35 = vmov 0  ;;  %v10042_v50 = vand.u32 15, %v7090_v31  ;;  %v2203_v38 = vrot.slane %v7115_v6, 1  ;;  %743 = vst.msk [vmem:[#allocation2 + $0xe8] sm:$0xff] %vm9763_vm2, %v670_v3  ;;  %v7475_v6 = vld [vmem:[#allocation2 + $0xc8] sm:$0xff] }
 0x10a   : > { %vm7421_vm5 = vcmp.le.s32.totalorder %v10038_v36, 14  ;;  %v7438_v36 = vsel %vm9754_vm3, %v10045_v9, %v2199_v46  ;;  %v2205_v31 = vrot.slane %v7147_v62, 1  ;;  %v669_v27 = vmax.f32 %v607_v43, 0.0  ;;  %v7458_v14 = vld [vmem:[#allocation2 + $0xc0] sm:$0xff]  ;;  %10058 = vst [vmem:[#allocation47_spill] sm:$0xff] %v7475_v6 }
 0x10b   : > { %v10040_v35 = vsel %vm7421_vm5, 4294967295, %v10039_v35  ;;  %vm7427_vm4 = vcmp.ge.s32.totalorder %v10042_v50, 1  ;;  %10046 = vst [vmem:[#allocation43_spill] sm:$0xff] %v7438_v36  ;;  %v622_v56 = vadd.f32 %v6137_v61, %v6944_v47  ;;  %6258 = vmatprep.mubr.msk.f32.mxu0 %vm9763_vm2, %v7438_v36  ;;  %v10047_v26 = vrot.slane %v7271_v63, 7  ;;  %v616_v50 = vpop.f32.mrf.mxu0  ;;  %10051 = vst [vmem:[#allocation45_spill] sm:$0xff] %v7458_v14 }
 0x10c   : > { %10041 = vst [vmem:[#allocation42_spill] sm:$0xff] %v10040_v35  ;;  %v10044_v55 = vsel %vm7427_vm4, 4294967295, %v10043_v55  ;;  %v10048_v46 = vrot.slane %v7217_v57, 7  ;;  %vm10049_vm3 = vcmask 1040384   ;;  %v2288_v3 = vsel %vm7292_vm13, %v7417_v8, 0.0 }
 0x10d   : > { %v7464_v43 = vsel %vm10052_vm14, %v2201_v7, %v2203_v38  ;;  %v10054_v61 = vrot.slane %v6902_v37, 7  ;;  %vm10055_vm2 = vmmov %vm10049_vm3  ;;  %v2209_v62 = vrot.slane %v7201_v18, 1  ;;  %v10059_v7 = vand.u32 15, %v7093_v33 }
 0x10e   : > { %v7454_v9 = vsel %vm10049_vm3, %v10048_v46, %v10047_v26  ;;  %10053 = vst [vmem:[#allocation46_spill] sm:$0xff] %v7464_v43  ;;  %vm10056_vm3 = vcmask 31744   ;;  %v672_v26 = vmax.f32 %v622_v56, 0.0  ;;  %v617_v46 = vadd.f32 %v6944_v47, %v616_v50 }
 0x10f   : > { %10050 = vst [vmem:[#allocation44_spill] sm:$0xff] %v7454_v9  ;;  %v7469_v36 = vsel %vm10055_vm2, %v10054_v61, %v1340_v58  ;;  %742 = vst.msk [vmem:[#allocation2 + $0xe0] sm:$0xff] %vm10056_vm3, %v669_v27  ;;  %vm7480_vm14 = vcmp.ge.s32.totalorder %v10059_v7, 1  ;;  %v10060_v51 = vmov 0  ;;  %v6140_v61 = vpop.f32.mrf.mxu0  ;;  %v7489_v56 = vsel %vm10064_vm10, %v2203_v38, %v2205_v31  ;;  %v7516_v9 = vld [vmem:[#allocation2 + $0xd0] sm:$0xff] }
 0x110   : > { %vm10057_vm12 = vmmov %vm10056_vm3  ;;  %v10061_v51 = vsel %vm7480_vm14, 4294967295, %v10060_v51  ;;  %10065 = vst [vmem:[#allocation48_spill] sm:$0xff] %v7489_v56  ;;  %v2207_v27 = vrot.slane %v7159_v44, 1  ;;  %v10066_v50 = vand.u32 15, %v7087_v28  ;;  %v10067_v33 = vmov 0 }
 0x111   : > { %6179 = vmatprep.mubr.msk.f32.mxu1 %vm10057_vm12, %v7458_v14  ;;  %vm10062_vm2 = vmmov %vm10056_vm3  ;;  %v632_v38 = vadd.f32 %v6140_v61, %v6944_v47  ;;  %v10072_v7 = vrot.slane %v7285_v29, 7  ;;  %v626_v37 = vpop.f32.mrf.mxu0  ;;  %v10077_v61 = vmov 0  ;;  %vm10081_vm15 = vcmask 31744   ;;  %v10337_v54 = vld [vmem:[#allocation47_spill] sm:$0xff] }
 0x112   : > { %6180 = vmatmul.mubr.msk.f32.gmra.mxu1 %vm10062_vm2, %v7475_v6  ;;  %vm10063_vm3 = vmmov %vm10062_vm2  ;;  %vm7494_vm12 = vcmp.le.s32.totalorder %v10066_v50, 14  ;;  %745 = vst.msk [vmem:[#allocation2 + $0xf8] sm:$0xff] %vm10062_vm2, %v672_v26  ;;  %v10071_v50 = vrot.slane %v7334_v21, 7  ;;  %v2290_v28 = vsel %vm7372_vm1, %v7489_v56, 0.0  ;;  %v7546_v44 = vsel %vm10083_vm7, %v2207_v27, %v2209_v62 }
 0x113   : > { %6259 = vmatmul.mubr.msk.f32.gmra.mxu0 %vm10063_vm3, %v2288_v3  ;;  %v10068_v33 = vsel %vm7494_vm12, 4294967295, %v10067_v33  ;;  %v671_v3 = vmax.f32 %v617_v46, 0.0  ;;  %vm10070_vm10 = vmmov %vm10062_vm2  ;;  %vm10073_vm3 = vcmask 1040384   ;;  %vm10074_vm2 = vcmask 1046528   ;;  %10084 = vst [vmem:[#allocation52_spill] sm:$0xff] %v7546_v44 }
 0x114   : > { %10069 = vst [vmem:[#allocation49_spill] sm:$0xff] %v10068_v33  ;;  %6261 = vmatprep.mubr.msk.f32.mxu0 %vm10070_vm10, %v7464_v43  ;;  %v7514_v18 = vsel %vm10073_vm3, %v10072_v7, %v10071_v50  ;;  %v7519_v26 = vsel %vm10074_vm2, %v2205_v31, %v2207_v27  ;;  %v10076_v46 = vand.u32 15, %v7103_v1  ;;  %v10080_v43 = vrot.slane %v6970_v13, 7  ;;  %vm10082_vm2 = vmmov %vm10081_vm15  ;;  %v6143_v27 = vpop.f32.mrf.mxu0 }
 0x115   : > { %10075 = vst [vmem:[#allocation50_spill] sm:$0xff] %v7519_v26  ;;  %744 = vst.msk [vmem:[#allocation2 + $0xf0] sm:$0xff] %vm10081_vm15, %v671_v3  ;;  %v674_v31 = vmax.f32 %v632_v38, 0.0  ;;  %v627_v1 = vadd.f32 %v6944_v47, %v626_v37  ;;  %6182 = vmatprep.mubr.msk.f32.mxu1 %vm10082_vm2, %v7516_v9  ;;  %v10088_v37 = vand.u32 15, %v7123_v0  ;;  %v10089_v3 = vmov 0 }
 0x116   : > { %vm7523_vm10 = vcmp.le.s32.totalorder %v10076_v46, 14  ;;  %v7533_v7 = vsel %vm10073_vm3, %v1340_v58, %v10080_v43  ;;  %v7540_v46 = vld [vmem:[#allocation2 + $0xd8] sm:$0xff]  ;;  %v10085_v58 = vand.u32 15, %v7109_v11  ;;  %v10086_v43 = vmov 0  ;;  %v636_v5 = vpop.f32.mrf.mxu0  ;;  %v7587_v48 = vld [vmem:[#allocation2 + $0xe0] sm:$0xff] }
 0x117   : > { %v10078_v61 = vsel %vm7523_vm10, 4294967295, %v10077_v61  ;;  %vm7556_vm15 = vcmp.ge.s32.totalorder %v10088_v37, 1  ;;  %v10092_v38 = vand.u32 15, %v7184_v32  ;;  %v10093_v50 = vmov 0 }
 0x118   : > { %10079 = vst [vmem:[#allocation51_spill] sm:$0xff] %v10078_v61  ;;  %vm7550_vm3 = vcmp.ge.s32.totalorder %v10085_v58, 1  ;;  %v10090_v3 = vsel %vm7556_vm15, 4294967295, %v10089_v3  ;;  %vm10096_vm7 = vcmask 31744   ;;  %v2211_v11 = vrot.slane %v7217_v57, 1  ;;  %v10254_v61 = vld [vmem:[#allocation11_spill] sm:$0xff] }
 0x119   : > { %v10087_v43 = vsel %vm7550_vm3, 4294967295, %v10086_v43  ;;  %10091 = vst [vmem:[#allocation53_spill] sm:$0xff] %v10090_v3  ;;  %vm7562_vm2 = vcmp.ge.s32.totalorder %v10092_v38, 1  ;;  %6183 = vmatmul.mubr.msk.f32.gmra.mxu1 %vm10096_vm7, %v7540_v46  ;;  %vm10097_vm6 = vmmov %vm10096_vm7  ;;  %v2213_v0 = vrot.slane %v7271_v63, 1  ;;  %v10098_v58 = vrot.slane %v7399_v10, 7 }
 0x11a   : > { %v10094_v50 = vsel %vm7562_vm2, 4294967295, %v10093_v50  ;;  %6262 = vmatmul.mubr.msk.f32.gmra.mxu0 %vm10097_vm6, %v2290_v28  ;;  %v10099_v37 = vrot.slane %v7351_v39, 7  ;;  %vm10100_vm0 = vcmask 1040384   ;;  %vm10101_vm1 = vmmov %vm10097_vm6  ;;  %v673_v20 = vmax.f32 %v627_v1, 0.0 }
 0x11b   : > { %10095 = vst [vmem:[#allocation54_spill] sm:$0xff] %v10094_v50  ;;  %747 = vst.msk [vmem:[#allocation2 + $0x108] sm:$0xff] %vm10101_vm1, %v674_v31  ;;  %v642_v28 = vadd.f32 %v6143_v27, %v6944_v47  ;;  %v2215_v31 = vrot.slane %v7285_v29, 1  ;;  %v2217_v1 = vrot.slane %v7334_v21, 1  ;;  %v10105_v27 = vand.u32 15, %v7106_v4 }
 0x11c   : > { %v7576_v32 = vsel %vm10100_vm0, %v10099_v37, %v10098_v58  ;;  %vm10102_vm6 = vmmov %vm10101_vm1  ;;  %v2292_v58 = vsel %vm7421_vm5, %v7546_v44, 0.0  ;;  %vm10103_vm0 = vcmask 1046528   ;;  %v10106_v38 = vmov 0 }
 0x11d   : > { %6264 = vmatprep.mubr.msk.f32.mxu0 %vm10102_vm6, %v7519_v26  ;;  %v7593_v37 = vsel %vm10103_vm0, %v2209_v62, %v2211_v11  ;;  %vm7599_vm1 = vcmp.le.s32.totalorder %v10105_v27, 14  ;;  %vm10109_vm7 = vmmov %vm10102_vm6  ;;  %v676_v57 = vmax.f32 %v642_v28, 0.0  ;;  %v637_v63 = vadd.f32 %v6944_v47, %v636_v5  ;;  %6185 = vmatprep.mubr.msk.f32.mxu1 %vm10102_vm6, %v7587_v48  ;;  %v7607_v62 = vld [vmem:[#allocation2 + $0xe8] sm:$0xff] }
 0x11e   : > { %10104 = vst [vmem:[#allocation55_spill] sm:$0xff] %v7593_v37  ;;  %v10107_v38 = vsel %vm7599_vm1, 4294967295, %v10106_v38  ;;  %746 = vst.msk [vmem:[#allocation2 + $0x100] sm:$0xff] %vm10109_vm7, %v673_v20  ;;  %v9809_v26 = vrot.slane %v7414_v25, 7  ;;  %v9812_v21 = vrot.slane %v7475_v6, 7  ;;  %v10111_v4 = vand.u32 15, %v7208_v53 }
 0x11f   : > { %10108 = vst [vmem:[#allocation56_spill] sm:$0xff] %v10107_v38  ;;  %10110 = vst [vmem:[#allocation57_spill] sm:$0xff] %v7607_v62  ;;  %v10112_v27 = vmov 0  ;;  %vm10116_vm5 = vcmask 1046528   ;;  %v675_v28 = vmax.f32 %v637_v63, 0.0  ;;  %v10123_v5 = vrot.slane %v7516_v9, 7 }
 0x120   : > { %vm7613_vm0 = vcmp.ge.s32.totalorder %v10111_v4, 1  ;;  %vm10114_vm7 = vmmov %vm10102_vm6  ;;  %v7621_v47 = vsel %vm10116_vm5, %v2211_v11, %v2213_v0  ;;  %v2223_v50 = vrot.slane %v7414_v25, 1  ;;  %v10159_v3 = vmov 0 }
 0x121   : > { %v10113_v27 = vsel %vm7613_vm0, 4294967295, %v10112_v27  ;;  %6186 = vmatmul.mubr.msk.f32.gmra.mxu1 %vm10114_vm7, %v7607_v62  ;;  %vm10115_vm4 = vmmov %vm10102_vm6  ;;  %10117 = vst [vmem:[#allocation58_spill] sm:$0xff] %v7621_v47  ;;  %vm10126_vm7 = vcmask 1046528   ;;  %vm10176_vm14 = vnez %v10031_v59  ;;  %v2235_v59 = vrot.slane %v7607_v62, 1 }
 0x122   : > { %6265 = vmatmul.mubr.msk.f32.gmra.mxu0 %vm10115_vm4, %v2292_v58  ;;  %vm10118_vm6 = vmmov %vm10115_vm4  ;;  %v10120_v58 = vrot.slane %v7458_v14, 7  ;;  %v7649_v63 = vsel %vm10126_vm7, %v2213_v0, %v2215_v31  ;;  %v7671_v0 = vld [vmem:[#allocation2 + $0xf8] sm:$0xff] }
 0x123   : > { %749 = vst.msk [vmem:[#allocation2 + $0x118] sm:$0xff] %vm10118_vm6, %v676_v57  ;;  %vm10119_vm1 = vmmov %vm10115_vm4  ;;  %vm10121_vm4 = vcmask 1040384   ;;  %v7646_v57 = vld [vmem:[#allocation2 + $0xf0] sm:$0xff]  ;;  %v10334_v24 = vld [vmem:[#allocation54_spill] sm:$0xff] }
 0x124   : > { %6267 = vmatprep.mubr.msk.f32.mxu0 %vm10119_vm1, %v7593_v37  ;;  %v7637_v11 = vsel %vm10121_vm4, %v9809_v26, %v10120_v58  ;;  %vm10124_vm5 = vmmov %vm10121_vm4  ;;  %10127 = vst [vmem:[#allocation61_spill] sm:$0xff] %v7649_v63  ;;  %v10130_v58 = vand.u32 15, %v7211_v41  ;;  %v10131_v26 = vmov 0  ;;  %v10133_v37 = vrot.slane %v7587_v48, 7 }
 0x125   : > { %10122 = vst [vmem:[#allocation59_spill] sm:$0xff] %v7637_v11  ;;  %v7644_v53 = vsel %vm10124_vm5, %v9812_v21, %v10123_v5  ;;  %vm10128_vm1 = vmmov %vm10126_vm7  ;;  %v10134_v5 = vrot.slane %v7540_v46, 7  ;;  %vm10136_vm5 = vcmask 31744   ;;  %v2294_v41 = vsel %vm7494_vm12, %v7621_v47, 0.0 }
 0x126   : > { %10125 = vst [vmem:[#allocation60_spill] sm:$0xff] %v7644_v53  ;;  %v7652_v4 = vsel %vm10128_vm1, %v2215_v31, %v2217_v1  ;;  %vm7657_vm6 = vcmp.ge.s32.totalorder %v10130_v58, 1  ;;  %748 = vst.msk [vmem:[#allocation2 + $0x110] sm:$0xff] %vm10136_vm5, %v675_v28  ;;  %v2219_v31 = vrot.slane %v7351_v39, 1  ;;  %v10141_v28 = vmov 0 }
 0x127   : > { %10129 = vst [vmem:[#allocation62_spill] sm:$0xff] %v7652_v4  ;;  %v10132_v26 = vsel %vm7657_vm6, 4294967295, %v10131_v26  ;;  %v7666_v21 = vsel %vm10121_vm4, %v10134_v5, %v10133_v37  ;;  %vm10137_vm7 = vmmov %vm10136_vm5  ;;  %v10140_v37 = vand.u32 15, %v7152_v12  ;;  %v10147_v58 = vrot.slane %v6979_v19, 7 }
 0x128   : > { %10135 = vst [vmem:[#allocation63_spill] sm:$0xff] %v7666_v21  ;;  %6188 = vmatprep.mubr.msk.f32.mxu1 %vm10137_vm7, %v7646_v57  ;;  %vm10138_vm1 = vmmov %vm10136_vm5  ;;  %v10148_v5 = vrot.slane %v6970_v13, 7  ;;  %v10150_v2 = vrot.slane %v7646_v57, 7  ;;  %v10151_v12 = vrot.slane %v7607_v62, 7  ;;  %v7722_v21 = vld [vmem:[#allocation2 + $0x100] sm:$0xff]  ;;  %v10154_v53 = vrot.slane %v7399_v10, 1 }
 0x129   : > { %6189 = vmatmul.mubr.msk.f32.gmra.mxu1 %vm10138_vm1, %v7671_v0  ;;  %vm10139_vm4 = vmmov %vm10138_vm1  ;;  %vm7684_vm5 = vcmp.le.s32.totalorder %v10140_v37, 14  ;;  %v2225_v11 = vrot.slane %v7458_v14, 1  ;;  %v9849_v14 = vrot.slane %v7722_v21, 7  ;;  %vm10193_vm6 = vcmask 1046528  }
 0x12a   : > { %6268 = vmatmul.mubr.msk.f32.gmra.mxu0 %vm10139_vm4, %v2294_v41  ;;  %v10142_v28 = vsel %vm7684_vm5, 4294967295, %v10141_v28  ;;  %vm10144_vm7 = vmmov %vm10138_vm1  ;;  %v2296_v41 = vsel %vm7523_vm10, %v7652_v4, 0.0  ;;  %vm10145_vm1 = vcmask 1046528   ;;  %vm10149_vm4 = vcmask 1040384  }
 0x12b   : > { %10143 = vst [vmem:[#allocation64_spill] sm:$0xff] %v10142_v28  ;;  %6270 = vmatprep.mubr.msk.f32.mxu0 %vm10144_vm7, %v7649_v63  ;;  %v7706_v37 = vsel %vm10145_vm1, %v2217_v1, %v2219_v31  ;;  %v7713_v20 = vsel %vm10149_vm4, %v10148_v5, %v10147_v58  ;;  %vm10152_vm2 = vmmov %vm10149_vm4  ;;  %v7734_v5 = vld [vmem:[#allocation2 + $0x108] sm:$0xff]  ;;  %v9850_v58 = vrot.slane %v7671_v0, 7  ;;  %v10198_v62 = vrot.slane %v7646_v57, 1 }
 0x12c   : > { %10146 = vst [vmem:[#allocation65_spill] sm:$0xff] %v7706_v37  ;;  %v7720_v63 = vsel %vm10152_vm2, %v10151_v12, %v10150_v2  ;;  %vm10155_vm7 = vmmov %vm10145_vm1  ;;  %vm10157_vm1 = vcmask 31744   ;;  %v2227_v2 = vrot.slane %v7475_v6, 1  ;;  %v10158_v12 = vand.u32 15, %v7181_v60 }
 0x12d   : > { %10153 = vst [vmem:[#allocation66_spill] sm:$0xff] %v7720_v63  ;;  %v7727_v1 = vsel %vm10155_vm7, %v2219_v31, %v10154_v53  ;;  %6191 = vmatprep.mubr.msk.f32.mxu1 %vm10157_vm1, %v7722_v21  ;;  %v10162_v53 = vand.u32 15, %v7205_v40  ;;  %v10163_v31 = vmov 0  ;;  %vm10166_vm7 = vmmov %vm10157_vm1  ;;  %v10167_v60 = vand.u32 15, %v7317_v22  ;;  %v7810_v22 = vld [vmem:[#allocation2 + $0x110] sm:$0xff] }
 0x12e   : > { %10156 = vst [vmem:[#allocation67_spill] sm:$0xff] %v7727_v1  ;;  %vm7739_vm2 = vcmp.le.s32.totalorder %v10158_v12, 14  ;;  %6192 = vmatmul.mubr.msk.f32.gmra.mxu1 %vm10166_vm7, %v7734_v5  ;;  %6271 = vmatmul.mubr.msk.f32.gmra.mxu0 %vm10157_vm1, %v2296_v41  ;;  %v10168_v40 = vmov 0  ;;  %v10171_v12 = vand.u32 15, %v7345_v52  ;;  %vm10178_vm0 = vmmov %vm10157_vm1  ;;  %v10195_v63 = vrot.slane %v7587_v48, 1 }
 0x12f   : > { %v10160_v3 = vsel %vm7739_vm2, 4294967295, %v10159_v3  ;;  %vm7745_vm4 = vcmp.le.s32.totalorder %v10162_v53, 14  ;;  %vm7759_vm15 = vcmp.le.s32.totalorder %v10167_v60, 14  ;;  %v10172_v53 = vmov 0  ;;  %6273 = vmatprep.mubr.msk.f32.mxu0 %vm10157_vm1, %v7706_v37  ;;  %vm10196_vm12 = vmmov %vm10193_vm6 }
 0x130   : > { %10161 = vst [vmem:[#allocation68_spill] sm:$0xff] %v10160_v3  ;;  %v10164_v31 = vsel %vm7745_vm4, 4294967295, %v10163_v31  ;;  %v10169_v40 = vsel %vm7759_vm15, 4294967295, %v10168_v40  ;;  %vm7765_vm3 = vcmp.le.s32.totalorder %v10171_v12, 14  ;;  %v10177_v60 = vsel %vm10176_vm14, %v7407_v42, 0.0  ;;  %vm10199_vm10 = vmmov %vm10193_vm6  ;;  %v10238_v3 = vld [vmem:[#allocation8_spill] sm:$0xff] }
 0x131   : > { %10165 = vst [vmem:[#allocation69_spill] sm:$0xff] %v10164_v31  ;;  %10170 = vst [vmem:[#allocation70_spill] sm:$0xff] %v10169_v40  ;;  %v10173_v53 = vsel %vm7765_vm3, 4294967295, %v10172_v53  ;;  %6196 = vmatprep.mubr.msk.f32.mxu1 %vm10178_vm0, %v10177_v60  ;;  %vm10179_vm3 = vnez %v10107_v38  ;;  %vm10180_vm15 = vcmask 1040384   ;;  %vm10181_vm1 = vcmask 1046528   ;;  %v10252_v31 = vld [vmem:[#allocation12_spill] sm:$0xff] }
 0x132   : > { %10174 = vst [vmem:[#allocation71_spill] sm:$0xff] %v10173_v53  ;;  %v2298_v12 = vsel %vm10179_vm3, %v7727_v1, 0.0  ;;  %v7798_v52 = vsel %vm10180_vm15, %v9850_v58, %v9849_v14  ;;  %v7801_v6 = vsel %vm10181_vm1, %v2223_v50, %v2225_v11  ;;  %v10183_v42 = vrot.slane %v7516_v9, 1  ;;  %vm10184_vm0 = vmmov %vm10181_vm1  ;;  %v7818_v58 = vld [vmem:[%s9703_s3 + $0x14] sm:$0xf] }
 0x133   : > { %10182 = vst [vmem:[#allocation72_spill] sm:$0xff] %v7801_v6  ;;  %v2231_v37 = vrot.slane %v7540_v46, 1  ;;  %vm10186_vm15 = vcmask 31744   ;;  %vm10189_vm14 = vcmask 1043456   ;;  %v10209_v34 = vrot.slane %v7810_v22, 1 }
 0x134   : > { %v7806_v60 = vsel %vm10184_vm0, %v2227_v2, %v10183_v42  ;;  %6197 = vmatmul.mubr.msk.f32.vlgmr.msra.gmra.mxu1 %vm10186_vm15, %v6932_v45  ;;  %vm10187_vm1 = vmmov %vm10186_vm15  ;;  %vm10190_vm15 = vnez %v9970_v17  ;;  %v10210_v41 = vrot.slane %v7734_v5, 1  ;;  %v10239_v28 = vrot.slane %v10238_v3, 7 }
 0x135   : > { %10185 = vst [vmem:[#allocation73_spill] sm:$0xff] %v7806_v60  ;;  %6274 = vmatmul.mubr.msk.f32.gmra.mxu0 %vm10187_vm1, %v2298_v12  ;;  %6295 = vmatpush3.msk.msra.mxu1 %vm10189_vm14, %v7230_v23  ;;  %v10191_v45 = vsel %vm10190_vm15, %v7469_v36, 0.0  ;;  %v10192_v12 = vrot.slane %v7399_v10, 1  ;;  %v7851_v42 = vsel %vm10196_vm12, %v2231_v37, %v10195_v63  ;;  %v7856_v23 = vsel %vm10199_vm10, %v2235_v59, %v10198_v62  ;;  %vm10201_vm14 = vmmov %vm10187_vm1 }
 0x136   : > { %6199 = vmatprep.mubr.msk.f32.mxu1 %vm10187_vm1, %v10191_v45  ;;  %10197 = vst [vmem:[#allocation75_spill] sm:$0xff] %v7851_v42  ;;  %10200 = vst [vmem:[#allocation76_spill] sm:$0xff] %v7856_v23  ;;  %v10205_v63 = vrot.slane %v7722_v21, 1  ;;  %v10263_v47 = vrot.slane %v7646_v57, 1  ;;  %vm10335_vm8 = vnez %v10334_v24 }
 0x137   : > { %v7846_v14 = vsel %vm10193_vm6, %v10192_v12, %v2223_v50  ;;  %vm10202_vm6 = vnez %v9974_v49  ;;  %vm10203_vm1 = vmmov %vm10199_vm10  ;;  %v10206_v12 = vrot.slane %v7671_v0, 1 }
 0x138   : > { %10194 = vst [vmem:[#allocation74_spill] sm:$0xff] %v7846_v14  ;;  %6276 = vmatprep.mubr.msk.f32.mxu0 %vm10201_vm14, %v7846_v14  ;;  %v1436_v50 = vsel %vm10202_vm6, %v7713_v20, 0.0  ;;  %v7867_v45 = vsel %vm10203_vm1, %v2225_v11, %v2227_v2  ;;  %vm10207_vm12 = vmmov %vm10203_vm1  ;;  %vm10213_vm14 = vcmask 1043456   ;;  %v2300_v11 = vsel %vm7684_vm5, %v7801_v6, 0.0  ;;  %v10229_v6 = vld [vmem:[#allocation20_spill] sm:$0xff] }
 0x139   : > { %10204 = vst [vmem:[#allocation77_spill] sm:$0xff] %v7867_v45  ;;  %v7874_v62 = vsel %vm10207_vm12, %v10206_v12, %v10205_v63  ;;  %vm10211_vm10 = vmmov %vm10203_vm1  ;;  %6394 = vmatprep.subr.msk.mxu1 %vm10213_vm14, %v7818_v58  ;;  %vm10214_vm1 = vcmask 31744   ;;  %v10222_v2 = vrot.slane %v6979_v19, 7  ;;  %v10228_v63 = vld [vmem:[#allocation16_spill] sm:$0xff]  ;;  %vm10230_vm3 = vnez %v10229_v6  ;;  %v10236_v12 = vld [vmem:[#allocation9_spill] sm:$0xff] }
 0x13a   : > { %10208 = vst [vmem:[#allocation78_spill] sm:$0xff] %v7874_v62  ;;  %v7881_v14 = vsel %vm10211_vm10, %v10210_v41, %v10209_v34  ;;  %6200 = vmatmul.mubr.msk.f32.gmra.mxu1 %vm10214_vm1, %v7533_v7  ;;  %vm10215_vm12 = vmmov %vm10214_vm1  ;;  %v1438_v34 = vsel %vm10230_vm3, %v10228_v63, 0.0  ;;  %vm10232_vm5 = vcmask 1046528  }
 0x13b   : > { %10212 = vst [vmem:[#allocation79_spill] sm:$0xff] %v7881_v14  ;;  %6277 = vmatmul.mubr.msk.f32.gmra.mxu0 %vm10215_vm12, %v2300_v11  ;;  %vm10216_vm10 = vmmov %vm10214_vm1  ;;  %vm10219_vm12 = vnez %v10173_v53  ;;  %v2302_v11 = vsel %vm7739_vm2, %v7806_v60, 0.0  ;;  %v10231_v60 = vrot.slane %v7516_v9, 1 }
 0x13c   : > { %6202 = vmatprep.mubr.msk.f32.mxu1 %vm10216_vm10, %v1436_v50  ;;  %vm10217_vm14 = vmmov %vm10214_vm1  ;;  %vm10218_vm1 = vnez %v10169_v40  ;;  %v10220_v50 = vld [vmem:[#allocation6_spill] sm:$0xff]  ;;  %vm10223_vm10 = vcmask 1040384   ;;  %v2308_v15 = vsel %vm10219_vm12, %v7874_v62, 0.0  ;;  %v10289_v62 = vld [vmem:[#allocation17_spill] sm:$0xff] }
 0x13d   : > { %6279 = vmatprep.mubr.msk.f32.mxu0 %vm10217_vm14, %v7867_v45  ;;  %v10221_v41 = vrot.slane %v10220_v50, 7  ;;  %v2306_v33 = vsel %vm10218_vm1, %v7856_v23, 0.0  ;;  %v10268_v40 = vld [vmem:[#allocation14_spill] sm:$0xff]  ;;  %v10290_v56 = vrot.slane %v10289_v62, 7 }
 0x13e   : > { %v10269_v23 = vrot.slane %v10268_v40, 7 }
 0x13f   : > { %v7932_v45 = vsel %vm10223_vm10, %v10222_v2, %v10221_v41  ;;  %vm10226_vm10 = vcmask 31744   ;;  %v7964_v2 = vsel %vm10232_vm5, %v10231_v60, %v2231_v37  ;;  %v2304_v37 = vsel %vm7745_vm4, %v7851_v42, 0.0  ;;  %v10243_v60 = vld [vmem:[#allocation21_spill] sm:$0xff] }
 0x140   : > { %6203 = vmatmul.mubr.msk.f32.gmra.mxu1 %vm10226_vm10, %v7932_v45  ;;  %vm10227_vm0 = vmmov %vm10226_vm10  ;;  %10233 = vst [vmem:[#allocation6_spill] sm:$0xff] %v7964_v2  ;;  %v10253_v42 = vrot.slane %v10252_v31, 7  ;;  %v10414_v17 = vsel %vm10202_vm6, %v10243_v60, 0.0 }
 0x141   : > { %6280 = vmatmul.mubr.msk.f32.gmra.mxu0 %vm10227_vm0, %v2302_v11  ;;  %vm10234_vm2 = vmmov %vm10227_vm0  ;;  %v10237_v11 = vrot.slane %v10236_v12, 7 }
 0x142   : > { %6205 = vmatprep.mubr.msk.f32.mxu1 %vm10234_vm2, %v1438_v34  ;;  %vm10235_vm14 = vmmov %vm10227_vm0  ;;  %vm10240_vm0 = vcmask 1040384   ;;  %v10244_v34 = vld [vmem:[#allocation25_spill] sm:$0xff] }
 0x143   : > { %6282 = vmatprep.mubr.msk.f32.mxu0 %vm10235_vm14, %v7964_v2  ;;  %v7977_v38 = vsel %vm10240_vm0, %v10239_v28, %v10237_v11  ;;  %vm10241_vm5 = vmmov %vm10234_vm2  ;;  %v10246_v2 = vrot.slane %v7587_v48, 1  ;;  %vm10247_vm14 = vcmask 1046528   ;;  %v10249_v28 = vld [vmem:[#allocation3_spill] sm:$0xff] }
 0x144   : > { %6206 = vmatmul.mubr.msk.f32.gmra.mxu1 %vm10241_vm5, %v7977_v38  ;;  %vm10242_vm10 = vmmov %vm10234_vm2  ;;  %vm10245_vm2 = vnez %v10244_v34  ;;  %v820_v11 = vadd.s32 248, %v10249_v28  ;;  %v819_v24 = vadd.s32 240, %v10249_v28 }
 0x145   : > { %6283 = vmatmul.mubr.msk.f32.gmra.mxu0 %vm10242_vm10, %v2304_v37  ;;  %v1440_v41 = vsel %vm10245_vm2, %v10243_v60, 0.0  ;;  %v7991_v1 = vsel %vm10247_vm14, %v10246_v2, %v2235_v59  ;;  %vm10250_vm0 = vmmov %vm10241_vm5  ;;  %v10255_v37 = vrot.slane %v10254_v61, 7  ;;  %vm10256_vm5 = vcmask 1040384   ;;  %v10259_v59 = vld [vmem:[#allocation28_spill] sm:$0xff]  ;;  %v10260_v2 = vld [vmem:[#allocation31_spill] sm:$0xff] }
 0x146   : > { %10248 = vst [vmem:[#allocation16_spill] sm:$0xff] %v7991_v1  ;;  %6208 = vmatprep.mubr.msk.f32.mxu1 %vm10250_vm0, %v1440_v41  ;;  %vm10251_vm4 = vmmov %vm10250_vm0  ;;  %v10422_v49 = vsel %vm10230_vm3, %v10259_v59, 0.0 }
 0x147   : > { %6285 = vmatprep.mubr.msk.f32.mxu0 %vm10251_vm4, %v7991_v1  ;;  %v8002_v4 = vsel %vm10256_vm5, %v10255_v37, %v10253_v42  ;;  %vm10257_vm10 = vmmov %vm10250_vm0  ;;  %v10262_v1 = vrot.slane %v7671_v0, 1  ;;  %vm10264_vm4 = vcmask 1046528   ;;  %v1042_v37 = vand.u32 15, %v820_v11 }
 0x148   : > { %6209 = vmatmul.mubr.msk.f32.gmra.mxu1 %vm10257_vm10, %v8002_v4  ;;  %vm10258_vm14 = vmmov %vm10250_vm0  ;;  %vm10261_vm0 = vnez %v10260_v2 }
 0x149   : > { %6286 = vmatmul.mubr.msk.f32.gmra.mxu0 %vm10258_vm14, %v2306_v33  ;;  %v1442_v41 = vsel %vm10261_vm0, %v10259_v59, 0.0  ;;  %v8018_v42 = vsel %vm10264_vm4, %v10263_v47, %v10262_v1  ;;  %vm10266_vm5 = vmmov %vm10257_vm10  ;;  %v10270_v33 = vld [vmem:[#allocation13_spill] sm:$0xff]  ;;  %vm10272_vm10 = vcmask 1040384   ;;  %v10276_v1 = vld [vmem:[#allocation36_spill] sm:$0xff] }
 0x14a   : > { %10265 = vst [vmem:[#allocation20_spill] sm:$0xff] %v8018_v42  ;;  %6211 = vmatprep.mubr.msk.f32.mxu1 %vm10266_vm5, %v1442_v41  ;;  %vm10267_vm1 = vmmov %vm10266_vm5  ;;  %v10271_v35 = vrot.slane %v10270_v33, 7  ;;  %v10275_v47 = vld [vmem:[#allocation33_spill] sm:$0xff]  ;;  %vm10277_vm5 = vnez %v10276_v1  ;;  %v10278_v41 = vrot.slane %v7734_v5, 1 }
 0x14b   : > { %6288 = vmatprep.mubr.msk.f32.mxu0 %vm10267_vm1, %v8018_v42  ;;  %vm10273_vm14 = vmmov %vm10267_vm1  ;;  %v1444_v11 = vsel %vm10277_vm5, %v10275_v47, 0.0  ;;  %v10279_v42 = vrot.slane %v7722_v21, 1  ;;  %v10429_v6 = vsel %vm10245_vm2, %v10275_v47, 0.0 }
 0x14c   : > { %v8028_v44 = vsel %vm10272_vm10, %v10271_v35, %v10269_v23  ;;  %vm10274_vm4 = vmmov %vm10267_vm1  ;;  %vm10280_vm1 = vcmask 1046528   ;;  %vm8046_vm10 = vcmp.le.s32.totalorder %v1042_v37, 14  ;;  %v10282_v23 = vmov 0  ;;  %v10294_v37 = vld [vmem:[#allocation40_spill] sm:$0xff] }
 0x14d   : > { %6212 = vmatmul.mubr.msk.f32.gmra.mxu1 %vm10273_vm14, %v8028_v44  ;;  %6289 = vmatmul.mubr.msk.f32.gmra.mxu0 %vm10274_vm4, %v2308_v15  ;;  %v8044_v35 = vsel %vm10280_vm1, %v10279_v42, %v10278_v41  ;;  %v10283_v23 = vsel %vm8046_vm10, 4294967295, %v10282_v23  ;;  %vm10285_vm12 = vmmov %vm10274_vm4  ;;  %v10287_v15 = vld [vmem:[#allocation18_spill] sm:$0xff]  ;;  %v2310_v42 = vsel %vm8046_vm10, %v7881_v14, 0.0  ;;  %v10297_v41 = vld [vmem:[#allocation4_spill] sm:$0xff]  ;;  %vm10305_vm10 = vnez %v10061_v51 }
 0x14e   : > { %10281 = vst [vmem:[#allocation9_spill] sm:$0xff] %v8044_v35  ;;  %10284 = vst [vmem:[#allocation8_spill] sm:$0xff] %v10283_v23  ;;  %6214 = vmatprep.mubr.msk.f32.mxu1 %vm10285_vm12, %v1444_v11  ;;  %v10288_v53 = vrot.slane %v10287_v15, 7 }
 0x14f   : > { %vm10286_vm14 = vmmov %vm10274_vm4  ;;  %vm10291_vm4 = vcmask 1040384  }
 0x150   : > { %6291 = vmatprep.mubr.msk.f32.mxu0 %vm10286_vm14, %v8044_v35  ;;  %v8058_v30 = vsel %vm10291_vm4, %v10290_v56, %v10288_v53  ;;  %vm10292_vm1 = vmmov %vm10285_vm12  ;;  %vm10295_vm12 = vnez %v10044_v55  ;;  %v10299_v56 = vld [vmem:[#allocation23_spill] sm:$0xff]  ;;  %v10301_v35 = vld [vmem:[#allocation22_spill] sm:$0xff] }
 0x151   : > { %6215 = vmatmul.mubr.msk.f32.gmra.mxu1 %vm10292_vm1, %v8058_v30  ;;  %vm10293_vm7 = vmmov %vm10292_vm1  ;;  %v1446_v11 = vsel %vm10295_vm12, %v10294_v37, 0.0  ;;  %v10300_v53 = vrot.slane %v10299_v56, 7  ;;  %v10302_v8 = vrot.slane %v10301_v35, 7 }
 0x152   : > { %6292 = vmatmul.mubr.msk.f32.gmra.mxu0 %vm10293_vm7, %v2310_v42  ;;  %vm10296_vm14 = vmmov %vm10292_vm1  ;;  %v10304_v42 = vld [vmem:[#allocation44_spill] sm:$0xff] }
 0x153   : > { %6217 = vmatprep.mubr.msk.f32.mxu1 %vm10296_vm14, %v1446_v11  ;;  %vm10298_vm13 = vmmov %vm10292_vm1  ;;  %v8077_v23 = vsel %vm10291_vm4, %v10302_v8, %v10300_v53  ;;  %v1448_v11 = vsel %vm10305_vm10, %v10304_v42, 0.0  ;;  %v10308_v8 = vld [vmem:[#allocation27_spill] sm:$0xff]  ;;  %vm10309_vm4 = vcmask 1043456   ;;  %v10310_v53 = vrot.slane %v7285_v29, 7 }
 0x154   : > { %6346 = vmatprep.mubr.msk.f32.mxu0 %vm10298_vm13, %v10297_v41  ;;  %vm10303_vm7 = vmmov %vm10292_vm1  ;;  %v8089_v41 = vld [vmem:[%s9703_s3 + $0x20] sm:$0xf]  ;;  %v10440_v34 = vsel %vm10277_vm5, %v10304_v42, 0.0 }
 0x155   : > { %6218 = vmatmul.mubr.msk.f32.gmra.mxu1 %vm10292_vm1, %v8077_v23  ;;  %vm10306_vm13 = vmmov %vm10292_vm1 }
 0x156   : > { %6347 = vmatmul.mubr.msk.f32.vlgmr.msra.gmra.mxu0 %vm10303_vm7, %v6970_v13  ;;  %6220 = vmatprep.mubr.msk.f32.mxu1 %vm10306_vm13, %v1448_v11  ;;  %vm10307_vm14 = vmmov %vm10292_vm1  ;;  %v10311_v13 = vld [vmem:[#allocation29_spill] sm:$0xff]  ;;  %vm10313_vm1 = vcmask 1040384   ;;  %v10321_v11 = vld [vmem:[#allocation34_spill] sm:$0xff] }
 0x157   : > { %6349 = vmatprep.mubr.msk.f32.mxu0 %vm10307_vm14, %v6979_v19  ;;  %6445 = vmatpush3.msk.msra.mxu0 %vm10309_vm4, %v10308_v8  ;;  %v10312_v14 = vrot.slane %v10311_v13, 7  ;;  %vm10314_vm7 = vmmov %vm10309_vm4  ;;  %vm10317_vm14 = vnez %v10087_v43  ;;  %v10322_v8 = vrot.slane %v10321_v11, 7 }
 0x158   : > { %6544 = vmatprep.subr.msk.mxu0 %vm10314_vm7, %v8089_v41  ;;  %vm10315_vm11 = vmmov %vm10306_vm13  ;;  %v1450_v19 = vsel %vm10317_vm14, %v7514_v18, 0.0 }
 0x159   : > { %v8101_v16 = vsel %vm10313_vm1, %v10312_v14, %v10310_v53  ;;  %vm10316_vm13 = vmmov %vm10315_vm11  ;;  %v10320_v14 = vrot.slane %v7351_v39, 7 }
 0x15a   : > { %6221 = vmatmul.mubr.msk.f32.gmra.mxu1 %vm10315_vm11, %v8101_v16  ;;  %6350 = vmatmul.mubr.msk.f32.gmra.mxu0 %vm10316_vm13, %v10220_v50  ;;  %vm10318_vm4 = vmmov %vm10315_vm11  ;;  %v10325_v50 = vld [vmem:[#allocation53_spill] sm:$0xff] }
 0x15b   : > { %6223 = vmatprep.mubr.msk.f32.mxu1 %vm10318_vm4, %v1450_v19  ;;  %vm10319_vm9 = vmmov %vm10318_vm4  ;;  %v8120_v53 = vsel %vm10313_vm1, %v10322_v8, %v10320_v14  ;;  %vm10326_vm13 = vnez %v10325_v50  ;;  %v10329_v14 = vrot.slane %v7399_v10, 7 }
 0x15c   : > { %6352 = vmatprep.mubr.msk.f32.mxu0 %vm10319_vm9, %v10238_v3  ;;  %vm10323_vm11 = vmmov %vm10318_vm4  ;;  %v1452_v19 = vsel %vm10326_vm13, %v7576_v32, 0.0  ;;  %v10328_v3 = vrot.slane %v7414_v25, 7 }
 0x15d   : > { %vm10324_vm7 = vmmov %vm10318_vm4 }
 0x15e   : > { %6224 = vmatmul.mubr.msk.f32.gmra.mxu1 %vm10323_vm11, %v8120_v53  ;;  %6353 = vmatmul.mubr.msk.f32.gmra.mxu0 %vm10324_vm7, %v10236_v12  ;;  %vm10327_vm9 = vmmov %vm10318_vm4  ;;  %v8137_v8 = vsel %vm10313_vm1, %v10329_v14, %v10328_v3  ;;  %v10333_v12 = vld [vmem:[#allocation59_spill] sm:$0xff]  ;;  %v10338_v3 = vrot.slane %v10337_v54, 7  ;;  %v10339_v14 = vld [vmem:[#allocation45_spill] sm:$0xff] }
 0x15f   : > { %6226 = vmatprep.mubr.msk.f32.mxu1 %vm10318_vm4, %v1452_v19  ;;  %6355 = vmatprep.mubr.msk.f32.mxu0 %vm10327_vm9, %v10254_v61  ;;  %10330 = vst [vmem:[#allocation21_spill] sm:$0xff] %v8137_v8  ;;  %vm10331_vm11 = vmmov %vm10318_vm4  ;;  %v1454_v19 = vsel %vm10335_vm8, %v10333_v12, 0.0  ;;  %v817_v61 = vadd.s32 224, %v10249_v28  ;;  %v10340_v50 = vrot.slane %v10339_v14, 7  ;;  %v10355_v28 = vmov 0 }
 0x160   : > { %vm10332_vm7 = vmmov %vm10318_vm4 }
 0x161   : > { %vm10336_vm9 = vmmov %vm10318_vm4 }
 0x162   : > { %6227 = vmatmul.mubr.msk.f32.gmra.mxu1 %vm10331_vm11, %v8137_v8  ;;  %6356 = vmatmul.mubr.msk.f32.gmra.mxu0 %vm10332_vm7, %v10252_v31  ;;  %v8155_v8 = vsel %vm10313_vm1, %v10340_v50, %v10338_v3  ;;  %vm10342_vm11 = vmmov %vm10318_vm4  ;;  %v10344_v31 = vld [vmem:[#allocation60_spill] sm:$0xff]  ;;  %v10348_v50 = vrot.slane %v7540_v46, 7  ;;  %v10349_v3 = vrot.slane %v7516_v9, 7 }
 0x163   : > { %6229 = vmatprep.mubr.msk.f32.mxu1 %vm10318_vm4, %v1454_v19  ;;  %6358 = vmatprep.mubr.msk.f32.mxu0 %vm10336_vm9, %v10270_v33  ;;  %10341 = vst [vmem:[#allocation25_spill] sm:$0xff] %v8155_v8  ;;  %vm10343_vm7 = vmmov %vm10318_vm4  ;;  %vm10345_vm4 = vnez %v10113_v27  ;;  %v1021_v33 = vand.u32 15, %v817_v61  ;;  %v1035_v61 = vand.u32 15, %v819_v24  ;;  %v10364_v24 = vmov 0 }
 0x164   : > { %v1456_v19 = vsel %vm10345_vm4, %v10344_v31, 0.0  ;;  %vm10346_vm9 = vmmov %vm10343_vm7 }
 0x165   : > { %vm10347_vm8 = vmmov %vm10343_vm7  ;;  %vm8185_vm13 = vcmp.ge.s32.totalorder %v1021_v33, 1  ;;  %v10366_v33 = vrot.slane %v7671_v0, 7 }
 0x166   : > { %6230 = vmatmul.mubr.msk.f32.gmra.mxu1 %vm10342_vm11, %v8155_v8  ;;  %6359 = vmatmul.mubr.msk.f32.gmra.mxu0 %vm10343_vm7, %v10268_v40  ;;  %v8173_v8 = vsel %vm10313_vm1, %v10349_v3, %v10348_v50  ;;  %vm10350_vm11 = vmmov %vm10343_vm7  ;;  %v10351_v40 = vld [vmem:[#allocation63_spill] sm:$0xff]  ;;  %v10356_v28 = vsel %vm8185_vm13, 4294967295, %v10355_v28  ;;  %v10359_v3 = vrot.slane %v7587_v48, 7 }
 0x167   : > { %6232 = vmatprep.mubr.msk.f32.mxu1 %vm10346_vm9, %v1456_v19  ;;  %6361 = vmatprep.mubr.msk.f32.mxu0 %vm10347_vm8, %v10289_v62  ;;  %vm10352_vm9 = vnez %v10132_v26  ;;  %vm10353_vm8 = vmmov %vm10343_vm7  ;;  %v10357_v19 = vld [vmem:[#allocation57_spill] sm:$0xff] }
 0x168   : > { %v1458_v62 = vsel %vm10352_vm9, %v10351_v40, 0.0  ;;  %vm10354_vm4 = vmmov %vm10343_vm7  ;;  %v10358_v50 = vrot.slane %v10357_v19, 7  ;;  %vm8206_vm9 = vcmp.ge.s32.totalorder %v1035_v61, 1  ;;  %v10371_v61 = vrot.slane %v7722_v21, 7 }
 0x169   : > { %v10365_v24 = vsel %vm8206_vm9, 4294967295, %v10364_v24 }
 0x16a   : > { %6233 = vmatmul.mubr.msk.f32.gmra.mxu1 %vm10350_vm11, %v8173_v8  ;;  %6362 = vmatmul.mubr.msk.f32.gmra.mxu0 %vm10343_vm7, %v10287_v15  ;;  %v8194_v15 = vsel %vm10313_vm1, %v10359_v3, %v10358_v50  ;;  %vm10360_vm11 = vmmov %vm10354_vm4  ;;  %v10367_v50 = vrot.slane %v7646_v57, 7 }
 0x16b   : > { %6235 = vmatprep.mubr.msk.f32.mxu1 %vm10353_vm8, %v1458_v62  ;;  %6364 = vmatprep.mubr.msk.f32.mxu0 %vm10354_vm4, %v10301_v35  ;;  %vm10361_vm7 = vmmov %vm10354_vm4  ;;  %v10362_v62 = vld [vmem:[#allocation66_spill] sm:$0xff] }
 0x16c   : > { %v1460_v35 = vsel %vm8185_vm13, %v10362_v62, 0.0  ;;  %vm10363_vm8 = vmmov %vm10354_vm4  ;;  %v8215_v3 = vsel %vm10313_vm1, %v10367_v50, %v10366_v33  ;;  %v10473_v50 = vld [vmem:[#allocation10_spill] sm:$0xff] }
 0x16e   : > { %6236 = vmatmul.mubr.msk.f32.gmra.mxu1 %vm10360_vm11, %v8194_v15  ;;  %6365 = vmatmul.mubr.msk.f32.gmra.mxu0 %vm10361_vm7, %v10299_v56  ;;  %vm10368_vm11 = vmmov %vm10354_vm4  ;;  %v1462_v56 = vsel %vm8206_vm9, %v7798_v52, 0.0 }
 0x16f   : > { %6238 = vmatprep.mubr.msk.f32.mxu1 %vm10354_vm4, %v1460_v35  ;;  %6367 = vmatprep.mubr.msk.f32.mxu0 %vm10363_vm8, %v10311_v13  ;;  %vm10369_vm7 = vmmov %vm10354_vm4  ;;  %v1398_v13 = vrot.slane %v7734_v5, 7 }
 0x170   : > { %vm10370_vm8 = vmmov %vm10354_vm4 }
 0x171   : > { %v8233_v35 = vsel %vm10313_vm1, %v10371_v61, %v1398_v13 }
 0x172   : > { %6239 = vmatmul.mubr.msk.f32.gmra.mxu1 %vm10368_vm11, %v8215_v3  ;;  %6368 = vmatmul.mubr.msk.f32.gmra.mxu0 %vm10369_vm7, %v7285_v29  ;;  %vm10372_vm11 = vmmov %vm10354_vm4  ;;  %v10374_v29 = vld [vmem:[#allocation39_spill] sm:$0xff] }
 0x173   : > { %6241 = vmatprep.mubr.msk.f32.mxu1 %vm10354_vm4, %v1462_v56  ;;  %6370 = vmatprep.mubr.msk.f32.mxu0 %vm10370_vm8, %v10321_v11  ;;  %vm10373_vm7 = vmmov %vm10354_vm4  ;;  %vm10375_vm4 = vnez %v10374_v29  ;;  %v8248_v11 = vld [vmem:[%s9703_s3 + $0x1c] sm:$0xf] }
 0x174   : > { %v2676_v33 = vsel %vm10375_vm4, %v7469_v36, 0.0  ;;  %vm10376_vm8 = vmmov %vm10373_vm7  ;;  %v2688_v36 = vsel %vm10277_vm5, %v10294_v37, 0.0 }
 0x175   : > { %vm10377_vm9 = vmmov %vm10373_vm7 }
 0x176   : > { %6242 = vmatmul.mubr.msk.f32.gmra.mxu1 %vm10372_vm11, %v8233_v35  ;;  %6371 = vmatmul.mubr.msk.f32.gmra.mxu0 %vm10373_vm7, %v7351_v39  ;;  %vm10378_vm1 = vmmov %vm10373_vm7  ;;  %v2678_v39 = vsel %vm10190_vm15, %v7713_v20, 0.0  ;;  %vm10380_vm7 = vcmask 1043456  }
 0x177   : > { %6296 = vmatprep.mubr.msk.f32.mxu1 %vm10376_vm8, %v2676_v33  ;;  %6373 = vmatprep.mubr.msk.f32.mxu0 %vm10377_vm9, %v7399_v10  ;;  %vm10379_vm11 = vmmov %vm10378_vm1  ;;  %v2680_v10 = vsel %vm10202_vm6, %v10228_v63, 0.0  ;;  %v10481_v33 = vld [vmem:[#allocation19_spill] sm:$0xff] }
 0x178   : > { %vm10381_vm8 = vmmov %vm10378_vm1 }
 0x179   : > { %vm10382_vm9 = vmmov %vm10378_vm1 }
 0x17a   : > { %6297 = vmatmul.mubr.msk.f32.vlgmr.msra.gmra.mxu1 %vm10378_vm1, %v7533_v7  ;;  %6374 = vmatmul.mubr.msk.f32.gmra.mxu0 %vm10379_vm11, %v7414_v25  ;;  %vm10383_vm13 = vmmov %vm10380_vm7  ;;  %v2682_v25 = vsel %vm10230_vm3, %v10243_v60, 0.0  ;;  %v3736_v7 = vsel %vm10375_vm4, %v7713_v20, 0.0  ;;  %v10408_v20 = vsel %vm10190_vm15, %v10228_v63, 0.0  ;;  %v10434_v60 = vsel %vm10261_vm0, %v10294_v37, 0.0  ;;  %v10457_v37 = vld [vmem:[#allocation26_spill] sm:$0xff] }
 0x17b   : > { %6395 = vmatpush3.msk.msra.mxu1 %vm10380_vm7, %v7818_v58  ;;  %6299 = vmatprep.mubr.msk.f32.mxu1 %vm10381_vm8, %v2678_v39  ;;  %vm10384_vm11 = vmmov %vm10378_vm1 }
 0x17c   : > { %6376 = vmatprep.mubr.msk.f32.mxu0 %vm10382_vm9, %v10339_v14  ;;  %6494 = vmatprep.subr.msk.mxu1 %vm10383_vm13, %v8248_v11  ;;  %vm10385_vm14 = vmmov %vm10378_vm1  ;;  %v10467_v14 = vld [vmem:[#allocation32_spill] sm:$0xff] }
 0x17d   : > { %vm10386_vm7 = vmmov %vm10378_vm1 }
 0x17e   : > { %6300 = vmatmul.mubr.msk.f32.gmra.mxu1 %vm10378_vm1, %v7932_v45  ;;  %6377 = vmatmul.mubr.msk.f32.gmra.mxu0 %vm10384_vm11, %v10337_v54  ;;  %vm10387_vm8 = vmmov %vm10378_vm1  ;;  %v2684_v54 = vsel %vm10245_vm2, %v10259_v59, 0.0  ;;  %v2670_v59 = vrot.slane %v7810_v22, 7 }
 0x17f   : > { %6302 = vmatprep.mubr.msk.f32.mxu1 %vm10385_vm14, %v2680_v10  ;;  %6379 = vmatprep.mubr.msk.f32.mxu0 %vm10386_vm7, %v7516_v9  ;;  %vm10388_vm13 = vmmov %vm10378_vm1  ;;  %v8314_v9 = vld [vmem:[#allocation2 + $0x118] sm:$0xff] }
 0x180   : > { %vm10389_vm9 = vmmov %vm10378_vm1  ;;  %10401 = vst [vmem:[#allocation3_spill] sm:$0xff] %v8314_v9 }
 0x181   : > { %vm10390_vm14 = vmmov %vm10378_vm1 }
 0x182   : > { %6303 = vmatmul.mubr.msk.f32.gmra.mxu1 %vm10387_vm8, %v7977_v38  ;;  %6380 = vmatmul.mubr.msk.f32.gmra.mxu0 %vm10388_vm13, %v7540_v46  ;;  %vm10391_vm11 = vmmov %vm10378_vm1  ;;  %v2692_v46 = vsel %vm10305_vm10, %v7514_v18, 0.0 }
 0x183   : > { %6305 = vmatprep.mubr.msk.f32.mxu1 %vm10389_vm9, %v2682_v25  ;;  %6382 = vmatprep.mubr.msk.f32.mxu0 %vm10378_vm1, %v7587_v48  ;;  %vm10392_vm7 = vmmov %vm10378_vm1  ;;  %v2686_v48 = vsel %vm10261_vm0, %v10275_v47, 0.0  ;;  %v10446_v47 = vsel %vm10295_vm12, %v7514_v18, 0.0  ;;  %v10452_v18 = vsel %vm10305_vm10, %v7576_v32, 0.0  ;;  %v8505_v25 = vld [vmem:[#allocation2 + $0x120] sm:$0xff] }
 0x184   : > { %vm10393_vm8 = vmmov %vm10378_vm1 }
 0x185   : > { %vm10394_vm13 = vmmov %vm10378_vm1 }
 0x186   : > { %6306 = vmatmul.mubr.msk.f32.gmra.mxu1 %vm10390_vm14, %v8002_v4  ;;  %6383 = vmatmul.mubr.msk.f32.gmra.mxu0 %vm10391_vm11, %v10357_v19  ;;  %vm10395_vm9 = vmmov %vm10378_vm1  ;;  %v10471_v19 = vld [vmem:[#allocation15_spill] sm:$0xff] }
 0x187   : > { %6308 = vmatprep.mubr.msk.f32.mxu1 %vm10392_vm7, %v2684_v54  ;;  %6385 = vmatprep.mubr.msk.f32.mxu0 %vm10393_vm8, %v7646_v57  ;;  %vm10396_vm14 = vmmov %vm10378_vm1 }
 0x188   : > { %vm10397_vm11 = vmmov %vm10378_vm1 }
 0x189   : > { %vm10398_vm7 = vmmov %vm10378_vm1 }
 0x18a   : > { %6309 = vmatmul.mubr.msk.f32.gmra.mxu1 %vm10394_vm13, %v8028_v44  ;;  %6386 = vmatmul.mubr.msk.f32.gmra.mxu0 %vm10395_vm9, %v7671_v0  ;;  %vm10399_vm8 = vmmov %vm10378_vm1  ;;  %v10416_v0 = vld [vmem:[#allocation21_spill] sm:$0xff] }
 0x18b   : > { %6311 = vmatprep.mubr.msk.f32.mxu1 %vm10378_vm1, %v2686_v48  ;;  %6388 = vmatprep.mubr.msk.f32.mxu0 %vm10396_vm14, %v7722_v21  ;;  %vm10400_vm13 = vmmov %vm10378_vm1  ;;  %v2690_v21 = vsel %vm10295_vm12, %v10304_v42, 0.0  ;;  %v10463_v42 = vld [vmem:[#allocation7_spill] sm:$0xff]  ;;  %v10490_v48 = vld [vmem:[#allocation24_spill] sm:$0xff] }
 0x18c   : > { %vm10402_vm9 = vmmov %vm10378_vm1 }
 0x18d   : > { %vm10403_vm14 = vmmov %vm10378_vm1 }
 0x18e   : > { %6312 = vmatmul.mubr.msk.f32.gmra.mxu1 %vm10397_vm11, %v8058_v30  ;;  %6389 = vmatmul.mubr.msk.f32.gmra.mxu0 %vm10398_vm7, %v7734_v5  ;;  %vm10404_vm11 = vmmov %vm10378_vm1  ;;  %v8442_v5 = vpop.f32.mrf.mxu0 }
 0x18f   : > { %6314 = vmatprep.mubr.msk.f32.mxu1 %vm10399_vm8, %v2688_v36  ;;  %6391 = vmatprep.mubr.msk.f32.mxu0 %vm10400_vm13, %v7810_v22  ;;  %vm10405_vm7 = vmmov %vm10378_vm1  ;;  %v10492_v36 = vld [vmem:[#allocation41_spill] sm:$0xff] }
 0x190   : > { %vm10406_vm8 = vmmov %vm10378_vm1 }
 0x191   : > { %vm10407_vm13 = vmmov %vm10378_vm1 }
 0x192   : > { %6315 = vmatmul.mubr.msk.f32.gmra.mxu1 %vm10402_vm9, %v8077_v23  ;;  %6392 = vmatmul.mubr.msk.f32.gmra.mxu0 %vm10378_vm1, %v8314_v9  ;;  %vm10409_vm4 = vmmov %vm10378_vm1  ;;  %vm10410_vm9 = vcmask 1043456  }
 0x193   : > { %6317 = vmatprep.mubr.msk.f32.mxu1 %vm10403_vm14, %v2690_v21  ;;  %6446 = vmatprep.mubr.msk.f32.mxu0 %vm10404_vm11, %v3736_v7  ;;  %vm10411_vm14 = vmmov %vm10378_vm1  ;;  %vm10412_vm11 = vnez %v10087_v43 }
 0x194   : > { %v2694_v57 = vsel %vm10412_vm11, %v7576_v32, 0.0  ;;  %vm10415_vm15 = vmmov %vm10378_vm1  ;;  %v10459_v51 = vsel %vm10412_vm11, %v10333_v12, 0.0  ;;  %v10461_v32 = vld [vmem:[#allocation5_spill] sm:$0xff] }
 0x195   : > { %vm10424_vm6 = vmmov %vm10378_vm1  ;;  %vm10462_vm10 = vnez %v10461_v32  ;;  %v10539_v32 = vld [vmem:[#allocation67_spill] sm:$0xff] }
 0x196   : > { %6318 = vmatmul.mubr.msk.f32.gmra.mxu1 %vm10405_vm7, %v8101_v16  ;;  %6447 = vmatmul.mubr.msk.f32.vlgmr.msra.gmra.mxu0 %vm10406_vm8, %v7932_v45  ;;  %vm10413_vm7 = vmmov %vm10378_vm1  ;;  %v10423_v45 = vld [vmem:[#allocation25_spill] sm:$0xff] }
 0x197   : > { %6320 = vmatprep.mubr.msk.f32.mxu1 %vm10407_vm13, %v2692_v46  ;;  %6449 = vmatprep.mubr.msk.f32.mxu0 %vm10409_vm4, %v10408_v20  ;;  %vm10417_vm8 = vmmov %vm10378_vm1  ;;  %v8526_v46 = vld [vmem:[#allocation2 + $0x128] sm:$0xff] }
 0x198   : > { %6545 = vmatpush3.msk.msra.mxu0 %vm10410_vm9, %v8089_v41  ;;  %vm10418_vm13 = vmmov %vm10378_vm1  ;;  %v10464_v41 = vsel %vm10462_vm10, %v10463_v42, 0.0 }
 0x199   : > { %vm10421_vm9 = vmmov %vm10378_vm1 }
 0x19a   : > { %6321 = vmatmul.mubr.msk.f32.gmra.mxu1 %vm10378_vm1, %v8120_v53  ;;  %6450 = vmatmul.mubr.msk.f32.gmra.mxu0 %vm10411_vm14, %v7977_v38  ;;  %v10419_v38 = vld [vmem:[#allocation53_spill] sm:$0xff]  ;;  %vm10425_vm14 = vmmov %vm10378_vm1 }
 0x19b   : > { %6323 = vmatprep.mubr.msk.f32.mxu1 %vm10413_vm7, %v2694_v57  ;;  %6452 = vmatprep.mubr.msk.f32.mxu0 %vm10415_vm15, %v10414_v17  ;;  %vm10420_vm4 = vnez %v10419_v38  ;;  %vm10428_vm15 = vmmov %vm10378_vm1  ;;  %v10500_v57 = vld [vmem:[#allocation30_spill] sm:$0xff]  ;;  %v3732_v38 = vrot.slane %v8526_v46, 7 }
 0x19c   : > { %v2696_v58 = vsel %vm10420_vm4, %v10333_v12, 0.0  ;;  %vm10431_vm3 = vmmov %vm10378_vm1  ;;  %v10469_v43 = vsel %vm10420_vm4, %v10344_v31, 0.0 }
 0x19d   : > { %vm10436_vm2 = vmmov %vm10378_vm1 }
 0x19e   : > { %6324 = vmatmul.mubr.msk.f32.gmra.mxu1 %vm10417_vm8, %v10416_v0  ;;  %6453 = vmatmul.mubr.msk.f32.gmra.mxu0 %vm10418_vm13, %v8002_v4  ;;  %v10426_v4 = vld [vmem:[#allocation54_spill] sm:$0xff]  ;;  %vm10430_vm8 = vmmov %vm10378_vm1 }
 0x19f   : > { %6326 = vmatprep.mubr.msk.f32.mxu1 %vm10421_vm9, %v2696_v58  ;;  %6455 = vmatprep.mubr.msk.f32.mxu0 %vm10378_vm1, %v10422_v49  ;;  %vm10427_vm7 = vnez %v10426_v4  ;;  %vm10432_vm13 = vmmov %vm10378_vm1  ;;  %vm10433_vm9 = vnez %v10113_v27  ;;  %v10496_v27 = vld [vmem:[#allocation46_spill] sm:$0xff]  ;;  %v10511_v4 = vld [vmem:[#allocation52_spill] sm:$0xff] }
 0x1a0   : > { %v2698_v63 = vsel %vm10427_vm7, %v10344_v31, 0.0  ;;  %vm10442_vm0 = vmmov %vm10378_vm1  ;;  %v10479_v31 = vsel %vm10427_vm7, %v10351_v40, 0.0 }
 0x1a1   : > { %vm10447_vm5 = vmmov %vm10442_vm0 }
 0x1a2   : > { %6327 = vmatmul.mubr.msk.f32.gmra.mxu1 %vm10424_vm6, %v10423_v45  ;;  %6456 = vmatmul.mubr.msk.f32.gmra.mxu0 %vm10425_vm14, %v8028_v44  ;;  %v2700_v44 = vsel %vm10433_vm9, %v10351_v40, 0.0  ;;  %vm10435_vm6 = vmmov %vm10378_vm1  ;;  %v10488_v40 = vsel %vm10433_vm9, %v10362_v62, 0.0 }
 0x1a3   : > { %6329 = vmatprep.mubr.msk.f32.mxu1 %vm10428_vm15, %v2698_v63  ;;  %6458 = vmatprep.mubr.msk.f32.mxu0 %vm10430_vm8, %v10429_v6  ;;  %vm10437_vm14 = vmmov %vm10378_vm1  ;;  %vm10438_vm15 = vnez %v10132_v26  ;;  %v10515_v63 = vld [vmem:[#allocation55_spill] sm:$0xff] }
 0x1a4   : > { %vm10439_vm8 = vmmov %vm10378_vm1 }
 0x1a5   : > { %vm10453_vm12 = vmmov %vm10442_vm0 }
 0x1a6   : > { %6330 = vmatmul.mubr.msk.f32.gmra.mxu1 %vm10431_vm3, %v8173_v8  ;;  %6459 = vmatmul.mubr.msk.f32.gmra.mxu0 %vm10432_vm13, %v8058_v30  ;;  %v2702_v30 = vsel %vm10438_vm15, %v10362_v62, 0.0  ;;  %vm10441_vm3 = vmmov %vm10378_vm1  ;;  %v3730_v62 = vrot.slane %v8505_v25, 7 }
 0x1a7   : > { %6332 = vmatprep.mubr.msk.f32.mxu1 %vm10378_vm1, %v2700_v44  ;;  %6461 = vmatprep.mubr.msk.f32.mxu0 %vm10435_vm6, %v10434_v60  ;;  %vm10443_vm13 = vmmov %vm10442_vm0  ;;  %vm10444_vm1 = vnez %v10356_v28 }
 0x1a8   : > { %v2704_v2 = vsel %vm10444_vm1, %v7798_v52, 0.0  ;;  %vm10445_vm6 = vmmov %vm10442_vm0 }
 0x1a9   : > { %vm10470_vm11 = vmmov %vm10442_vm0 }
 0x1aa   : > { %6333 = vmatmul.mubr.msk.f32.gmra.mxu1 %vm10436_vm2, %v8194_v15  ;;  %6462 = vmatmul.mubr.msk.f32.gmra.mxu0 %vm10437_vm14, %v8077_v23  ;;  %vm10448_vm2 = vcmask 1040384   ;;  %v2672_v23 = vrot.slane %v8314_v9, 7  ;;  %vm10449_vm14 = vmmov %vm10442_vm0 }
 0x1ab   : > { %6335 = vmatprep.mubr.msk.f32.mxu1 %vm10439_vm8, %v2702_v30  ;;  %6464 = vmatprep.mubr.msk.f32.mxu0 %vm10441_vm3, %v10440_v34  ;;  %v2671_v1 = vsel %vm10448_vm2, %v1398_v13, %v2670_v59  ;;  %vm10450_vm8 = vmmov %vm10442_vm0  ;;  %vm10451_vm3 = vnez %v10365_v24  ;;  %v10477_v13 = vld [vmem:[#allocation37_spill] sm:$0xff]  ;;  %v10519_v30 = vld [vmem:[#allocation42_spill] sm:$0xff] }
 0x1ac   : > { %vm10480_vm4 = vmmov %vm10442_vm0  ;;  %v3764_v26 = vsel %vm10444_vm1, %v2671_v1, 0.0  ;;  %v10521_v34 = vld [vmem:[#allocation58_spill] sm:$0xff]  ;;  %v10525_v24 = vld [vmem:[#allocation61_spill] sm:$0xff] }
 0x1ad   : > { %vm10489_vm7 = vmmov %vm10442_vm0 }
 0x1ae   : > { %6336 = vmatmul.mubr.msk.f32.gmra.mxu1 %vm10442_vm0, %v8215_v3  ;;  %6465 = vmatmul.mubr.msk.f32.gmra.mxu0 %vm10443_vm13, %v8101_v16  ;;  %v2706_v16 = vsel %vm10451_vm3, %v2671_v1, 0.0  ;;  %vm10454_vm13 = vmmov %vm10448_vm2 }
 0x1af   : > { %6338 = vmatprep.mubr.msk.f32.mxu1 %vm10445_vm6, %v2704_v2  ;;  %6467 = vmatprep.mubr.msk.f32.mxu0 %vm10447_vm5, %v10446_v47  ;;  %v2673_v55 = vsel %vm10454_vm13, %v2670_v59, %v2672_v23  ;;  %vm10455_vm6 = vmmov %vm10442_vm0 }
 0x1b0   : > { %vm10456_vm5 = vmmov %vm10442_vm0 }
 0x1b1   : > { %vm10458_vm2 = vmmov %vm10442_vm0 }
 0x1b2   : > { %6339 = vmatmul.mubr.msk.f32.gmra.mxu1 %vm10449_vm14, %v8233_v35  ;;  %6468 = vmatmul.mubr.msk.f32.gmra.mxu0 %vm10450_vm8, %v8120_v53  ;;  %vm10460_vm14 = vmmov %vm10442_vm0  ;;  %v8458_v53 = vpop.f32.mrf.mxu0 }
 0x1b3   : > { %6341 = vmatprep.mubr.msk.f32.mxu1 %vm10442_vm0, %v2706_v16  ;;  %6470 = vmatprep.mubr.msk.f32.mxu0 %vm10453_vm12, %v10452_v18  ;;  %vm10465_vm8 = vmmov %vm10442_vm0  ;;  %vm10466_vm12 = vcmask 1043456   ;;  %v10530_v16 = vld [vmem:[#allocation62_spill] sm:$0xff] }
 0x1b4   : > { %vm10468_vm13 = vmmov %vm10442_vm0  ;;  %v8469_v12 = vpop.f32.mrf.mxu0 }
 0x1b5   : > { %vm10499_vm9 = vmmov %vm10442_vm0 }
 0x1b6   : > { %6342 = vmatmul.mubr.msk.f32.gmra.mxu1 %vm10455_vm6, %v2673_v55  ;;  %6471 = vmatmul.mubr.msk.f32.gmra.mxu0 %vm10456_vm5, %v10416_v0  ;;  %vm10472_vm6 = vnez %v10471_v19  ;;  %vm10475_vm5 = vmmov %vm10442_vm0  ;;  %v8485_v61 = vpop.f32.mrf.mxu0  ;;  %v10550_v19 = vld [vmem:[#allocation72_spill] sm:$0xff] }
 0x1b7   : > { %6396 = vmatprep.mubr.msk.f32.mxu1 %vm10458_vm2, %v10457_v37  ;;  %6473 = vmatprep.mubr.msk.f32.mxu0 %vm10460_vm14, %v10459_v51  ;;  %v10474_v56 = vsel %vm10472_vm6, %v10473_v50, 0.0  ;;  %vm10476_vm2 = vmmov %vm10442_vm0  ;;  %v10534_v37 = vld [vmem:[#allocation65_spill] sm:$0xff] }
 0x1b8   : > { %vm10478_vm14 = vmmov %vm10442_vm0  ;;  %v8487_v29 = vpop.f32.mrf.mxu0 }
 0x1b9   : > { %vm10514_vm1 = vmmov %vm10442_vm0 }
 0x1ba   : > { %6397 = vmatmul.mubr.msk.f32.vlgmr.msra.gmra.mxu1 %vm10465_vm8, %v10464_v41  ;;  %6474 = vmatmul.mubr.msk.f32.gmra.mxu0 %vm10442_vm0, %v10423_v45  ;;  %vm10482_vm8 = vnez %v10481_v33  ;;  %v8503_v10 = vpop.f32.mrf.mxu0  ;;  %v10509_v45 = vld [vmem:[#allocation38_spill] sm:$0xff]  ;;  %v10561_v33 = vld [vmem:[#allocation73_spill] sm:$0xff] }
 0x1bb   : > { %6495 = vmatpush3.msk.msra.mxu1 %vm10466_vm12, %v8248_v11  ;;  %6399 = vmatprep.mubr.msk.f32.mxu1 %vm10468_vm13, %v10467_v14  ;;  %v10483_v11 = vld [vmem:[#allocation35_spill] sm:$0xff]  ;;  %vm10485_vm12 = vmmov %vm10442_vm0  ;;  %v8576_v47 = vpop.f32.mrf.mxu1 }
 0x1bc   : > { %6476 = vmatprep.mubr.msk.f32.mxu0 %vm10470_vm11, %v10469_v43  ;;  %v10484_v39 = vsel %vm10482_vm8, %v10483_v11, 0.0  ;;  %vm10487_vm13 = vmmov %vm10442_vm0  ;;  %v8507_v54 = vpop.f32.mrf.mxu0  ;;  %vm10491_vm11 = vnez %v10490_v48  ;;  %v10537_v43 = vld [vmem:[#allocation51_spill] sm:$0xff] }
 0x1bd   : > { %v10493_v21 = vsel %vm10491_vm11, %v10492_v36, 0.0  ;;  %v8594_v51 = vpop.f32.mrf.mxu1  ;;  %v10573_v48 = vld [vmem:[#allocation75_spill] sm:$0xff] }
 0x1be   : > { %6400 = vmatmul.mubr.msk.f32.gmra.mxu1 %vm10475_vm5, %v10474_v56  ;;  %6477 = vmatmul.mubr.msk.f32.gmra.mxu0 %vm10476_vm2, %v8173_v8  ;;  %v10486_v8 = vld [vmem:[#allocation43_spill] sm:$0xff]  ;;  %vm10494_vm5 = vmmov %vm10442_vm0  ;;  %v8524_v7 = vpop.f32.mrf.mxu0  ;;  %v10542_v56 = vsel %vm10472_vm6, %v10483_v11, 0.0 }
 0x1bf   : > { %6402 = vmatprep.mubr.msk.f32.mxu1 %vm10478_vm14, %v10477_v13  ;;  %6479 = vmatprep.mubr.msk.f32.mxu0 %vm10480_vm4, %v10479_v31  ;;  %vm10495_vm2 = vmmov %vm10442_vm0  ;;  %vm10501_vm4 = vnez %v10500_v57  ;;  %v8598_v41 = vpop.f32.mrf.mxu1  ;;  %v10584_v57 = vld [vmem:[#allocation76_spill] sm:$0xff] }
 0x1c0   : > { %vm10497_vm14 = vmmov %vm10442_vm0  ;;  %v8528_v20 = vpop.f32.mrf.mxu0 }
 0x1c1   : > { %v8616_v31 = vpop.f32.mrf.mxu1 }
 0x1c2   : > { %6403 = vmatmul.mubr.msk.f32.gmra.mxu1 %vm10442_vm0, %v10484_v39  ;;  %6480 = vmatmul.mubr.msk.f32.gmra.mxu0 %vm10485_vm12, %v8194_v15  ;;  %v10498_v15 = vsel %vm10438_vm15, %v7798_v52, 0.0  ;;  %vm10504_vm12 = vmmov %vm10442_vm0  ;;  %v10505_v52 = vld [vmem:[#allocation50_spill] sm:$0xff]  ;;  %v8544_v58 = vpop.f32.mrf.mxu0 }
 0x1c3   : > { %6405 = vmatprep.mubr.msk.f32.mxu1 %vm10487_vm13, %v10486_v8  ;;  %6482 = vmatprep.mubr.msk.f32.mxu0 %vm10489_vm7, %v10488_v40  ;;  %vm10506_vm15 = vmmov %vm10442_vm0  ;;  %vm10508_vm7 = vcmask 1040384   ;;  %v8620_v40 = vpop.f32.mrf.mxu1 }
 0x1c4   : > { %vm10507_vm13 = vmmov %vm10442_vm0  ;;  %v3731_v0 = vsel %vm10508_vm7, %v2672_v23, %v3730_v62  ;;  %v8546_v49 = vpop.f32.mrf.mxu0  ;;  %v10528_v23 = vld [vmem:[#allocation49_spill] sm:$0xff]  ;;  %10547 = vst [vmem:[#allocation12_spill] sm:$0xff] %v8620_v40 }
 0x1c5   : > { %v3766_v28 = vsel %vm10451_vm3, %v3731_v0, 0.0  ;;  %vm10526_vm3 = vmmov %vm10514_vm1 }
 0x1c6   : > { %6406 = vmatmul.mubr.msk.f32.gmra.mxu1 %vm10494_vm5, %v10493_v21  ;;  %6483 = vmatmul.mubr.msk.f32.gmra.mxu0 %vm10495_vm2, %v8215_v3  ;;  %v10502_v3 = vld [vmem:[#allocation48_spill] sm:$0xff]  ;;  %vm10510_vm5 = vnez %v10509_v45  ;;  %vm10513_vm2 = vmmov %vm10442_vm0  ;;  %v8560_v44 = vpop.f32.mrf.mxu0  ;;  %v10594_v45 = vld [vmem:[#allocation70_spill] sm:$0xff] }
 0x1c7   : > { %6408 = vmatprep.mubr.msk.f32.mxu1 %vm10497_vm14, %v10496_v27  ;;  %6485 = vmatprep.mubr.msk.f32.mxu0 %vm10499_vm9, %v10498_v15  ;;  %v10503_v17 = vsel %vm10501_vm4, %v10502_v3, 0.0  ;;  %vm10516_vm14 = vmmov %vm10442_vm0  ;;  %v10548_v15 = vld [vmem:[#allocation56_spill] sm:$0xff] }
 0x1c8   : > { %vm10517_vm9 = vmmov %vm10442_vm0  ;;  %v8562_v60 = vpop.f32.mrf.mxu0 }
 0x1ca   : > { %6409 = vmatmul.mubr.msk.f32.gmra.mxu1 %vm10442_vm0, %v10503_v17  ;;  %6486 = vmatmul.mubr.msk.f32.gmra.mxu0 %vm10504_vm12, %v8233_v35  ;;  %v10512_v35 = vsel %vm10510_vm5, %v10511_v4, 0.0  ;;  %vm10518_vm0 = vmmov %vm10508_vm7  ;;  %vm10520_vm12 = vnez %v10519_v30  ;;  %v8574_v2 = vpop.f32.mrf.mxu0  ;;  %v8638_v17 = vpop.f32.mrf.mxu1  ;;  %v10605_v30 = vld [vmem:[#allocation71_spill] sm:$0xff] }
 0x1cb   : > { %6411 = vmatprep.mubr.msk.f32.mxu1 %vm10506_vm15, %v10505_v52  ;;  %6488 = vmatprep.mubr.msk.f32.mxu0 %vm10507_vm13, %v3764_v26  ;;  %v3733_v6 = vsel %vm10518_vm0, %v3730_v62, %v3732_v38  ;;  %v10522_v59 = vsel %vm10520_vm12, %v10521_v34, 0.0  ;;  %vm10523_vm15 = vmmov %vm10514_vm1  ;;  %v10553_v62 = vsel %vm10482_vm8, %v10492_v36, 0.0  ;;  %10557 = vst [vmem:[#allocation11_spill] sm:$0xff] %v8638_v17 }
 0x1cc   : > { %vm10524_vm13 = vmmov %vm10514_vm1  ;;  %v8578_v1 = vpop.f32.mrf.mxu0  ;;  %v8642_v0 = vpop.f32.mrf.mxu1 }
 0x1cd   : > { %vm10527_vm7 = vmmov %vm10514_vm1  ;;  %10558 = vst [vmem:[#allocation28_spill] sm:$0xff] %v8642_v0  ;;  %v10601_v0 = vld [vmem:[#allocation9_spill] sm:$0xff] }
 0x1ce   : > { %6412 = vmatmul.mubr.msk.f32.gmra.mxu1 %vm10513_vm2, %v10512_v35  ;;  %6489 = vmatmul.mubr.msk.f32.gmra.mxu0 %vm10514_vm1, %v2673_v55  ;;  %vm10529_vm2 = vnez %v10528_v23  ;;  %v10532_v55 = vsel %vm10462_vm10, %v10473_v50, 0.0  ;;  %vm10536_vm0 = vmmov %vm10514_vm1  ;;  %v8596_v42 = vpop.f32.mrf.mxu0  ;;  %v10559_v35 = vld [vmem:[#allocation64_spill] sm:$0xff] }
 0x1cf   : > { %6414 = vmatprep.mubr.msk.f32.mxu1 %vm10516_vm14, %v10515_v63  ;;  %6491 = vmatprep.mubr.msk.f32.mxu0 %vm10517_vm9, %v3766_v28  ;;  %v10531_v18 = vsel %vm10529_vm2, %v10530_v16, 0.0  ;;  %vm10533_vm14 = vmmov %vm10514_vm1  ;;  %v10564_v28 = vsel %vm10491_vm11, %v10502_v3, 0.0 }
 0x1d0   : > { %vm10535_vm9 = vmmov %vm10514_vm1 }
 0x1d1   : > { %vm10541_vm10 = vmmov %vm10536_vm0 }
 0x1d2   : > { %6415 = vmatmul.mubr.msk.f32.gmra.mxu1 %vm10523_vm15, %v10522_v59  ;;  %6492 = vmatmul.mubr.msk.f32.gmra.mxu0 %vm10524_vm13, %v3733_v6  ;;  %vm10538_vm15 = vnez %v10537_v43  ;;  %vm10543_vm13 = vmmov %vm10536_vm0  ;;  %v8660_v6 = vpop.f32.mrf.mxu1 }
 0x1d3   : > { %6417 = vmatprep.mubr.msk.f32.mxu1 %vm10526_vm3, %v10525_v24  ;;  %6546 = vmatprep.mubr.msk.f32.mxu0 %vm10527_vm7, %v10467_v14  ;;  %v8600_v14 = vpop.f32.mrf.mxu0  ;;  %v10540_v50 = vsel %vm10538_vm15, %v10539_v32, 0.0  ;;  %vm10545_vm3 = vmmov %vm10536_vm0  ;;  %10569 = vst [vmem:[#allocation31_spill] sm:$0xff] %v8660_v6 }
 0x1d4   : > { %vm10546_vm7 = vmmov %vm10536_vm0 }
 0x1d5   : > { %v8618_v39 = vpop.f32.mrf.mxu0  ;;  %vm10552_vm6 = vmmov %vm10536_vm0 }
 0x1d6   : > { %6418 = vmatmul.mubr.msk.f32.gmra.mxu1 %vm10514_vm1, %v10531_v18  ;;  %6547 = vmatmul.mubr.msk.f32.vlgmr.msra.gmra.mxu0 %vm10533_vm14, %v10532_v55  ;;  %vm10549_vm1 = vnez %v10548_v15  ;;  %vm10554_vm14 = vmmov %vm10536_vm0  ;;  %v8664_v18 = vpop.f32.mrf.mxu1 }
 0x1d7   : > { %6420 = vmatprep.mubr.msk.f32.mxu1 %vm10535_vm9, %v10534_v37  ;;  %6549 = vmatprep.mubr.msk.f32.mxu0 %vm10536_vm0, %v10477_v13  ;;  %v10544_v13 = vld [vmem:[#allocation74_spill] sm:$0xff]  ;;  %v8622_v21 = vpop.f32.mrf.mxu0  ;;  %v10551_v11 = vsel %vm10549_vm1, %v10550_v19, 0.0  ;;  %vm10556_vm9 = vmmov %vm10536_vm0  ;;  %10570 = vst [vmem:[#allocation14_spill] sm:$0xff] %v8664_v18  ;;  %v3333_v18 = vrot.slane %v8314_v9, 1  ;;  %v10629_v43 = vsel %vm10549_vm1, %v10561_v33, 0.0 }
 0x1d8   : > { %vm10563_vm8 = vmmov %vm10536_vm0 }
 0x1d9   : > { %v8640_v26 = vpop.f32.mrf.mxu0  ;;  %vm10575_vm11 = vmmov %vm10536_vm0 }
 0x1da   : > { %6421 = vmatmul.mubr.msk.f32.gmra.mxu1 %vm10541_vm10, %v10540_v50  ;;  %6550 = vmatmul.mubr.msk.f32.gmra.mxu0 %vm10543_vm13, %v10542_v56  ;;  %vm10560_vm10 = vnez %v10559_v35  ;;  %vm10565_vm13 = vmmov %vm10536_vm0  ;;  %v10571_v50 = vld [vmem:[#allocation68_spill] sm:$0xff]  ;;  %v10576_v56 = vsel %vm10501_vm4, %v10511_v4, 0.0 }
 0x1db   : > { %6423 = vmatprep.mubr.msk.f32.mxu1 %vm10545_vm3, %v10544_v13  ;;  %6552 = vmatprep.mubr.msk.f32.mxu0 %vm10546_vm7, %v10486_v8  ;;  %v10555_v8 = vld [vmem:[#allocation77_spill] sm:$0xff]  ;;  %v8644_v38 = vpop.f32.mrf.mxu0  ;;  %v10562_v36 = vsel %vm10560_vm10, %v10561_v33, 0.0  ;;  %vm10567_vm3 = vmmov %vm10536_vm0 }
 0x1dc   : > { %vm10568_vm7 = vmmov %vm10536_vm0 }
 0x1dd   : > { %v8662_v59 = vpop.f32.mrf.mxu0  ;;  %vm10586_vm4 = vmmov %vm10536_vm0 }
 0x1de   : > { %6424 = vmatmul.mubr.msk.f32.gmra.mxu1 %vm10552_vm6, %v10551_v11  ;;  %6553 = vmatmul.mubr.msk.f32.gmra.mxu0 %vm10554_vm14, %v10553_v62  ;;  %vm10572_vm6 = vnez %v10571_v50  ;;  %vm10577_vm14 = vmmov %vm10536_vm0  ;;  %v8682_v11 = vpop.f32.mrf.mxu1 }
 0x1df   : > { %6426 = vmatprep.mubr.msk.f32.mxu1 %vm10556_vm9, %v10555_v8  ;;  %6555 = vmatprep.mubr.msk.f32.mxu0 %vm10536_vm0, %v10496_v27  ;;  %v10566_v27 = vld [vmem:[#allocation6_spill] sm:$0xff]  ;;  %v8666_v55 = vpop.f32.mrf.mxu0  ;;  %v10574_v3 = vsel %vm10572_vm6, %v10573_v48, 0.0  ;;  %vm10579_vm9 = vmmov %vm10536_vm0  ;;  %10580 = vst [vmem:[#allocation13_spill] sm:$0xff] %v8682_v11 }
 0x1e0   : > { %vm10633_vm1 = vmmov %vm10536_vm0 }
 0x1e1   : > { %v8684_v62 = vpop.f32.mrf.mxu0 }
 0x1e2   : > { %6427 = vmatmul.mubr.msk.f32.gmra.mxu1 %vm10563_vm8, %v10562_v36  ;;  %6556 = vmatmul.mubr.msk.f32.gmra.mxu0 %vm10565_vm13, %v10564_v28  ;;  %v8686_v36 = vpop.f32.mrf.mxu1  ;;  %vm10588_vm13 = vmmov %vm10536_vm0 }
 0x1e3   : > { %6429 = vmatprep.mubr.msk.f32.mxu1 %vm10567_vm3, %v10566_v27  ;;  %6558 = vmatprep.mubr.msk.f32.mxu0 %vm10568_vm7, %v10505_v52  ;;  %v10578_v52 = vld [vmem:[#allocation16_spill] sm:$0xff]  ;;  %10581 = vst [vmem:[#allocation33_spill] sm:$0xff] %v8686_v36  ;;  %v8688_v28 = vpop.f32.mrf.mxu0  ;;  %vm10590_vm3 = vmmov %vm10536_vm0 }
 0x1e4   : > { %vm10591_vm7 = vmmov %vm10536_vm0  ;;  %v8704_v36 = vpop.f32.mrf.mxu1 }
 0x1e5   : > { %10592 = vst [vmem:[#allocation36_spill] sm:$0xff] %v8704_v36  ;;  %v8706_v11 = vpop.f32.mrf.mxu0  ;;  %v10610_v36 = vsel %vm10529_vm2, %v10539_v32, 0.0 }
 0x1e6   : > { %6430 = vmatmul.mubr.msk.f32.gmra.mxu1 %vm10575_vm11, %v10574_v3  ;;  %6559 = vmatmul.mubr.msk.f32.gmra.mxu0 %vm10577_vm14, %v10576_v56  ;;  %v10582_v3 = vld [vmem:[#allocation69_spill] sm:$0xff]  ;;  %v10587_v56 = vsel %vm10510_vm5, %v10521_v34, 0.0  ;;  %v8709_v6 = vpop.f32.mrf.mxu1  ;;  %vm10595_vm5 = vnez %v10594_v45  ;;  %v10596_v34 = vld [vmem:[#allocation78_spill] sm:$0xff]  ;;  %vm10598_vm11 = vmmov %vm10536_vm0  ;;  %v10653_v45 = vrot.slane %v8505_v25, 1 }
 0x1e7   : > { %6432 = vmatprep.mubr.msk.f32.mxu1 %vm10579_vm9, %v10578_v52  ;;  %6561 = vmatprep.mubr.msk.f32.mxu0 %vm10536_vm0, %v10515_v63  ;;  %vm10583_vm8 = vnez %v10582_v3  ;;  %v10589_v63 = vld [vmem:[#allocation20_spill] sm:$0xff]  ;;  %10593 = vst [vmem:[#allocation18_spill] sm:$0xff] %v8709_v6  ;;  %vm10600_vm14 = vmmov %vm10536_vm0  ;;  %v4393_v3 = vrot.slane %v8526_v46, 1 }
 0x1e8   : > { %v10585_v4 = vsel %vm10583_vm8, %v10584_v57, 0.0  ;;  %vm10602_vm9 = vmmov %vm10536_vm0  ;;  %v8728_v9 = vpop.f32.mrf.mxu1 }
 0x1e9   : > { %10603 = vst [vmem:[#allocation17_spill] sm:$0xff] %v8728_v9 }
 0x1ea   : > { %6433 = vmatmul.mubr.msk.f32.gmra.mxu1 %vm10586_vm4, %v10585_v4  ;;  %6562 = vmatmul.mubr.msk.f32.gmra.mxu0 %vm10588_vm13, %v10587_v56  ;;  %v8711_v4 = vpop.f32.mrf.mxu0  ;;  %v10597_v56 = vsel %vm10595_vm5, %v10596_v34, 0.0  ;;  %v8732_v17 = vpop.f32.mrf.mxu1  ;;  %vm10609_vm4 = vmmov %vm10536_vm0 }
 0x1eb   : > { %6435 = vmatprep.mubr.msk.f32.mxu1 %vm10590_vm3, %v10589_v63  ;;  %6564 = vmatprep.mubr.msk.f32.mxu0 %vm10591_vm7, %v10525_v24  ;;  %v10599_v24 = vsel %vm10520_vm12, %v10530_v16, 0.0  ;;  %10604 = vst [vmem:[#allocation40_spill] sm:$0xff] %v8732_v17  ;;  %vm10606_vm12 = vnez %v10605_v30  ;;  %v10607_v16 = vld [vmem:[#allocation79_spill] sm:$0xff]  ;;  %vm10611_vm13 = vmmov %vm10536_vm0  ;;  %vm10613_vm3 = vcmask 1046528   ;;  %v10614_v17 = vrot.slane %v8505_v25, 1 }
 0x1ec   : > { %v8730_v6 = vpop.f32.mrf.mxu0  ;;  %vm10615_vm7 = vmmov %vm10613_vm3  ;;  %v8760_v23 = vpop.f32.mrf.mxu1 }
 0x1ed   : > { %v8754_v40 = vsel %vm10615_vm7, %v3333_v18, %v10614_v17  ;;  %10618 = vst [vmem:[#allocation4_spill] sm:$0xff] %v8760_v23  ;;  %v10624_v17 = vsel %vm10538_vm15, %v10550_v19, 0.0  ;;  %vm10630_vm15 = vmmov %vm10536_vm0 }
 0x1ee   : > { %6436 = vmatmul.mubr.msk.f32.gmra.mxu1 %vm10598_vm11, %v10597_v56  ;;  %6565 = vmatmul.mubr.msk.f32.gmra.mxu0 %vm10600_vm14, %v10599_v24  ;;  %v8734_v56 = vpop.f32.mrf.mxu0  ;;  %v10608_v24 = vsel %vm10606_vm12, %v10607_v16, 0.0  ;;  %vm10616_vm11 = vmmov %vm10536_vm0 }
 0x1ef   : > { %6438 = vmatprep.mubr.msk.f32.mxu1 %vm10602_vm9, %v10601_v0  ;;  %6567 = vmatprep.mubr.msk.f32.mxu0 %vm10536_vm0, %v10534_v37  ;;  %v10612_v37 = vrot.slane %v7810_v22, 1  ;;  %vm10617_vm14 = vmmov %vm10536_vm0  ;;  %v10619_v22 = vld [vmem:[#allocation8_spill] sm:$0xff] }
 0x1f0   : > { %v8762_v32 = vpop.f32.mrf.mxu0  ;;  %vm10620_vm2 = vnez %v10619_v22  ;;  %vm10623_vm9 = vmmov %vm10536_vm0 }
 0x1f1   : > { %v8749_v9 = vsel %vm10613_vm3, %v10612_v37, %v3333_v18  ;;  %vm10628_vm3 = vmmov %vm10536_vm0 }
 0x1f2   : > { %6439 = vmatmul.mubr.msk.f32.gmra.mxu1 %vm10609_vm4, %v10608_v24  ;;  %6568 = vmatmul.mubr.msk.f32.gmra.mxu0 %vm10611_vm13, %v10610_v36  ;;  %v3370_v36 = vsel %vm10620_vm2, %v8754_v40, 0.0  ;;  %v8767_v24 = vpop.f32.mrf.mxu1  ;;  %v8769_v37 = vpop.f32.mrf.mxu0  ;;  %vm10625_vm4 = vmmov %vm10536_vm0 }
 0x1f3   : > { %6441 = vmatprep.mubr.msk.f32.mxu1 %vm10616_vm11, %v8749_v9  ;;  %6570 = vmatprep.mubr.msk.f32.mxu0 %vm10617_vm14, %v10544_v13  ;;  %10621 = vst [vmem:[#allocation23_spill] sm:$0xff] %v8767_v24  ;;  %10622 = vst [vmem:[#allocation22_spill] sm:$0xff] %v8769_v37  ;;  %v6655_v13 = vld [vmem:[#allocation2 + $0x30] sm:$0xff] }
 0x1f4   : > { %vm10626_vm13 = vmmov %vm10536_vm0  ;;  %v8780_v18 = vpop.f32.mrf.mxu1  ;;  %v8782_v23 = vpop.f32.mrf.mxu0 }
 0x1f5   : > { %10627 = vst [vmem:[#allocation44_spill] sm:$0xff] %v8780_v18  ;;  %vm10631_vm7 = vmmov %vm10536_vm0 }
 0x1f6   : > { %6442 = vmatmul.mubr.msk.f32.gmra.mxu1 %vm10623_vm9, %v3370_v36  ;;  %6571 = vmatmul.mubr.msk.f32.gmra.mxu0 %vm10536_vm0, %v10624_v17  ;;  %v6198_v24 = vpop.f32.mrf.mxu1  ;;  %v8784_v37 = vpop.f32.mrf.mxu0  ;;  %v6656_v36 = vld [vmem:[#allocation2 + $0x38] sm:$0xff]  ;;  %v6657_v17 = vld [vmem:[#allocation2 + $0x40] sm:$0xff]  ;;  %vm10632_vm11 = vmmov %vm10536_vm0 }
 0x1f7   : > { %6496 = vmatprep.mubr.msk.f32.mxu1 %vm10625_vm4, %v6655_v13  ;;  %6573 = vmatprep.mubr.msk.f32.mxu0 %vm10626_vm13, %v10555_v8  ;;  %v1931_v19 = vadd.f32 %v6198_v24, %v8442_v5  ;;  %v10634_v5 = vsel %vm10560_vm10, %v10573_v48, 0.0  ;;  %vm10635_vm14 = vmmov %vm10536_vm0  ;;  %v6659_v24 = vld [vmem:[#allocation2 + $0x50] sm:$0xff] }
 0x1f8   : > { %v1925_v8 = vpop.f32.mrf.mxu1  ;;  %v8796_v13 = vpop.f32.mrf.mxu0  ;;  %vm10636_vm9 = vmmov %vm10536_vm0 }
 0x1f9   : > { %v1926_v18 = vadd.f32 %v1925_v8, %v8458_v53  ;;  %vm10637_vm10 = vmmov %vm10536_vm0 }
 0x1fa   : > { %6497 = vmatmul.mubr.msk.f32.vlgmr.msra.gmra.mxu1 %vm10628_vm3, %v6656_v36  ;;  %6574 = vmatmul.mubr.msk.f32.gmra.mxu0 %vm10630_vm15, %v10629_v43  ;;  %v8800_v36 = vadd.f32 %v8578_v1, %v1931_v19  ;;  %v6201_v15 = vpop.f32.mrf.mxu1  ;;  %v6658_v43 = vld [vmem:[#allocation2 + $0x48] sm:$0xff]  ;;  %vm10639_vm4 = vmmov %vm10536_vm0 }
 0x1fb   : > { %6499 = vmatprep.mubr.msk.f32.mxu1 %vm10631_vm7, %v6657_v17  ;;  %6576 = vmatprep.mubr.msk.f32.mxu0 %vm10632_vm11, %v10566_v27  ;;  %v8802_v33 = vpop.f32.mrf.mxu0  ;;  %v1941_v27 = vadd.f32 %v6201_v15, %v8469_v12  ;;  %v8815_v53 = vadd.f32 %v8596_v42, %v1926_v18  ;;  %v6660_v12 = vld [vmem:[#allocation2 + $0x58] sm:$0xff]  ;;  %v6661_v18 = vld [vmem:[#allocation2 + $0x60] sm:$0xff]  ;;  %vm10640_vm13 = vmmov %vm10536_vm0 }
 0x1fc   : > { %v1935_v1 = vpop.f32.mrf.mxu1  ;;  %vm10641_vm3 = vmmov %vm10536_vm0 }
 0x1fd   : > { %v8817_v19 = vpop.f32.mrf.mxu0  ;;  %v1936_v35 = vadd.f32 %v1935_v1, %v8485_v61  ;;  %v8821_v48 = vadd.f32 %v8600_v14, %v1941_v27  ;;  %vm10644_vm15 = vmmov %vm10536_vm0 }
 0x1fe   : > { %6500 = vmatmul.mubr.msk.f32.gmra.mxu1 %vm10633_vm1, %v6658_v43  ;;  %6577 = vmatmul.mubr.msk.f32.gmra.mxu0 %vm10635_vm14, %v10634_v5  ;;  %v787_v43 = vld [vmem:[#allocation2 + $0x130] sm:$0xff]  ;;  %vm10645_vm7 = vmmov %vm10536_vm0 }
 0x1ff   : > { %6502 = vmatprep.mubr.msk.f32.mxu1 %vm10636_vm9, %v6659_v24  ;;  %6579 = vmatprep.mubr.msk.f32.mxu0 %vm10536_vm0, %v10578_v52  ;;  %v10638_v52 = vsel %vm10572_vm6, %v10584_v57, 0.0  ;;  %v8836_v61 = vadd.f32 %v8618_v39, %v1936_v35  ;;  %vm10642_vm6 = vmmov %vm10536_vm0  ;;  %v10643_v39 = vsel %vm10583_vm8, %v10596_v34, 0.0  ;;  %vm10647_vm8 = vcmask 1043456  }
 0x200   : > { %v6204_v17 = vpop.f32.mrf.mxu1  ;;  %vm10646_vm11 = vmmov %vm10536_vm0 }
 0x201   : > { %v8823_v8 = vpop.f32.mrf.mxu0  ;;  %v1951_v42 = vadd.f32 %v6204_v17, %v8487_v29  ;;  %v4860_v29 = vld [vmem:[%s9705_s5] sm:$0xf]  ;;  %v4395_v17 = vrot.slane %v787_v43, 1  ;;  %vm10648_vm1 = vmmov %vm10647_vm8  ;;  %v4428_v43 = vsel %vm10606_vm12, %v8754_v40, 0.0 }
 0x202   : > { %6503 = vmatmul.mubr.msk.f32.gmra.mxu1 %vm10637_vm10, %v6660_v12  ;;  %6580 = vmatmul.mubr.msk.f32.gmra.mxu0 %vm10639_vm4, %v10638_v52  ;;  %v1945_v14 = vpop.f32.mrf.mxu1  ;;  %vm10649_vm14 = vmmov %vm10536_vm0  ;;  %v10650_v52 = vsel %vm10595_vm5, %v10607_v16, 0.0  ;;  %vm10654_vm4 = vcmask 1046528  }
 0x203   : > { %6505 = vmatprep.mubr.msk.f32.mxu1 %vm10640_vm13, %v6661_v18  ;;  %6582 = vmatprep.mubr.msk.f32.mxu0 %vm10641_vm3, %v10589_v63  ;;  %v8838_v15 = vpop.f32.mrf.mxu0  ;;  %v1946_v50 = vadd.f32 %v1945_v14, %v8503_v10  ;;  %v8842_v57 = vadd.f32 %v8622_v21, %v1951_v42  ;;  %v6662_v63 = vld [vmem:[#allocation2 + $0x68] sm:$0xff]  ;;  %v6663_v21 = vld [vmem:[#allocation2 + $0x70] sm:$0xff]  ;;  %vm10651_vm9 = vmmov %vm10536_vm0  ;;  %v4394_v16 = vsel %vm10654_vm4, %v10653_v45, %v4393_v3 }
 0x204   : > { %v6207_v5 = vpop.f32.mrf.mxu1  ;;  %6594 = vmatprep.subr.msk.mxu1 %vm10647_vm8, %v4860_v29  ;;  %vm10652_vm10 = vmmov %vm10536_vm0 }
 0x205   : > { %v8847_v27 = vpop.f32.mrf.mxu0  ;;  %v1961_v10 = vadd.f32 %v6207_v5, %v8507_v54  ;;  %v8860_v24 = vadd.f32 %v8640_v26, %v1946_v50  ;;  %6595 = vmatpush3.msk.msra.mxu1 %vm10648_vm1, %v4860_v29  ;;  %v6664_v26 = vld [vmem:[#allocation2 + $0x78] sm:$0xff]  ;;  %vm10655_vm5 = vmmov %vm10654_vm4  ;;  %v6666_v5 = vld [vmem:[#allocation2 + $0x88] sm:$0xff] }
 0x206   : > { %6506 = vmatmul.mubr.msk.f32.gmra.mxu1 %vm10642_vm6, %v6662_v63  ;;  %6583 = vmatmul.mubr.msk.f32.gmra.mxu0 %vm10644_vm15, %v10643_v39  ;;  %v1955_v1 = vpop.f32.mrf.mxu1  ;;  %v4396_v50 = vsel %vm10655_vm5, %v4393_v3, %v4395_v17  ;;  %vm10656_vm13 = vmmov %vm10536_vm0  ;;  %v6667_v39 = vld [vmem:[#allocation2 + $0x90] sm:$0xff]  ;;  %v6668_v3 = vld [vmem:[#allocation2 + $0x98] sm:$0xff] }
 0x207   : > { %6508 = vmatprep.mubr.msk.f32.mxu1 %vm10645_vm7, %v6663_v21  ;;  %6585 = vmatprep.mubr.msk.f32.mxu0 %vm10646_vm11, %v10601_v0  ;;  %v8862_v35 = vpop.f32.mrf.mxu0  ;;  %v1956_v34 = vadd.f32 %v1955_v1, %v8524_v7  ;;  %v8868_v54 = vadd.f32 %v8644_v38, %v1961_v10  ;;  %v6665_v7 = vld [vmem:[#allocation2 + $0x80] sm:$0xff]  ;;  %vm10657_vm3 = vmmov %vm10536_vm0 }
 0x208   : > { %v6210_v12 = vpop.f32.mrf.mxu1  ;;  %vm10658_vm6 = vmmov %vm10536_vm0 }
 0x209   : > { %v8871_v0 = vpop.f32.mrf.mxu0  ;;  %v1971_v42 = vadd.f32 %v6210_v12, %v8528_v20  ;;  %v8884_v38 = vadd.f32 %v8662_v59, %v1956_v34  ;;  %vm10659_vm15 = vmmov %vm10536_vm0 }
 0x20a   : > { %6509 = vmatmul.mubr.msk.f32.gmra.mxu1 %vm10649_vm14, %v6664_v26  ;;  %6586 = vmatmul.mubr.msk.f32.gmra.mxu0 %vm10651_vm9, %v10650_v52  ;;  %v1965_v18 = vpop.f32.mrf.mxu1  ;;  %vm10660_vm12 = vmmov %vm10536_vm0 }
 0x20b   : > { %6511 = vmatprep.mubr.msk.f32.mxu1 %vm10536_vm0, %v6665_v7  ;;  %6588 = vmatprep.mubr.msk.f32.mxu0 %vm10652_vm10, %v8749_v9  ;;  %v8886_v14 = vpop.f32.mrf.mxu0  ;;  %v1966_v20 = vadd.f32 %v1965_v18, %v8544_v58  ;;  %v8897_v9 = vadd.f32 %v8666_v55, %v1971_v42  ;;  %v4430_v58 = vsel %vm10620_vm2, %v4396_v50, 0.0  ;;  %vm10661_vm7 = vmmov %vm10536_vm0  ;;  %v6670_v42 = vld [vmem:[#allocation2 + $0xa8] sm:$0xff]  ;;  %v6671_v7 = vld [vmem:[#allocation2 + $0xb0] sm:$0xff] }
 0x20c   : > { %vm10662_vm2 = vmmov %vm10536_vm0 }
 0x20d   : > { %v6213_v59 = vpop.f32.mrf.mxu1  ;;  %v8899_v29 = vpop.f32.mrf.mxu0  ;;  %v8909_v40 = vadd.f32 %v8684_v62, %v1966_v20  ;;  %v6669_v62 = vld [vmem:[#allocation2 + $0xa0] sm:$0xff]  ;;  %vm10663_vm11 = vmmov %vm10536_vm0  ;;  %v6672_v20 = vld [vmem:[#allocation2 + $0xb8] sm:$0xff] }
 0x20e   : > { %6512 = vmatmul.mubr.msk.f32.gmra.mxu1 %vm10656_vm13, %v6666_v5  ;;  %6589 = vmatmul.mubr.msk.f32.gmra.mxu0 %vm10657_vm3, %v4428_v43  ;;  %v1981_v63 = vadd.f32 %v6213_v59, %v8546_v49  ;;  %vm10664_vm8 = vmmov %vm10536_vm0  ;;  %v6673_v43 = vld [vmem:[#allocation2 + $0xc0] sm:$0xff] }
 0x20f   : > { %6514 = vmatprep.mubr.msk.f32.mxu1 %vm10658_vm6, %v6667_v39  ;;  %6591 = vmatprep.mubr.msk.f32.mxu0 %vm10659_vm15, %v4394_v16  ;;  %v1975_v55 = vpop.f32.mrf.mxu1  ;;  %v8911_v30 = vpop.f32.mrf.mxu0  ;;  %vm10665_vm1 = vmmov %vm10536_vm0 }
 0x210   : > { %v1976_v10 = vadd.f32 %v1975_v55, %v8560_v44  ;;  %v8915_v21 = vadd.f32 %v8688_v28, %v1981_v63  ;;  %vm10666_vm14 = vmmov %vm10536_vm0  ;;  %v6674_v55 = vld [vmem:[#allocation2 + $0xc8] sm:$0xff] }
 0x211   : > { %v6216_v49 = vpop.f32.mrf.mxu1  ;;  %vm10668_vm9 = vmmov %vm10536_vm0 }
 0x212   : > { %v8917_v1 = vpop.f32.mrf.mxu0  ;;  %6515 = vmatmul.mubr.msk.f32.gmra.mxu1 %vm10660_vm12, %v6668_v3  ;;  %6592 = vmatmul.mubr.msk.f32.gmra.mxu0 %vm10661_vm7, %v4430_v58  ;;  %v1991_v22 = vadd.f32 %v6216_v49, %v8562_v60  ;;  %v8924_v17 = vadd.f32 %v8706_v11, %v1976_v10  ;;  %v6675_v49 = vld [vmem:[#allocation2 + $0xd0] sm:$0xff]  ;;  %vm10671_vm10 = vmmov %vm10536_vm0 }
 0x213   : > { %6517 = vmatprep.mubr.msk.f32.mxu1 %vm10662_vm2, %v6669_v62  ;;  %v1985_v44 = vpop.f32.mrf.mxu1  ;;  %vm10673_vm4 = vmmov %vm10536_vm0 }
 0x214   : > { %v8926_v34 = vpop.f32.mrf.mxu0  ;;  %v1986_v28 = vadd.f32 %v1985_v44, %v8574_v2  ;;  %v8930_v12 = vadd.f32 %v8711_v4, %v1991_v22  ;;  %vm10675_vm5 = vmmov %vm10536_vm0 }
 0x215   : > { %v6219_v26 = vpop.f32.mrf.mxu1  ;;  %vm10677_vm13 = vmmov %vm10536_vm0 }
 0x216   : > { %v8932_v52 = vpop.f32.mrf.mxu0  ;;  %6518 = vmatmul.mubr.msk.f32.gmra.mxu1 %vm10663_vm11, %v6670_v42  ;;  %v2001_v60 = vadd.f32 %v6219_v26, %v8576_v47  ;;  %v8938_v11 = vadd.f32 %v8730_v6, %v1986_v28  ;;  %v6676_v42 = vld [vmem:[#allocation2 + $0xd8] sm:$0xff]  ;;  %vm10679_vm3 = vmmov %vm10536_vm0 }
 0x217   : > { %6520 = vmatprep.mubr.msk.f32.mxu1 %vm10664_vm8, %v6671_v7  ;;  %v1995_v18 = vpop.f32.mrf.mxu1  ;;  %vm10681_vm6 = vmmov %vm10536_vm0 }
 0x218   : > { %v8940_v45 = vpop.f32.mrf.mxu0  ;;  %v1996_v2 = vadd.f32 %v1995_v18, %v8594_v51  ;;  %v8944_v4 = vadd.f32 %v8734_v56, %v2001_v60  ;;  %v10667_v56 = vld [vmem:[#allocation22_spill] sm:$0xff]  ;;  %v10672_v60 = vld [vmem:[#allocation28_spill] sm:$0xff]  ;;  %v6677_v18 = vld [vmem:[#allocation2 + $0xe0] sm:$0xff] }
 0x219   : > { %vm10683_vm15 = vmmov %vm10536_vm0 }
 0x21a   : > { %v6222_v16 = vpop.f32.mrf.mxu1  ;;  %v8946_v50 = vpop.f32.mrf.mxu0  ;;  %6521 = vmatmul.mubr.msk.f32.gmra.mxu1 %vm10665_vm1, %v6672_v20  ;;  %v8952_v6 = vadd.f32 %v8762_v32, %v1996_v2  ;;  %v10674_v20 = vld [vmem:[#allocation31_spill] sm:$0xff]  ;;  %vm10685_vm12 = vmmov %vm10536_vm0 }
 0x21b   : > { %v2011_v47 = vadd.f32 %v6222_v16, %v8598_v41  ;;  %6523 = vmatprep.mubr.msk.f32.mxu1 %vm10666_vm14, %v6673_v43  ;;  %v10669_v41 = vld [vmem:[#allocation12_spill] sm:$0xff]  ;;  %vm10688_vm7 = vmmov %vm10536_vm0 }
 0x21c   : > { %v2005_v59 = vpop.f32.mrf.mxu1  ;;  %v8954_v5 = vpop.f32.mrf.mxu0  ;;  %vm10690_vm2 = vmmov %vm10536_vm0 }
 0x21d   : > { %v2006_v51 = vadd.f32 %v2005_v59, %v8616_v31  ;;  %v8958_v63 = vadd.f32 %v10667_v56, %v2011_v47  ;;  %v10670_v31 = vld [vmem:[#allocation11_spill] sm:$0xff]  ;;  %v10676_v56 = vld [vmem:[#allocation14_spill] sm:$0xff]  ;;  %vm10692_vm11 = vmmov %vm10536_vm0 }
 0x21e   : > { %v6225_v39 = vpop.f32.mrf.mxu1  ;;  %v8960_v58 = vpop.f32.mrf.mxu0  ;;  %6524 = vmatmul.mubr.msk.f32.gmra.mxu1 %vm10668_vm9, %v6674_v55  ;;  %v6679_v55 = vld [vmem:[#allocation2 + $0xf0] sm:$0xff]  ;;  %vm10751_vm8 = vmmov %vm10536_vm0 }
 0x21f   : > { %v2021_v10 = vadd.f32 %v6225_v39, %v10669_v41  ;;  %6526 = vmatprep.mubr.msk.f32.mxu1 %vm10536_vm0, %v6675_v49  ;;  %v8966_v32 = vadd.f32 %v8782_v23, %v2006_v51  ;;  %v6678_v51 = vld [vmem:[#allocation2 + $0xe8] sm:$0xff]  ;;  %v10678_v49 = vld [vmem:[#allocation13_spill] sm:$0xff]  ;;  %vm10752_vm1 = vmmov %vm10536_vm0 }
 0x220   : > { %v2015_v3 = vpop.f32.mrf.mxu1  ;;  %v8968_v22 = vpop.f32.mrf.mxu0  ;;  %vm10753_vm14 = vmmov %vm10536_vm0 }
 0x221   : > { %v2016_v62 = vadd.f32 %v2015_v3, %v10670_v31  ;;  %v8972_v44 = vadd.f32 %v8784_v37, %v2021_v10  ;;  %vm10754_vm9 = vmmov %vm10536_vm0 }
 0x222   : > { %v6228_v28 = vpop.f32.mrf.mxu1  ;;  %v8974_v26 = vpop.f32.mrf.mxu0  ;;  %6527 = vmatmul.mubr.msk.f32.gmra.mxu1 %vm10671_vm10, %v6676_v42  ;;  %v10680_v42 = vld [vmem:[#allocation33_spill] sm:$0xff]  ;;  %vm10755_vm10 = vmmov %vm10536_vm0 }
 0x223   : > { %v2031_v7 = vadd.f32 %v6228_v28, %v10672_v60  ;;  %6529 = vmatprep.mubr.msk.f32.mxu1 %vm10673_vm4, %v6677_v18  ;;  %v8980_v23 = vadd.f32 %v8796_v13, %v2016_v62  ;;  %v6680_v28 = vld [vmem:[#allocation2 + $0xf8] sm:$0xff]  ;;  %vm10757_vm4 = vmmov %vm10536_vm0 }
 0x224   : > { %v2025_v2 = vpop.f32.mrf.mxu1  ;;  %v8982_v16 = vpop.f32.mrf.mxu0 }
 0x225   : > { %v2026_v37 = vadd.f32 %v2025_v2, %v10674_v20  ;;  %v8986_v47 = vadd.f32 %v8802_v33, %v2031_v7  ;;  %v6681_v7 = vld [vmem:[#allocation2 + $0x100] sm:$0xff]  ;;  %v10682_v20 = vld [vmem:[#allocation36_spill] sm:$0xff] }
 0x226   : > { %v6231_v43 = vpop.f32.mrf.mxu1  ;;  %v8988_v59 = vpop.f32.mrf.mxu0  ;;  %6530 = vmatmul.mubr.msk.f32.gmra.mxu1 %vm10675_vm5, %v6678_v51  ;;  %vm10758_vm5 = vmmov %vm10536_vm0 }
 0x227   : > { %v2041_v39 = vadd.f32 %v6231_v43, %v10676_v56  ;;  %6532 = vmatprep.mubr.msk.f32.mxu1 %vm10677_vm13, %v6679_v55  ;;  %v8994_v13 = vadd.f32 %v8817_v19, %v2026_v37  ;;  %v6682_v56 = vld [vmem:[#allocation2 + $0x108] sm:$0xff]  ;;  %vm10766_vm13 = vmmov %vm10536_vm0 }
 0x228   : > { %v2035_v41 = vpop.f32.mrf.mxu1  ;;  %v8996_v10 = vpop.f32.mrf.mxu0 }
 0x229   : > { %v2036_v33 = vadd.f32 %v2035_v41, %v10678_v49  ;;  %v9000_v3 = vadd.f32 %v8823_v8, %v2041_v39  ;;  %v10684_v39 = vld [vmem:[#allocation18_spill] sm:$0xff]  ;;  %v6683_v41 = vld [vmem:[#allocation2 + $0x110] sm:$0xff] }
 0x22a   : > { %v6234_v31 = vpop.f32.mrf.mxu1  ;;  %v9002_v62 = vpop.f32.mrf.mxu0  ;;  %6533 = vmatmul.mubr.msk.f32.gmra.mxu1 %vm10679_vm3, %v6680_v28  ;;  %vm10770_vm3 = vmmov %vm10536_vm0 }
 0x22b   : > { %v2051_v60 = vadd.f32 %v6234_v31, %v10680_v42  ;;  %6535 = vmatprep.mubr.msk.f32.mxu1 %vm10681_vm6, %v6681_v7  ;;  %v9008_v19 = vadd.f32 %v8838_v15, %v2036_v33  ;;  %v10686_v31 = vld [vmem:[#allocation17_spill] sm:$0xff]  ;;  %v10687_v7 = vld [vmem:[#allocation3_spill] sm:$0xff]  ;;  %vm10776_vm6 = vmmov %vm10536_vm0 }
 0x22c   : > { %v2045_v18 = vpop.f32.mrf.mxu1  ;;  %v9010_v2 = vpop.f32.mrf.mxu0 }
 0x22d   : > { %v2046_v8 = vadd.f32 %v2045_v18, %v10682_v20  ;;  %v9014_v37 = vadd.f32 %v8847_v27, %v2051_v60  ;;  %v10689_v18 = vld [vmem:[#allocation40_spill] sm:$0xff] }
 0x22e   : > { %v6237_v43 = vpop.f32.mrf.mxu1  ;;  %v9016_v51 = vpop.f32.mrf.mxu0  ;;  %6536 = vmatmul.mubr.msk.f32.gmra.mxu1 %vm10683_vm15, %v6682_v56  ;;  %v10691_v56 = vld [vmem:[#allocation4_spill] sm:$0xff]  ;;  %vm10777_vm15 = vmmov %vm10536_vm0 }
 0x22f   : > { %v2061_v55 = vadd.f32 %v6237_v43, %v10684_v39  ;;  %6538 = vmatprep.mubr.msk.f32.mxu1 %vm10685_vm12, %v6683_v41  ;;  %v9022_v15 = vadd.f32 %v8862_v35, %v2046_v8  ;;  %vm10783_vm12 = vmmov %vm10536_vm0 }
 0x230   : > { %v2055_v49 = vpop.f32.mrf.mxu1  ;;  %v9024_v33 = vpop.f32.mrf.mxu0 }
 0x231   : > { %v2056_v27 = vadd.f32 %v2055_v49, %v10686_v31  ;;  %v9028_v28 = vadd.f32 %v8871_v0, %v2061_v55  ;;  %v10693_v49 = vld [vmem:[#allocation23_spill] sm:$0xff] }
 0x232   : > { %v6240_v42 = vpop.f32.mrf.mxu1  ;;  %v9030_v60 = vpop.f32.mrf.mxu0  ;;  %6539 = vmatmul.mubr.msk.f32.gmra.mxu1 %vm10688_vm7, %v10687_v7  ;;  %vm10787_vm7 = vmmov %vm10536_vm0 }
 0x233   : > { %v2071_v20 = vadd.f32 %v6240_v42, %v10689_v18  ;;  %6541 = vmatprep.mubr.msk.f32.mxu1 %vm10690_vm2, %v8505_v25  ;;  %v9038_v35 = vadd.f32 %v8886_v14, %v2056_v27  ;;  %v10694_v42 = vld [vmem:[#allocation44_spill] sm:$0xff]  ;;  %vm10792_vm2 = vmmov %vm10536_vm0 }
 0x234   : > { %v2065_v8 = vpop.f32.mrf.mxu1  ;;  %v9040_v43 = vpop.f32.mrf.mxu0 }
 0x235   : > { %v2066_v0 = vadd.f32 %v2065_v8, %v10691_v56  ;;  %v9044_v39 = vadd.f32 %v8899_v29, %v2071_v20 }
 0x236   : > { %v6243_v55 = vpop.f32.mrf.mxu1  ;;  %v9046_v41 = vpop.f32.mrf.mxu0  ;;  %6542 = vmatmul.mubr.msk.f32.gmra.mxu1 %vm10692_vm11, %v8526_v46  ;;  %vm10793_vm11 = vmmov %vm10536_vm0 }
 0x237   : > { %v2081_v31 = vadd.f32 %v6243_v55, %v10693_v49  ;;  %v9052_v25 = vadd.f32 %v8911_v30, %v2066_v0 }
 0x238   : > { %v2075_v14 = vpop.f32.mrf.mxu1  ;;  %v9054_v27 = vpop.f32.mrf.mxu0 }
 0x239   : > { %v2076_v7 = vadd.f32 %v2075_v14, %v10694_v42  ;;  %v9058_v18 = vadd.f32 %v8917_v1, %v2081_v31 }
 0x23a   : > { %v6298_v29 = vpop.f32.mrf.mxu1  ;;  %v9060_v20 = vpop.f32.mrf.mxu0 }
 0x23b   : > { %v3035_v8 = vadd.f32 %v6298_v29, %v8800_v36  ;;  %v9064_v46 = vadd.f32 %v8926_v34, %v2076_v7 }
 0x23c   : > { %v2875_v56 = vpop.f32.mrf.mxu1  ;;  %v9066_v55 = vpop.f32.mrf.mxu0 }
 0x23d   : > { %v3034_v30 = vadd.f32 %v2875_v56, %v8815_v53  ;;  %v9070_v0 = vadd.f32 %v8932_v52, %v3035_v8 }
 0x23e   : > { %v6301_v49 = vpop.f32.mrf.mxu1  ;;  %v9072_v14 = vpop.f32.mrf.mxu0 }
 0x23f   : > { %v3037_v1 = vadd.f32 %v6301_v49, %v8821_v48  ;;  %v9076_v31 = vadd.f32 %v8940_v45, %v3034_v30 }
 0x240   : > { %v2885_v36 = vpop.f32.mrf.mxu1  ;;  %v9078_v42 = vpop.f32.mrf.mxu0 }
 0x241   : > { %v3036_v34 = vadd.f32 %v2885_v36, %v8836_v61  ;;  %v9082_v7 = vadd.f32 %v8946_v50, %v3037_v1 }
 0x242   : > { %v6304_v53 = vpop.f32.mrf.mxu1  ;;  %v9084_v29 = vpop.f32.mrf.mxu0 }
 0x243   : > { %v3039_v52 = vadd.f32 %v6304_v53, %v8842_v57  ;;  %v9088_v8 = vadd.f32 %v8954_v5, %v3036_v34 }
 0x244   : > { %v2895_v48 = vpop.f32.mrf.mxu1  ;;  %v9090_v56 = vpop.f32.mrf.mxu0 }
 0x245   : > { %v3038_v45 = vadd.f32 %v2895_v48, %v8860_v24  ;;  %v9094_v30 = vadd.f32 %v8960_v58, %v3039_v52 }
 0x246   : > { %v6307_v61 = vpop.f32.mrf.mxu1  ;;  %v9096_v49 = vpop.f32.mrf.mxu0 }
 0x247   : > { %v3041_v50 = vadd.f32 %v6307_v61, %v8868_v54  ;;  %v9100_v1 = vadd.f32 %v8968_v22, %v3038_v45 }
 0x248   : > { %v2905_v57 = vpop.f32.mrf.mxu1  ;;  %v9102_v36 = vpop.f32.mrf.mxu0 }
 0x249   : > { %v3040_v5 = vadd.f32 %v2905_v57, %v8884_v38  ;;  %v9106_v34 = vadd.f32 %v8974_v26, %v3041_v50 }
 0x24a   : > { %v6310_v24 = vpop.f32.mrf.mxu1  ;;  %v9108_v53 = vpop.f32.mrf.mxu0 }
 0x24b   : > { %v3043_v58 = vadd.f32 %v6310_v24, %v8897_v9  ;;  %v9112_v52 = vadd.f32 %v8982_v16, %v3040_v5 }
 0x24c   : > { %v2915_v54 = vpop.f32.mrf.mxu1  ;;  %v9114_v48 = vpop.f32.mrf.mxu0 }
 0x24d   : > { %v3042_v22 = vadd.f32 %v2915_v54, %v8909_v40  ;;  %v9118_v45 = vadd.f32 %v8988_v59, %v3043_v58 }
 0x24e   : > { %v6313_v38 = vpop.f32.mrf.mxu1  ;;  %v9120_v61 = vpop.f32.mrf.mxu0 }
 0x24f   : > { %v3045_v26 = vadd.f32 %v6313_v38, %v8915_v21  ;;  %v9124_v50 = vadd.f32 %v8996_v10, %v3042_v22 }
 0x250   : > { %v2925_v9 = vpop.f32.mrf.mxu1  ;;  %v9126_v57 = vpop.f32.mrf.mxu0 }
 0x251   : > { %v3044_v16 = vadd.f32 %v2925_v9, %v8924_v17  ;;  %v9130_v5 = vadd.f32 %v9002_v62, %v3045_v26 }
 0x252   : > { %v6316_v40 = vpop.f32.mrf.mxu1  ;;  %v9132_v24 = vpop.f32.mrf.mxu0 }
 0x253   : > { %v3047_v59 = vadd.f32 %v6316_v40, %v8930_v12  ;;  %v9136_v58 = vadd.f32 %v9010_v2, %v3044_v16 }
 0x254   : > { %v2935_v21 = vpop.f32.mrf.mxu1  ;;  %v9138_v54 = vpop.f32.mrf.mxu0 }
 0x255   : > { %v3046_v10 = vadd.f32 %v2935_v21, %v8938_v11  ;;  %v9142_v22 = vadd.f32 %v9016_v51, %v3047_v59 }
 0x256   : > { %v6319_v17 = vpop.f32.mrf.mxu1  ;;  %v9144_v38 = vpop.f32.mrf.mxu0 }
 0x257   : > { %v3049_v62 = vadd.f32 %v6319_v17, %v8944_v4  ;;  %v9148_v26 = vadd.f32 %v9024_v33, %v3046_v10 }
 0x258   : > { %v2945_v12 = vpop.f32.mrf.mxu1  ;;  %v9150_v9 = vpop.f32.mrf.mxu0 }
 0x259   : > { %v3048_v2 = vadd.f32 %v2945_v12, %v8952_v6  ;;  %v9154_v16 = vadd.f32 %v9030_v60, %v3049_v62 }
 0x25a   : > { %v6322_v11 = vpop.f32.mrf.mxu1  ;;  %v9156_v40 = vpop.f32.mrf.mxu0 }
 0x25b   : > { %v3051_v51 = vadd.f32 %v6322_v11, %v8958_v63  ;;  %v9160_v59 = vadd.f32 %v9040_v43, %v3048_v2 }
 0x25c   : > { %v2955_v4 = vpop.f32.mrf.mxu1  ;;  %v9162_v21 = vpop.f32.mrf.mxu0 }
 0x25d   : > { %10695 = vst [vmem:[#allocation27_spill] sm:$0xff] %v9160_v59  ;;  %v3050_v33 = vadd.f32 %v2955_v4, %v8966_v32  ;;  %v9166_v10 = vadd.f32 %v9046_v41, %v3051_v51 }
 0x25e   : > { %v6325_v6 = vpop.f32.mrf.mxu1  ;;  %v9168_v17 = vpop.f32.mrf.mxu0 }
 0x25f   : > { %10696 = vst [vmem:[#allocation29_spill] sm:$0xff] %v9166_v10  ;;  %v3053_v60 = vadd.f32 %v6325_v6, %v8972_v44  ;;  %v9172_v62 = vadd.f32 %v9054_v27, %v3050_v33 }
 0x260   : > { %v2965_v63 = vpop.f32.mrf.mxu1  ;;  %v9174_v12 = vpop.f32.mrf.mxu0 }
 0x261   : > { %10697 = vst [vmem:[#allocation34_spill] sm:$0xff] %v9172_v62  ;;  %v3052_v43 = vadd.f32 %v2965_v63, %v8980_v23  ;;  %v9178_v2 = vadd.f32 %v9060_v20, %v3053_v60 }
 0x262   : > { %v6328_v32 = vpop.f32.mrf.mxu1  ;;  %v9180_v11 = vpop.f32.mrf.mxu0 }
 0x263   : > { %10698 = vst [vmem:[#allocation59_spill] sm:$0xff] %v9178_v2  ;;  %v3055_v41 = vadd.f32 %v6328_v32, %v8986_v47  ;;  %v9184_v51 = vadd.f32 %v9066_v55, %v3052_v43 }
 0x264   : > { %v2975_v44 = vpop.f32.mrf.mxu1  ;;  %v9186_v4 = vpop.f32.mrf.mxu0 }
 0x265   : > { %10699 = vst [vmem:[#allocation47_spill] sm:$0xff] %v9184_v51  ;;  %v3054_v27 = vadd.f32 %v2975_v44, %v8994_v13  ;;  %v9190_v33 = vadd.f32 %v9072_v14, %v3055_v41 }
 0x266   : > { %v6331_v23 = vpop.f32.mrf.mxu1  ;;  %v9192_v6 = vpop.f32.mrf.mxu0 }
 0x267   : > { %10700 = vst [vmem:[#allocation45_spill] sm:$0xff] %v9190_v33  ;;  %v3057_v20 = vadd.f32 %v6331_v23, %v9000_v3  ;;  %v9196_v60 = vadd.f32 %v9078_v42, %v3054_v27 }
 0x268   : > { %v2985_v47 = vpop.f32.mrf.mxu1  ;;  %v9198_v63 = vpop.f32.mrf.mxu0 }
 0x269   : > { %10701 = vst [vmem:[#allocation60_spill] sm:$0xff] %v9196_v60  ;;  %v3056_v55 = vadd.f32 %v2985_v47, %v9008_v19  ;;  %v9202_v43 = vadd.f32 %v9084_v29, %v3057_v20 }
 0x26a   : > { %v6334_v13 = vpop.f32.mrf.mxu1  ;;  %v9204_v32 = vpop.f32.mrf.mxu0 }
 0x26b   : > { %10702 = vst [vmem:[#allocation63_spill] sm:$0xff] %v9202_v43  ;;  %v3059_v14 = vadd.f32 %v6334_v13, %v9014_v37  ;;  %v9208_v41 = vadd.f32 %v9090_v56, %v3056_v55 }
 0x26c   : > { %v2995_v3 = vpop.f32.mrf.mxu1  ;;  %v9210_v44 = vpop.f32.mrf.mxu0 }
 0x26d   : > { %10703 = vst [vmem:[#allocation57_spill] sm:$0xff] %v9208_v41  ;;  %v3058_v42 = vadd.f32 %v2995_v3, %v9022_v15  ;;  %v9214_v27 = vadd.f32 %v9096_v49, %v3059_v14 }
 0x26e   : > { %v6337_v19 = vpop.f32.mrf.mxu1  ;;  %v9216_v23 = vpop.f32.mrf.mxu0 }
 0x26f   : > { %10704 = vst [vmem:[#allocation66_spill] sm:$0xff] %v9214_v27  ;;  %v3061_v29 = vadd.f32 %v6337_v19, %v9028_v28  ;;  %v9220_v20 = vadd.f32 %v9102_v36, %v3058_v42 }
 0x270   : > { %v3005_v37 = vpop.f32.mrf.mxu1  ;;  %v9222_v47 = vpop.f32.mrf.mxu0 }
 0x271   : > { %10705 = vst [vmem:[#allocation39_spill] sm:$0xff] %v9220_v20  ;;  %10706 = vst [vmem:[#allocation21_spill] sm:$0xff] %v9222_v47  ;;  %v3060_v56 = vadd.f32 %v3005_v37, %v9038_v35  ;;  %v9226_v55 = vadd.f32 %v9108_v53, %v3061_v29 }
 0x272   : > { %v6340_v15 = vpop.f32.mrf.mxu1  ;;  %v9228_v13 = vpop.f32.mrf.mxu0 }
 0x273   : > { %10707 = vst [vmem:[#allocation53_spill] sm:$0xff] %v9226_v55  ;;  %10708 = vst [vmem:[#allocation25_spill] sm:$0xff] %v9228_v13  ;;  %v3063_v49 = vadd.f32 %v6340_v15, %v9044_v39  ;;  %v9232_v14 = vadd.f32 %v9114_v48, %v3060_v56 }
 0x274   : > { %v3015_v28 = vpop.f32.mrf.mxu1  ;;  %v9234_v3 = vpop.f32.mrf.mxu0 }
 0x275   : > { %10709 = vst [vmem:[#allocation54_spill] sm:$0xff] %v9232_v14  ;;  %10710 = vst [vmem:[#allocation26_spill] sm:$0xff] %v9234_v3  ;;  %v3062_v36 = vadd.f32 %v3015_v28, %v9052_v25  ;;  %v9238_v42 = vadd.f32 %v9120_v61, %v3063_v49 }
 0x276   : > { %v6343_v35 = vpop.f32.mrf.mxu1  ;;  %v9240_v19 = vpop.f32.mrf.mxu0 }
 0x277   : > { %10711 = vst [vmem:[#allocation5_spill] sm:$0xff] %v9238_v42  ;;  %10712 = vst [vmem:[#allocation7_spill] sm:$0xff] %v9240_v19  ;;  %v3065_v53 = vadd.f32 %v6343_v35, %v9058_v18  ;;  %v9244_v29 = vadd.f32 %v9126_v57, %v3062_v36 }
 0x278   : > { %v3025_v39 = vpop.f32.mrf.mxu1  ;;  %v9246_v37 = vpop.f32.mrf.mxu0 }
 0x279   : > { %10713 = vst [vmem:[#allocation32_spill] sm:$0xff] %v9244_v29  ;;  %10714 = vst [vmem:[#allocation15_spill] sm:$0xff] %v9246_v37  ;;  %v3064_v48 = vadd.f32 %v3025_v39, %v9064_v46  ;;  %v9250_v56 = vadd.f32 %v9132_v24, %v3065_v53 }
 0x27a   : > { %v6398_v25 = vpop.f32.mrf.mxu1  ;;  %v9252_v15 = vpop.f32.mrf.mxu0 }
 0x27b   : > { %10715 = vst [vmem:[#allocation10_spill] sm:$0xff] %v9250_v56  ;;  %10716 = vst [vmem:[#allocation37_spill] sm:$0xff] %v9252_v15  ;;  %v9255_v61 = vadd.f32 %v9138_v54, %v3064_v48 }
 0x27c   : > { %v3538_v49 = vpop.f32.mrf.mxu1  ;;  %v9257_v28 = vpop.f32.mrf.mxu0 }
 0x27d   : > { %10717 = vst [vmem:[#allocation19_spill] sm:$0xff] %v9255_v61  ;;  %10718 = vst [vmem:[#allocation35_spill] sm:$0xff] %v9257_v28 }
 0x27e   : > { %v6401_v18 = vpop.f32.mrf.mxu1  ;;  %v9259_v57 = vpop.f32.mrf.mxu0 }
 0x27f   : > { %10719 = vst [vmem:[#allocation43_spill] sm:$0xff] %v9259_v57 }
 0x280   : > { %v3548_v36 = vpop.f32.mrf.mxu1  ;;  %v9261_v35 = vpop.f32.mrf.mxu0 }
 0x281   : > { %10720 = vst [vmem:[#allocation24_spill] sm:$0xff] %v9261_v35 }
 0x282   : > { %v6404_v29 = vpop.f32.mrf.mxu1  ;;  %v9263_v46 = vpop.f32.mrf.mxu0 }
 0x283   : > { %10721 = vst [vmem:[#allocation41_spill] sm:$0xff] %v9263_v46 }
 0x284   : > { %v9265_v24 = vpop.f32.mrf.mxu1  ;;  %v9267_v53 = vpop.f32.mrf.mxu0 }
 0x285   : > { %10722 = vst [vmem:[#allocation46_spill] sm:$0xff] %v9267_v53 }
 0x286   : > { %v9269_v39 = vpop.f32.mrf.mxu1  ;;  %v9271_v54 = vpop.f32.mrf.mxu0 }
 0x287   : > { %10723 = vst [vmem:[#allocation30_spill] sm:$0xff] %v9271_v54 }
 0x288   : > { %v9273_v48 = vpop.f32.mrf.mxu1  ;;  %v9275_v61 = vpop.f32.mrf.mxu0 }
 0x289   : > { %10724 = vst [vmem:[#allocation48_spill] sm:$0xff] %v9275_v61 }
 0x28a   : > { %v9277_v56 = vpop.f32.mrf.mxu1  ;;  %v9279_v42 = vpop.f32.mrf.mxu0 }
 0x28b   : > { %10725 = vst [vmem:[#allocation50_spill] sm:$0xff] %v9279_v42 }
 0x28c   : > { %v9281_v14 = vpop.f32.mrf.mxu1  ;;  %v9283_v55 = vpop.f32.mrf.mxu0 }
 0x28d   : > { %10726 = vst [vmem:[#allocation38_spill] sm:$0xff] %v9283_v55 }
 0x28e   : > { %v9285_v20 = vpop.f32.mrf.mxu1  ;;  %v9287_v46 = vpop.f32.mrf.mxu0 }
 0x28f   : > { %10727 = vst [vmem:[#allocation52_spill] sm:$0xff] %v9287_v46 }
 0x290   : > { %v9289_v53 = vpop.f32.mrf.mxu1  ;;  %v9291_v27 = vpop.f32.mrf.mxu0 }
 0x291   : > { %10728 = vst [vmem:[#allocation55_spill] sm:$0xff] %v9291_v27 }
 0x292   : > { %v9293_v54 = vpop.f32.mrf.mxu1  ;;  %v9295_v41 = vpop.f32.mrf.mxu0 }
 0x293   : > { %10729 = vst [vmem:[#allocation42_spill] sm:$0xff] %v9295_v41 }
 0x294   : > { %v9297_v61 = vpop.f32.mrf.mxu1  ;;  %v9299_v35 = vpop.f32.mrf.mxu0 }
 0x295   : > { %10730 = vst [vmem:[#allocation58_spill] sm:$0xff] %v9299_v35 }
 0x296   : > { %v9301_v42 = vpop.f32.mrf.mxu1  ;;  %v6548_v43 = vpop.f32.mrf.mxu0 }
 0x298   : > { %v9303_v55 = vpop.f32.mrf.mxu1  ;;  %v4598_v57 = vpop.f32.mrf.mxu0 }
 0x299   : > { %10731 = vst [vmem:[#allocation61_spill] sm:$0xff] %v9303_v55 }
 0x29a   : > { %v9305_v28 = vpop.f32.mrf.mxu1  ;;  %v6551_v46 = vpop.f32.mrf.mxu0 }
 0x29b   : > { %10732 = vst [vmem:[#allocation49_spill] sm:$0xff] %v9305_v28 }
 0x29c   : > { %v9307_v60 = vpop.f32.mrf.mxu1  ;;  %v4608_v27 = vpop.f32.mrf.mxu0 }
 0x29d   : > { %10733 = vst [vmem:[#allocation62_spill] sm:$0xff] %v9307_v60 }
 0x29e   : > { %v9309_v15 = vpop.f32.mrf.mxu1  ;;  %v9311_v33 = vpop.f32.mrf.mxu0 }
 0x29f   : > { %10734 = vst [vmem:[#allocation65_spill] sm:$0xff] %v9309_v15 }
 0x2a0   : > { %v9313_v41 = vpop.f32.mrf.mxu1  ;;  %v9315_v51 = vpop.f32.mrf.mxu0 }
 0x2a1   : > { %10735 = vst [vmem:[#allocation51_spill] sm:$0xff] %v9313_v41 }
 0x2a2   : > { %v9317_v35 = vpop.f32.mrf.mxu1  ;;  %v9319_v37 = vpop.f32.mrf.mxu0 }
 0x2a3   : > { %10736 = vst [vmem:[#allocation67_spill] sm:$0xff] %v9317_v35 }
 0x2a4   : > { %v9321_v2 = vpop.f32.mrf.mxu1  ;;  %v9323_v19 = vpop.f32.mrf.mxu0 }
 0x2a5   : > { %10737 = vst [vmem:[#allocation74_spill] sm:$0xff] %v9321_v2 }
 0x2a6   : > { %v9325_v3 = vpop.f32.mrf.mxu1  ;;  %v9327_v60 = vpop.f32.mrf.mxu0 }
 0x2a7   : > { %10738 = vst [vmem:[#allocation56_spill] sm:$0xff] %v9325_v3 }
 0x2a8   : > { %v9329_v62 = vpop.f32.mrf.mxu1  ;;  %v9331_v15 = vpop.f32.mrf.mxu0 }
 0x2a9   : > { %10739 = vst [vmem:[#allocation72_spill] sm:$0xff] %v9329_v62 }
 0x2aa   : > { %v9333_v13 = vpop.f32.mrf.mxu1  ;;  %v9335_v41 = vpop.f32.mrf.mxu0 }
 0x2ab   : > { %10740 = vst [vmem:[#allocation77_spill] sm:$0xff] %v9333_v13  ;;  %10741 = vst [vmem:[#allocation64_spill] sm:$0xff] %v9335_v41  ;;  %v3698_v13 = vadd.f32 %v6398_v25, %v9070_v0  ;;  %v3702_v0 = vadd.f32 %v6404_v29, %v9094_v30 }
 0x2ac   : > { %v9337_v28 = vpop.f32.mrf.mxu1  ;;  %v9339_v35 = vpop.f32.mrf.mxu0 }
 0x2ad   : > { %10742 = vst [vmem:[#allocation73_spill] sm:$0xff] %v9337_v28  ;;  %10743 = vst [vmem:[#allocation6_spill] sm:$0xff] %v9339_v35  ;;  %v3697_v28 = vadd.f32 %v3538_v49, %v9076_v31  ;;  %v9371_v49 = vld [vmem:[%s9704_s4] ss:$0 sm:$0xff]  ;;  %v4099_v29 = vadd.f32 %v9168_v17, %v3702_v0 }
 0x2ae   : > { %v9341_v10 = vpop.f32.mrf.mxu1  ;;  %v9343_v2 = vpop.f32.mrf.mxu0 }
 0x2af   : > { %10744 = vst [vmem:[#allocation68_spill] sm:$0xff] %v9341_v10  ;;  %10745 = vst [vmem:[#allocation75_spill] sm:$0xff] %v9343_v2  ;;  %v3700_v10 = vadd.f32 %v6401_v18, %v9082_v7 }
 0x2b0   : > { %v9345_v55 = vpop.f32.mrf.mxu1  ;;  %v9349_v59 = vpop.f32.mrf.mxu0 }
 0x2b1   : > { %10746 = vst [vmem:[#allocation16_spill] sm:$0xff] %v9345_v55  ;;  %10748 = vst [vmem:[#allocation76_spill] sm:$0xff] %v9349_v59  ;;  %v4095_v55 = vadd.f32 %v9144_v38, %v3698_v13  ;;  %v4097_v38 = vadd.f32 %v9156_v40, %v3700_v10 }
 0x2b2   : > { %v9347_v3 = vpop.f32.mrf.mxu1  ;;  %v9357_v41 = vpop.f32.mrf.mxu0 }
 0x2b3   : > { %10747 = vst [vmem:[#allocation69_spill] sm:$0xff] %v9347_v3  ;;  %v3699_v3 = vadd.f32 %v3548_v36, %v9088_v8  ;;  %v3701_v8 = vadd.f32 %v9265_v24, %v9100_v1  ;;  %v3706_v36 = vadd.f32 %v9277_v56, %v9118_v45 }
 0x2b4   : > { %v9351_v62 = vpop.f32.mrf.mxu1  ;;  %v9366_v25 = vpop.f32.mrf.mxu0 }
 0x2b5   : > { %10749 = vst [vmem:[#allocation20_spill] sm:$0xff] %v9351_v62  ;;  %v4094_v62 = vadd.f32 %v9150_v9, %v3697_v28  ;;  %v4096_v30 = vadd.f32 %v9162_v21, %v3699_v3  ;;  %v4098_v28 = vadd.f32 %v9174_v12, %v3701_v8  ;;  %v3703_v21 = vadd.f32 %v9273_v48, %v9112_v52 }
 0x2b6   : > { %v9354_v47 = vpop.f32.mrf.mxu1  ;;  %v9377_v13 = vpop.f32.mrf.mxu0 }
 0x2b7   : > { %10750 = vst [vmem:[#allocation70_spill] sm:$0xff] %v9354_v47 }
 0x2b8   : > { %v9359_v35 = vpop.f32.mrf.mxu1  ;;  %v9389_v17 = vpop.f32.mrf.mxu0 }
 0x2ba   : > { %v6498_v2 = vpop.f32.mrf.mxu1 }
 0x2bb   : > { %v4361_v59 = vadd.f32 %v6498_v2, %v4095_v55 }
 0x2bc   : > { %v4201_v47 = vpop.f32.mrf.mxu1 }
 0x2bd   : > { %v4758_v31 = vadd.f32 %v6548_v43, %v4361_v59  ;;  %v4360_v7 = vadd.f32 %v4201_v47, %v4094_v62  ;;  %v3704_v62 = vadd.f32 %v9269_v39, %v9106_v34 }
 0x2be   : > { %v6501_v2 = vpop.f32.mrf.mxu1 }
 0x2bf   : > { %v4757_v55 = vadd.f32 %v4598_v57, %v4360_v7  ;;  %v4363_v9 = vadd.f32 %v6501_v2, %v4097_v38  ;;  %v4797_v59 = vadd.f32 %v9371_v49, %v4758_v31  ;;  %v4101_v52 = vadd.f32 %v9180_v11, %v3704_v62  ;;  %v9401_v38 = vpop.f32.mrf.mxu0 }
 0x2c0   : > { %v4211_v43 = vpop.f32.mrf.mxu1  ;;  %v4100_v7 = vadd.f32 %v9186_v4, %v3703_v21  ;;  %v4103_v11 = vadd.f32 %v9192_v6, %v3706_v36 }
 0x2c1   : > { %v4796_v40 = vadd.f32 %v9371_v49, %v4757_v55  ;;  %v4760_v10 = vadd.f32 %v6551_v46, %v4363_v9  ;;  %v4362_v47 = vadd.f32 %v4211_v43, %v4096_v30  ;;  %v4829_v24 = vmax.f32 %v4797_v59, 0.0 }
 0x2c2   : > { %v6504_v1 = vpop.f32.mrf.mxu1  ;;  %v3707_v30 = vadd.f32 %v9289_v53, %v9136_v58 }
 0x2c3   : > { %v4828_v3 = vmax.f32 %v4796_v40, 0.0  ;;  %v4759_v18 = vadd.f32 %v4608_v27, %v4362_v47  ;;  %v4365_v57 = vadd.f32 %v6504_v1, %v4099_v29  ;;  %v4799_v34 = vadd.f32 %v9371_v49, %v4760_v10 }
 0x2c4   : > { %v4221_v39 = vpop.f32.mrf.mxu1  ;;  %v3705_v27 = vadd.f32 %v9281_v14, %v9124_v50  ;;  %v3708_v50 = vadd.f32 %v9285_v20, %v9130_v5  ;;  %v3710_v5 = vadd.f32 %v9293_v54, %v9142_v22  ;;  %v9417_v20 = vpop.f32.mrf.mxu0  ;;  %v4104_v1 = vadd.f32 %v9210_v44, %v3707_v30  ;;  %v10759_v44 = vld [vmem:[#allocation21_spill] sm:$0xff]  ;;  %v10771_v30 = vld [vmem:[#allocation76_spill] sm:$0xff] }
 0x2c5   : > { %v4798_v46 = vadd.f32 %v9371_v49, %v4759_v18  ;;  %v4762_v0 = vadd.f32 %v9311_v33, %v4365_v57  ;;  %v4364_v12 = vadd.f32 %v4221_v39, %v4098_v28  ;;  %6596 = vmatprep.mubr.msk.f32.mxu1 %vm10751_vm8, %v4828_v3  ;;  %v4831_v33 = vmax.f32 %v4799_v34, 0.0  ;;  %v10756_v18 = vld [vmem:[#allocation64_spill] sm:$0xff]  ;;  %v10760_v34 = vld [vmem:[#allocation27_spill] sm:$0xff]  ;;  %v10761_v39 = vld [vmem:[#allocation61_spill] sm:$0xff] }
 0x2c6   : > { %v6507_v48 = vpop.f32.mrf.mxu1  ;;  %6597 = vmatmul.mubr.msk.f32.vlgmr.msra.gmra.mxu1 %vm10752_vm1, %v4829_v24  ;;  %v4102_v4 = vadd.f32 %v9198_v63, %v3705_v27  ;;  %v4105_v58 = vadd.f32 %v9204_v32, %v3708_v50  ;;  %v9429_v28 = vpop.f32.mrf.mxu0  ;;  %v4107_v32 = vadd.f32 %v9216_v23, %v3710_v5  ;;  %v10762_v23 = vld [vmem:[#allocation6_spill] sm:$0xff]  ;;  %vm10799_vm8 = vmmov %vm10536_vm0 }
 0x2c7   : > { %v4830_v45 = vmax.f32 %v4798_v46, 0.0  ;;  %v4761_v56 = vadd.f32 %v9315_v51, %v4364_v12  ;;  %v4367_v31 = vadd.f32 %v6507_v48, %v4101_v52  ;;  %v4801_v8 = vadd.f32 %v9371_v49, %v4762_v0  ;;  %vm10803_vm1 = vmmov %vm10536_vm0 }
 0x2c8   : > { %v4231_v2 = vpop.f32.mrf.mxu1  ;;  %v3711_v46 = vadd.f32 %v10761_v39, %v10760_v34  ;;  %v9445_v48 = vpop.f32.mrf.mxu0 }
 0x2c9   : > { %v4800_v14 = vadd.f32 %v9371_v49, %v4761_v56  ;;  %v4764_v55 = vadd.f32 %v9319_v37, %v4367_v31  ;;  %v4366_v9 = vadd.f32 %v4231_v2, %v4100_v7  ;;  %6599 = vmatprep.mubr.msk.f32.mxu1 %vm10753_vm14, %v4830_v45  ;;  %v4833_v37 = vmax.f32 %v4801_v8, 0.0  ;;  %vm10808_vm14 = vmmov %vm10536_vm0 }
 0x2ca   : > { %v6510_v51 = vpop.f32.mrf.mxu1  ;;  %6600 = vmatmul.mubr.msk.f32.gmra.mxu1 %vm10754_vm9, %v4831_v33  ;;  %v10765_v33 = vld [vmem:[#allocation75_spill] sm:$0xff]  ;;  %vm10809_vm9 = vmmov %vm10536_vm0 }
 0x2cb   : > { %v4832_v59 = vmax.f32 %v4800_v14, 0.0  ;;  %v4763_v6 = vadd.f32 %v9323_v19, %v4366_v9  ;;  %v4369_v43 = vadd.f32 %v6510_v51, %v4103_v11  ;;  %v4803_v29 = vadd.f32 %v9371_v49, %v4764_v55  ;;  %v10767_v11 = vld [vmem:[#allocation25_spill] sm:$0xff]  ;;  %v10768_v14 = vld [vmem:[#allocation34_spill] sm:$0xff] }
 0x2cc   : > { %v4241_v62 = vpop.f32.mrf.mxu1  ;;  %v3709_v19 = vadd.f32 %v9297_v61, %v9148_v26  ;;  %v3712_v26 = vadd.f32 %v9301_v42, %v9154_v16  ;;  %v10763_v16 = vld [vmem:[#allocation29_spill] sm:$0xff]  ;;  %v10769_v55 = vld [vmem:[#allocation62_spill] sm:$0xff] }
 0x2cd   : > { %v4802_v40 = vadd.f32 %v9371_v49, %v4763_v6  ;;  %v4766_v63 = vadd.f32 %v9327_v60, %v4369_v43  ;;  %v4368_v10 = vadd.f32 %v4241_v62, %v4102_v4  ;;  %6602 = vmatprep.mubr.msk.f32.mxu1 %vm10536_vm0, %v4832_v59  ;;  %v4835_v60 = vmax.f32 %v4803_v29, 0.0  ;;  %v10764_v42 = vld [vmem:[#allocation49_spill] sm:$0xff]  ;;  %v10772_v43 = vld [vmem:[#allocation26_spill] sm:$0xff] }
 0x2ce   : > { %v6513_v53 = vpop.f32.mrf.mxu1  ;;  %6603 = vmatmul.mubr.msk.f32.gmra.mxu1 %vm10755_vm10, %v4833_v37  ;;  %v4106_v24 = vadd.f32 %v10759_v44, %v3709_v19  ;;  %v3714_v27 = vadd.f32 %v10764_v42, %v10763_v16  ;;  %v4109_v50 = vadd.f32 %v10767_v11, %v3712_v26  ;;  %v3713_v9 = vadd.f32 %v10769_v55, %v10768_v14  ;;  %v9457_v37 = vpop.f32.mrf.mxu0  ;;  %v10775_v19 = vld [vmem:[#allocation65_spill] sm:$0xff]  ;;  %v10786_v16 = vld [vmem:[#allocation74_spill] sm:$0xff]  ;;  %v10790_v55 = vld [vmem:[#allocation63_spill] sm:$0xff] }
 0x2cf   : > { %v4834_v22 = vmax.f32 %v4802_v40, 0.0  ;;  %v4765_v54 = vadd.f32 %v9331_v15, %v4368_v10  ;;  %v4371_v47 = vadd.f32 %v6513_v53, %v4105_v58  ;;  %v4805_v21 = vadd.f32 %v9371_v49, %v4766_v63  ;;  %v10773_v63 = vld [vmem:[#allocation7_spill] sm:$0xff]  ;;  %vm10818_vm10 = vmmov %vm10536_vm0 }
 0x2d0   : > { %v4251_v3 = vpop.f32.mrf.mxu1  ;;  %v4108_v5 = vadd.f32 %v10772_v43, %v3711_v46  ;;  %v4111_v10 = vadd.f32 %v10773_v63, %v3714_v27  ;;  %v10774_v58 = vld [vmem:[#allocation59_spill] sm:$0xff] }
 0x2d1   : > { %v4804_v61 = vadd.f32 %v9371_v49, %v4765_v54  ;;  %v4768_v57 = vadd.f32 %v10756_v18, %v4371_v47  ;;  %v4370_v36 = vadd.f32 %v4251_v3, %v4104_v1  ;;  %6605 = vmatprep.mubr.msk.f32.mxu1 %vm10757_vm4, %v4834_v22  ;;  %v4837_v45 = vmax.f32 %v4805_v21, 0.0  ;;  %v10779_v3 = vld [vmem:[#allocation47_spill] sm:$0xff]  ;;  %vm10823_vm4 = vmmov %vm10536_vm0 }
 0x2d2   : > { %v6516_v15 = vpop.f32.mrf.mxu1  ;;  %6606 = vmatmul.mubr.msk.f32.gmra.mxu1 %vm10758_vm5, %v4835_v60  ;;  %v3716_v53 = vadd.f32 %v10775_v19, %v10774_v58  ;;  %v10778_v60 = vld [vmem:[#allocation15_spill] sm:$0xff]  ;;  %v10797_v58 = vld [vmem:[#allocation66_spill] sm:$0xff]  ;;  %v10798_v19 = vld [vmem:[#allocation77_spill] sm:$0xff] }
 0x2d3   : > { %v4836_v0 = vmax.f32 %v4804_v61, 0.0  ;;  %v4767_v12 = vadd.f32 %v10762_v23, %v4370_v36  ;;  %v4373_v52 = vadd.f32 %v6516_v15, %v4107_v32  ;;  %v4807_v56 = vadd.f32 %v9371_v49, %v4768_v57  ;;  %v10780_v32 = vld [vmem:[#allocation51_spill] sm:$0xff]  ;;  %v10781_v36 = vld [vmem:[#allocation45_spill] sm:$0xff]  ;;  %vm10824_vm5 = vmmov %vm10536_vm0 }
 0x2d4   : > { %v4261_v31 = vpop.f32.mrf.mxu1  ;;  %v4110_v21 = vadd.f32 %v10778_v60, %v3713_v9  ;;  %v3715_v26 = vadd.f32 %v10780_v32, %v10779_v3  ;;  %v10782_v15 = vld [vmem:[#allocation67_spill] sm:$0xff]  ;;  %v10791_v9 = vld [vmem:[#allocation56_spill] sm:$0xff]  ;;  %v10800_v3 = vld [vmem:[#allocation41_spill] sm:$0xff] }
 0x2d5   : > { %v4806_v7 = vadd.f32 %v9371_v49, %v4767_v12  ;;  %v4770_v8 = vadd.f32 %v10765_v33, %v4373_v52  ;;  %v4372_v2 = vadd.f32 %v4261_v31, %v4106_v24  ;;  %6608 = vmatprep.mubr.msk.f32.mxu1 %vm10766_vm13, %v4836_v0  ;;  %v4839_v29 = vmax.f32 %v4807_v56, 0.0  ;;  %v9473_v24 = vpop.f32.mrf.mxu0  ;;  %v10784_v12 = vld [vmem:[#allocation37_spill] sm:$0xff]  ;;  %vm10827_vm13 = vmmov %vm10536_vm0 }
 0x2d6   : > { %v6519_v51 = vpop.f32.mrf.mxu1  ;;  %6609 = vmatmul.mubr.msk.f32.gmra.mxu1 %vm10770_vm3, %v4837_v45  ;;  %v3718_v44 = vadd.f32 %v10782_v15, %v10781_v36  ;;  %v4113_v52 = vadd.f32 %v10784_v12, %v3716_v53  ;;  %v3722_v53 = vadd.f32 %v10798_v19, %v10797_v58  ;;  %v10806_v12 = vld [vmem:[#allocation53_spill] sm:$0xff]  ;;  %v10819_v58 = vld [vmem:[#allocation38_spill] sm:$0xff]  ;;  %vm10829_vm3 = vmmov %vm10536_vm0 }
 0x2d7   : > { %v4838_v4 = vmax.f32 %v4806_v7, 0.0  ;;  %v4769_v59 = vadd.f32 %v10771_v30, %v4372_v2  ;;  %v4375_v6 = vadd.f32 %v6519_v51, %v4109_v50  ;;  %v4809_v62 = vadd.f32 %v9371_v49, %v4770_v8  ;;  %v10788_v7 = vld [vmem:[#allocation35_spill] sm:$0xff]  ;;  %v6584_v8 = vpop.f32.mrf.mxu0 }
 0x2d8   : > { %v4271_v40 = vpop.f32.mrf.mxu1  ;;  %v4112_v33 = vadd.f32 %v10788_v7, %v3715_v26  ;;  %v10789_v50 = vld [vmem:[#allocation43_spill] sm:$0xff]  ;;  %v3720_v51 = vadd.f32 %v10791_v9, %v10790_v55  ;;  %v10812_v7 = vld [vmem:[#allocation16_spill] sm:$0xff] }
 0x2d9   : > { %v4808_v22 = vadd.f32 %v9371_v49, %v4769_v59  ;;  %v4772_v54 = vadd.f32 %v9357_v41, %v4375_v6  ;;  %v4374_v47 = vadd.f32 %v4271_v40, %v4108_v5  ;;  %6611 = vmatprep.mubr.msk.f32.mxu1 %vm10776_vm6, %v4838_v4  ;;  %v4841_v41 = vmax.f32 %v4809_v62, 0.0  ;;  %v10794_v6 = vld [vmem:[#allocation24_spill] sm:$0xff]  ;;  %v10795_v5 = vld [vmem:[#allocation57_spill] sm:$0xff]  ;;  %v10801_v26 = vld [vmem:[#allocation39_spill] sm:$0xff] }
 0x2da   : > { %v6522_v1 = vpop.f32.mrf.mxu1  ;;  %6612 = vmatmul.mubr.msk.f32.gmra.mxu1 %vm10777_vm15, %v4839_v29  ;;  %v4115_v14 = vadd.f32 %v10789_v50, %v3718_v44  ;;  %v10796_v29 = vld [vmem:[#allocation72_spill] sm:$0xff]  ;;  %v4117_v32 = vadd.f32 %v10800_v3, %v3720_v51  ;;  %v10804_v44 = vld [vmem:[#allocation46_spill] sm:$0xff]  ;;  %v10813_v50 = vld [vmem:[#allocation5_spill] sm:$0xff] }
 0x2db   : > { %v4840_v61 = vmax.f32 %v4808_v22, 0.0  ;;  %v4771_v18 = vadd.f32 %v9366_v25, %v4374_v47  ;;  %v4377_v57 = vadd.f32 %v6522_v1, %v4111_v10  ;;  %v4811_v34 = vadd.f32 %v9371_v49, %v4772_v54  ;;  %v10785_v25 = vld [vmem:[#allocation60_spill] sm:$0xff]  ;;  %v4718_v22 = vpop.f32.mrf.mxu0  ;;  %vm10831_vm6 = vmmov %vm10536_vm0 }
 0x2dc   : > { %v4281_v39 = vpop.f32.mrf.mxu1  ;;  %v3717_v42 = vadd.f32 %v10786_v16, %v10785_v25  ;;  %v3719_v62 = vadd.f32 %v10796_v29, %v10795_v5  ;;  %v10816_v5 = vld [vmem:[#allocation32_spill] sm:$0xff]  ;;  %vm10832_vm15 = vmmov %vm10536_vm0 }
 0x2dd   : > { %v4810_v46 = vadd.f32 %v9371_v49, %v4771_v18  ;;  %v4774_v0 = vadd.f32 %v9377_v13, %v4377_v57  ;;  %v4376_v23 = vadd.f32 %v4281_v39, %v4110_v21  ;;  %6614 = vmatprep.mubr.msk.f32.mxu1 %vm10783_vm12, %v4840_v61  ;;  %v4843_v2 = vmax.f32 %v4811_v34, 0.0  ;;  %v6587_v34 = vpop.f32.mrf.mxu0  ;;  %v10817_v29 = vld [vmem:[#allocation20_spill] sm:$0xff]  ;;  %vm10833_vm12 = vmmov %vm10536_vm0 }
 0x2de   : > { %v6525_v27 = vpop.f32.mrf.mxu1  ;;  %6615 = vmatmul.mubr.msk.f32.gmra.mxu1 %vm10787_vm7, %v4841_v41  ;;  %v4114_v43 = vadd.f32 %v10794_v6, %v3717_v42  ;;  %v4116_v41 = vadd.f32 %v10804_v44, %v3719_v62  ;;  %v10815_v6 = vld [vmem:[#allocation50_spill] sm:$0xff]  ;;  %vm10834_vm7 = vmmov %vm10536_vm0 }
 0x2df   : > { %v4842_v45 = vmax.f32 %v4810_v46, 0.0  ;;  %v4773_v56 = vadd.f32 %v9389_v17, %v4376_v23  ;;  %v4379_v31 = vadd.f32 %v6525_v27, %v4113_v52  ;;  %v4813_v13 = vadd.f32 %v9371_v49, %v4774_v0  ;;  %v10805_v0 = vld [vmem:[#allocation30_spill] sm:$0xff]  ;;  %v10807_v52 = vld [vmem:[#allocation68_spill] sm:$0xff]  ;;  %v4728_v9 = vpop.f32.mrf.mxu0 }
 0x2e0   : > { %v4291_v11 = vpop.f32.mrf.mxu1  ;;  %v4119_v23 = vadd.f32 %v10805_v0, %v3722_v53  ;;  %v3724_v25 = vadd.f32 %v10807_v52, %v10806_v12  ;;  %v10828_v52 = vld [vmem:[#allocation42_spill] sm:$0xff] }
 0x2e1   : > { %v4812_v4 = vadd.f32 %v9371_v49, %v4773_v56  ;;  %v4776_v30 = vadd.f32 %v9401_v38, %v4379_v31  ;;  %v4378_v59 = vadd.f32 %v4291_v11, %v4112_v33  ;;  %6617 = vmatprep.mubr.msk.f32.mxu1 %vm10792_vm2, %v4842_v45  ;;  %v4845_v38 = vmax.f32 %v4813_v13, 0.0  ;;  %v10810_v45 = vld [vmem:[#allocation48_spill] sm:$0xff]  ;;  %v10811_v31 = vld [vmem:[#allocation54_spill] sm:$0xff]  ;;  %v6590_v53 = vpop.f32.mrf.mxu0  ;;  %vm10835_vm2 = vmmov %vm10536_vm0 }
 0x2e2   : > { %v6528_v17 = vpop.f32.mrf.mxu1  ;;  %6618 = vmatmul.mubr.msk.f32.gmra.mxu1 %vm10793_vm11, %v4843_v2  ;;  %v3723_v33 = vadd.f32 %v10812_v7, %v10811_v31  ;;  %vm10836_vm11 = vmmov %vm10536_vm0 }
 0x2e3   : > { %v4844_v40 = vmax.f32 %v4812_v4, 0.0  ;;  %v4775_v63 = vadd.f32 %v9417_v20, %v4378_v59  ;;  %v4381_v10 = vadd.f32 %v6528_v17, %v4115_v14  ;;  %v4815_v54 = vadd.f32 %v9371_v49, %v4776_v30  ;;  %v10802_v20 = vld [vmem:[#allocation73_spill] sm:$0xff] }
 0x2e4   : > { %v4301_v47 = vpop.f32.mrf.mxu1  ;;  %v3721_v61 = vadd.f32 %v10802_v20, %v10801_v26  ;;  %v10814_v14 = vld [vmem:[#allocation69_spill] sm:$0xff]  ;;  %v4120_v19 = vadd.f32 %v10819_v58, %v3723_v33 }
 0x2e5   : > { %v4814_v1 = vadd.f32 %v9371_v49, %v4775_v63  ;;  %v4778_v60 = vadd.f32 %v9429_v28, %v4381_v10  ;;  %v4380_v21 = vadd.f32 %v4301_v47, %v4114_v43  ;;  %6620 = vmatprep.mubr.msk.f32.mxu1 %vm10799_vm8, %v4844_v40  ;;  %v4847_v39 = vmax.f32 %v4815_v54, 0.0  ;;  %v10820_v47 = vld [vmem:[#allocation52_spill] sm:$0xff] }
 0x2e6   : > { %v6531_v18 = vpop.f32.mrf.mxu1  ;;  %6621 = vmatmul.mubr.msk.f32.gmra.mxu1 %vm10803_vm1, %v4845_v38  ;;  %v4118_v56 = vadd.f32 %v10810_v45, %v3721_v61  ;;  %v3726_v55 = vadd.f32 %v10814_v14, %v10813_v50  ;;  %v4121_v43 = vadd.f32 %v10815_v6, %v3724_v25  ;;  %v10825_v61 = vld [vmem:[#allocation55_spill] sm:$0xff]  ;;  %v10830_v45 = vld [vmem:[#allocation58_spill] sm:$0xff]  ;;  %vm10837_vm8 = vcmask 130048  }
 0x2e7   : > { %v4846_v57 = vmax.f32 %v4814_v1, 0.0  ;;  %v4777_v36 = vadd.f32 %v9445_v48, %v4380_v21  ;;  %v4383_v15 = vadd.f32 %v6531_v18, %v4117_v32  ;;  %v4817_v28 = vadd.f32 %v9371_v49, %v4778_v60  ;;  %v10821_v60 = vld [vmem:[#allocation10_spill] sm:$0xff]  ;;  %vm10838_vm1 = vmmov %vm10837_vm8 }
 0x2e8   : > { %v4311_v46 = vpop.f32.mrf.mxu1  ;;  %v4123_v1 = vadd.f32 %v10820_v47, %v3726_v55  ;;  %v10822_v21 = vld [vmem:[#allocation70_spill] sm:$0xff] }
 0x2e9   : > { %v4816_v16 = vadd.f32 %v9371_v49, %v4777_v36  ;;  %v4780_v42 = vadd.f32 %v9457_v37, %v4383_v15  ;;  %v4382_v27 = vadd.f32 %v4311_v46, %v4116_v41  ;;  %6623 = vmatprep.mubr.msk.f32.mxu1 %vm10808_vm14, %v4846_v57  ;;  %v4849_v37 = vmax.f32 %v4817_v28, 0.0  ;;  %v10826_v57 = vld [vmem:[#allocation19_spill] sm:$0xff]  ;;  %vm10839_vm14 = vmmov %vm10838_vm1 }
 0x2ea   : > { %v6534_v48 = vpop.f32.mrf.mxu1  ;;  %6624 = vmatmul.mubr.msk.f32.gmra.mxu1 %vm10809_vm9, %v4847_v39  ;;  %v3728_v3 = vadd.f32 %v10822_v21, %v10821_v60  ;;  %v3727_v36 = vadd.f32 %v9359_v35, %v10826_v57  ;;  %v4738_v39 = vpop.f32.mrf.mxu0  ;;  %vm10840_vm9 = vmmov %vm10838_vm1  ;;  %v6689_v57 = vld [vmem:[%s6793_s13 + $0x20] sm:$0xff] }
 0x2eb   : > { %v4848_v2 = vmax.f32 %v4816_v16, 0.0  ;;  %v4779_v13 = vadd.f32 %v9473_v24, %v4382_v27  ;;  %v4385_v11 = vadd.f32 %v6534_v48, %v4119_v23  ;;  %v4819_v51 = vadd.f32 %v9371_v49, %v4780_v42 }
 0x2ec   : > { %v4321_v4 = vpop.f32.mrf.mxu1  ;;  %v3725_v24 = vadd.f32 %v10817_v29, %v10816_v5  ;;  %v4125_v25 = vadd.f32 %v10828_v52, %v3728_v3  ;;  %v6593_v42 = vpop.f32.mrf.mxu0 }
 0x2ed   : > { %v4818_v30 = vadd.f32 %v9371_v49, %v4779_v13  ;;  %v4782_v59 = vadd.f32 %v6584_v8, %v4385_v11  ;;  %v4384_v17 = vadd.f32 %v4321_v4, %v4118_v56  ;;  %6626 = vmatprep.mubr.msk.f32.mxu1 %vm10536_vm0, %v4848_v2  ;;  %v4851_v38 = vmax.f32 %v4819_v51, 0.0  ;;  %vm10841_vm0 = vmmov %vm10838_vm1 }
 0x2ee   : > { %v6537_v62 = vpop.f32.mrf.mxu1  ;;  %6627 = vmatmul.mubr.msk.f32.gmra.mxu1 %vm10818_vm10, %v4849_v37  ;;  %v4122_v18 = vadd.f32 %v10825_v61, %v3725_v24  ;;  %v4124_v56 = vadd.f32 %v10830_v45, %v3727_v36  ;;  %v4748_v50 = vpop.f32.mrf.mxu0  ;;  %vm10842_vm10 = vmmov %vm10841_vm0 }
 0x2ef   : > { %v4850_v40 = vmax.f32 %v4818_v30, 0.0  ;;  %v4781_v63 = vadd.f32 %v4718_v22, %v4384_v17  ;;  %v4387_v10 = vadd.f32 %v6537_v62, %v4121_v43  ;;  %v4821_v8 = vadd.f32 %v9371_v49, %v4782_v59  ;;  %v9560_v59 = vld [vmem:[%s9706_s6] ss:$0 sm:$0xff]  ;;  %v6684_v43 = vld [vmem:[%s6793_s13 + $0x8] sm:$0xff] }
 0x2f0   : > { %v4331_v54 = vpop.f32.mrf.mxu1 }
 0x2f1   : > { %v4820_v32 = vadd.f32 %v9371_v49, %v4781_v63  ;;  %v4784_v26 = vadd.f32 %v6587_v34, %v4387_v10  ;;  %v4386_v20 = vadd.f32 %v4331_v54, %v4120_v19  ;;  %6629 = vmatprep.mubr.msk.f32.mxu1 %vm10823_vm4, %v4850_v40  ;;  %v4853_v28 = vmax.f32 %v4821_v8, 0.0  ;;  %v6685_v40 = vld [vmem:[%s6793_s13] sm:$0xff]  ;;  %vm10843_vm4 = vmmov %vm10841_vm0 }
 0x2f2   : > { %v6540_v22 = vpop.f32.mrf.mxu1  ;;  %6630 = vmatmul.mubr.msk.f32.gmra.mxu1 %vm10824_vm5, %v4851_v38  ;;  %vm10844_vm5 = vmmov %vm10841_vm0 }
 0x2f3   : > { %v4852_v15 = vmax.f32 %v4820_v32, 0.0  ;;  %v4783_v44 = vadd.f32 %v4728_v9, %v4386_v20  ;;  %v4389_v41 = vadd.f32 %v6540_v22, %v4123_v1  ;;  %v4823_v46 = vadd.f32 %v9371_v49, %v4784_v26  ;;  %v6687_v1 = vld [vmem:[%s6793_s13 + $0x10] sm:$0xff]  ;;  %v6688_v26 = vld [vmem:[%s6793_s13 + $0x28] sm:$0xff] }
 0x2f4   : > { %v4341_v0 = vpop.f32.mrf.mxu1 }
 0x2f5   : > { %v4822_v34 = vadd.f32 %v9371_v49, %v4783_v44  ;;  %v4786_v23 = vadd.f32 %v6590_v53, %v4389_v41  ;;  %v4388_v12 = vadd.f32 %v4341_v0, %v4122_v18  ;;  %6632 = vmatprep.mubr.msk.f32.mxu1 %vm10827_vm13, %v4852_v15  ;;  %v4855_v31 = vmax.f32 %v4823_v46, 0.0  ;;  %v6686_v53 = vld [vmem:[%s6793_s13 + $0x18] sm:$0xff]  ;;  %vm10845_vm13 = vmmov %vm10841_vm0 }
 0x2f6   : > { %v6543_v16 = vpop.f32.mrf.mxu1  ;;  %6633 = vmatmul.mubr.msk.f32.gmra.mxu1 %vm10829_vm3, %v4853_v28  ;;  %vm10846_vm3 = vmmov %vm10841_vm0 }
 0x2f7   : > { %v4854_v35 = vmax.f32 %v4822_v34, 0.0  ;;  %v4785_v27 = vadd.f32 %v4738_v39, %v4388_v12  ;;  %v4391_v48 = vadd.f32 %v6543_v16, %v4125_v25  ;;  %v4825_v7 = vadd.f32 %v9371_v49, %v4786_v23  ;;  %v6690_v39 = vld [vmem:[%s6793_s13 + $0x38] sm:$0xff]  ;;  %v6691_v23 = vld [vmem:[%s6793_s13 + $0x30] sm:$0xff] }
 0x2f8   : > { %v4351_v33 = vpop.f32.mrf.mxu1 }
 0x2f9   : > { %v4824_v2 = vadd.f32 %v9371_v49, %v4785_v27  ;;  %v4788_v13 = vadd.f32 %v6593_v42, %v4391_v48  ;;  %v4390_v11 = vadd.f32 %v4351_v33, %v4124_v56  ;;  %6635 = vmatprep.mubr.msk.f32.mxu1 %vm10831_vm6, %v4854_v35  ;;  %v4857_v9 = vmax.f32 %v4825_v7, 0.0  ;;  %v6692_v42 = vld [vmem:[%s6793_s13 + $0x48] sm:$0xff]  ;;  %v6693_v56 = vld [vmem:[%s6793_s13 + $0x40] sm:$0xff]  ;;  %vm10847_vm6 = vmmov %vm10841_vm0 }
 0x2fa   : > { %6636 = vmatmul.mubr.msk.f32.gmra.mxu1 %vm10832_vm15, %v4855_v31  ;;  %vm10848_vm15 = vmmov %vm10841_vm0 }
 0x2fb   : > { %v4856_v14 = vmax.f32 %v4824_v2, 0.0  ;;  %v4787_v55 = vadd.f32 %v4748_v50, %v4390_v11  ;;  %v4827_v37 = vadd.f32 %v9371_v49, %v4788_v13  ;;  %v6694_v13 = vld [vmem:[%s6793_s13 + $0x58] sm:$0xff] }
 0x2fd   : > { %v4826_v51 = vadd.f32 %v9371_v49, %v4787_v55  ;;  %6638 = vmatprep.mubr.msk.f32.mxu1 %vm10833_vm12, %v4856_v14  ;;  %v4859_v30 = vmax.f32 %v4827_v37, 0.0  ;;  %vm10849_vm12 = vmmov %vm10841_vm0 }
 0x2fe   : > { %6639 = vmatmul.mubr.msk.f32.gmra.mxu1 %vm10834_vm7, %v4857_v9  ;;  %v6695_v9 = vld [vmem:[%s6793_s13 + $0x50] sm:$0xff]  ;;  %vm10850_vm7 = vmmov %vm10841_vm0 }
 0x2ff   : > { %v4858_v4 = vmax.f32 %v4826_v51, 0.0 }
 0x301   : > { %6641 = vmatprep.mubr.msk.f32.mxu1 %vm10835_vm2, %v4858_v4  ;;  %vm10851_vm2 = vmmov %vm10841_vm0 }
 0x302   : > { %6642 = vmatmul.mubr.msk.f32.gmra.mxu1 %vm10836_vm11, %v4859_v30  ;;  %vm10852_vm11 = vmmov %vm10841_vm0 }
 0x386   : > { %v6598_v17 = vpop.f32.mrf.mxu1 }
 0x387   : > { %v5039_v49 = vadd.f32 %v6598_v17, %v9560_v59  ;;  %v6696_v17 = vld [vmem:[%s6793_s13 + $0x68] sm:$0xff] }
 0x388   : > { %v5033_v6 = vpop.f32.mrf.mxu1 }
 0x389   : > { %v5193_v5 = vadd.f32 %v6684_v43, %v5039_v49  ;;  %v5034_v29 = vadd.f32 %v9560_v59, %v5033_v6 }
 0x38a   : > { %v6601_v24 = vpop.f32.mrf.mxu1 }
 0x38b   : > { %v5225_v62 = vmax.f32 %v5193_v5, 0.0  ;;  %v5192_v63 = vadd.f32 %v6685_v40, %v5034_v29  ;;  %v5049_v10 = vadd.f32 %v6601_v24, %v9560_v59  ;;  %v6697_v29 = vld [vmem:[%s6793_s13 + $0x60] sm:$0xff] }
 0x38c   : > { %v5043_v58 = vpop.f32.mrf.mxu1 }
 0x38d   : > { %5257 = vst.msk [vmem:[%s9570_s21 + $0x8] sm:$0xff] %vm10837_vm8, %v5225_v62  ;;  %v5224_v19 = vmax.f32 %v5192_v63, 0.0  ;;  %v5195_v38 = vadd.f32 %v6686_v53, %v5049_v10  ;;  %v5044_v8 = vadd.f32 %v9560_v59, %v5043_v58  ;;  %v6698_v10 = vld [vmem:[%s6793_s13 + $0x78] sm:$0xff]  ;;  %vm10853_vm8 = vmmov %vm10841_vm0 }
 0x38e   : > { %v6604_v54 = vpop.f32.mrf.mxu1 }
 0x38f   : > { %5256 = vst.msk [vmem:[%s9570_s21] sm:$0xff] %vm10838_vm1, %v5224_v19  ;;  %v5227_v47 = vmax.f32 %v5195_v38, 0.0  ;;  %v5194_v60 = vadd.f32 %v6687_v1, %v5044_v8  ;;  %v5059_v21 = vadd.f32 %v6604_v54, %v9560_v59  ;;  %v6699_v8 = vld [vmem:[%s6793_s13 + $0x70] sm:$0xff]  ;;  %vm10854_vm1 = vmmov %vm10841_vm0 }
 0x390   : > { %v5053_v3 = vpop.f32.mrf.mxu1 }
 0x391   : > { %5259 = vst.msk [vmem:[%s9570_s21 + $0x18] sm:$0xff] %vm10839_vm14, %v5227_v47  ;;  %v5226_v32 = vmax.f32 %v5194_v60, 0.0  ;;  %v5197_v20 = vadd.f32 %v6688_v26, %v5059_v21  ;;  %v5054_v22 = vadd.f32 %v9560_v59, %v5053_v3  ;;  %v6700_v21 = vld [vmem:[%s6793_s13 + $0x88] sm:$0xff]  ;;  %vm10855_vm14 = vmmov %vm10841_vm0 }
 0x392   : > { %v6607_v61 = vpop.f32.mrf.mxu1 }
 0x393   : > { %5258 = vst.msk [vmem:[%s9570_s21 + $0x10] sm:$0xff] %vm10840_vm9, %v5226_v32  ;;  %v5229_v18 = vmax.f32 %v5197_v20, 0.0  ;;  %v5196_v36 = vadd.f32 %v6689_v57, %v5054_v22  ;;  %v5069_v15 = vadd.f32 %v6607_v61, %v9560_v59  ;;  %v6701_v22 = vld [vmem:[%s6793_s13 + $0x80] sm:$0xff]  ;;  %vm10856_vm9 = vmmov %vm10841_vm0 }
 0x394   : > { %v5063_v44 = vpop.f32.mrf.mxu1 }
 0x395   : > { %5261 = vst.msk [vmem:[%s9570_s21 + $0x28] sm:$0xff] %vm10841_vm0, %v5229_v18  ;;  %v5228_v41 = vmax.f32 %v5196_v36, 0.0  ;;  %v5199_v28 = vadd.f32 %v6690_v39, %v5069_v15  ;;  %v5064_v46 = vadd.f32 %v9560_v59, %v5063_v44  ;;  %v6702_v15 = vld [vmem:[%s6793_s13 + $0x98] sm:$0xff] }
 0x396   : > { %v6610_v0 = vpop.f32.mrf.mxu1 }
 0x397   : > { %5260 = vst.msk [vmem:[%s9570_s21 + $0x20] sm:$0xff] %vm10842_vm10, %v5228_v41  ;;  %v5231_v34 = vmax.f32 %v5199_v28, 0.0  ;;  %v5198_v12 = vadd.f32 %v6691_v23, %v5064_v46  ;;  %v5079_v52 = vadd.f32 %v6610_v0, %v9560_v59  ;;  %v6703_v46 = vld [vmem:[%s6793_s13 + $0x90] sm:$0xff]  ;;  %vm10857_vm10 = vmmov %vm10841_vm0 }
 0x398   : > { %v5073_v25 = vpop.f32.mrf.mxu1 }
 0x399   : > { %5263 = vst.msk [vmem:[%s9570_s21 + $0x38] sm:$0xff] %vm10843_vm4, %v5231_v34  ;;  %v5230_v16 = vmax.f32 %v5198_v12, 0.0  ;;  %v5201_v35 = vadd.f32 %v6692_v42, %v5079_v52  ;;  %v5074_v27 = vadd.f32 %v9560_v59, %v5073_v25  ;;  %v6704_v52 = vld [vmem:[%s6793_s13 + $0xa8] sm:$0xff]  ;;  %vm10858_vm4 = vmmov %vm10841_vm0 }
 0x39a   : > { %v6613_v48 = vpop.f32.mrf.mxu1 }
 0x39b   : > { %5262 = vst.msk [vmem:[%s9570_s21 + $0x30] sm:$0xff] %vm10844_vm5, %v5230_v16  ;;  %v5233_v45 = vmax.f32 %v5201_v35, 0.0  ;;  %v5200_v31 = vadd.f32 %v6693_v56, %v5074_v27  ;;  %v5089_v7 = vadd.f32 %v6613_v48, %v9560_v59  ;;  %v6705_v27 = vld [vmem:[%s6793_s13 + $0xa0] sm:$0xff]  ;;  %vm10859_vm5 = vmmov %vm10841_vm0 }
 0x39c   : > { %v5083_v33 = vpop.f32.mrf.mxu1 }
 0x39d   : > { %5265 = vst.msk [vmem:[%s9570_s21 + $0x48] sm:$0xff] %vm10845_vm13, %v5233_v45  ;;  %v5232_v2 = vmax.f32 %v5200_v31, 0.0  ;;  %v5203_v11 = vadd.f32 %v6694_v13, %v5089_v7  ;;  %v5084_v50 = vadd.f32 %v9560_v59, %v5083_v33  ;;  %v6706_v7 = vld [vmem:[%s6793_s13 + $0xb8] sm:$0xff]  ;;  %vm10860_vm13 = vmmov %vm10841_vm0 }
 0x39e   : > { %v6616_v14 = vpop.f32.mrf.mxu1 }
 0x39f   : > { %5264 = vst.msk [vmem:[%s9570_s21 + $0x40] sm:$0xff] %vm10846_vm3, %v5232_v2  ;;  %v5235_v55 = vmax.f32 %v5203_v11, 0.0  ;;  %v5202_v37 = vadd.f32 %v6695_v9, %v5084_v50  ;;  %v5099_v51 = vadd.f32 %v6616_v14, %v9560_v59  ;;  %v6707_v50 = vld [vmem:[%s6793_s13 + $0xb0] sm:$0xff]  ;;  %vm10861_vm3 = vmmov %vm10841_vm0 }
 0x3a0   : > { %v5093_v4 = vpop.f32.mrf.mxu1 }
 0x3a1   : > { %5267 = vst.msk [vmem:[%s9570_s21 + $0x58] sm:$0xff] %vm10847_vm6, %v5235_v55  ;;  %v5234_v30 = vmax.f32 %v5202_v37, 0.0  ;;  %v5205_v49 = vadd.f32 %v6696_v17, %v5099_v51  ;;  %v5094_v6 = vadd.f32 %v9560_v59, %v5093_v4  ;;  %v6708_v51 = vld [vmem:[%s6793_s13 + $0xc8] sm:$0xff]  ;;  %vm10862_vm6 = vmmov %vm10841_vm0 }
 0x3a2   : > { %v6619_v43 = vpop.f32.mrf.mxu1 }
 0x3a3   : > { %5266 = vst.msk [vmem:[%s9570_s21 + $0x50] sm:$0xff] %vm10848_vm15, %v5234_v30  ;;  %v5237_v5 = vmax.f32 %v5205_v49, 0.0  ;;  %v5204_v24 = vadd.f32 %v6697_v29, %v5094_v6  ;;  %v5109_v62 = vadd.f32 %v6619_v43, %v9560_v59  ;;  %v6709_v6 = vld [vmem:[%s6793_s13 + $0xc0] sm:$0xff]  ;;  %vm10863_vm15 = vmmov %vm10841_vm0 }
 0x3a4   : > { %v5103_v40 = vpop.f32.mrf.mxu1 }
 0x3a5   : > { %5269 = vst.msk [vmem:[%s9570_s21 + $0x68] sm:$0xff] %vm10849_vm12, %v5237_v5  ;;  %v5236_v63 = vmax.f32 %v5204_v24, 0.0  ;;  %v5207_v58 = vadd.f32 %v6698_v10, %v5109_v62  ;;  %v5104_v19 = vadd.f32 %v9560_v59, %v5103_v40  ;;  %v6710_v62 = vld [vmem:[%s6793_s13 + $0xd8] sm:$0xff]  ;;  %vm10864_vm12 = vmmov %vm10841_vm0 }
 0x3a6   : > { %v6622_v53 = vpop.f32.mrf.mxu1 }
 0x3a7   : > { %5268 = vst.msk [vmem:[%s9570_s21 + $0x60] sm:$0xff] %vm10850_vm7, %v5236_v63  ;;  %v5239_v38 = vmax.f32 %v5207_v58, 0.0  ;;  %v5206_v54 = vadd.f32 %v6699_v8, %v5104_v19  ;;  %v5119_v47 = vadd.f32 %v6622_v53, %v9560_v59  ;;  %v6711_v19 = vld [vmem:[%s6793_s13 + $0xd0] sm:$0xff]  ;;  %vm10865_vm7 = vmmov %vm10841_vm0 }
 0x3a8   : > { %v5113_v1 = vpop.f32.mrf.mxu1 }
 0x3a9   : > { %5271 = vst.msk [vmem:[%s9570_s21 + $0x78] sm:$0xff] %vm10851_vm2, %v5239_v38  ;;  %v5238_v60 = vmax.f32 %v5206_v54, 0.0  ;;  %v5209_v3 = vadd.f32 %v6700_v21, %v5119_v47  ;;  %v5114_v32 = vadd.f32 %v9560_v59, %v5113_v1  ;;  %v6712_v47 = vld [vmem:[%s6793_s13 + $0xe8] sm:$0xff]  ;;  %vm10866_vm2 = vmmov %vm10841_vm0 }
 0x3aa   : > { %v6625_v26 = vpop.f32.mrf.mxu1 }
 0x3ab   : > { %5270 = vst.msk [vmem:[%s9570_s21 + $0x70] sm:$0xff] %vm10852_vm11, %v5238_v60  ;;  %v5241_v20 = vmax.f32 %v5209_v3, 0.0  ;;  %v5208_v61 = vadd.f32 %v6701_v22, %v5114_v32  ;;  %v5129_v18 = vadd.f32 %v6625_v26, %v9560_v59  ;;  %v6713_v32 = vld [vmem:[%s6793_s13 + $0xe0] sm:$0xff]  ;;  %vm10867_vm11 = vmmov %vm10841_vm0 }
 0x3ac   : > { %v5123_v57 = vpop.f32.mrf.mxu1 }
 0x3ad   : > { %5273 = vst.msk [vmem:[%s9570_s21 + $0x88] sm:$0xff] %vm10853_vm8, %v5241_v20  ;;  %v5240_v36 = vmax.f32 %v5208_v61, 0.0  ;;  %v5211_v44 = vadd.f32 %v6702_v15, %v5129_v18  ;;  %v5124_v41 = vadd.f32 %v9560_v59, %v5123_v57  ;;  %v6714_v18 = vld [vmem:[%s6793_s13 + $0xf8] sm:$0xff] }
 0x3ae   : > { %v6628_v39 = vpop.f32.mrf.mxu1 }
 0x3af   : > { %5272 = vst.msk [vmem:[%s9570_s21 + $0x80] sm:$0xff] %vm10854_vm1, %v5240_v36  ;;  %v5243_v28 = vmax.f32 %v5211_v44, 0.0  ;;  %v5210_v0 = vadd.f32 %v6703_v46, %v5124_v41  ;;  %v5139_v34 = vadd.f32 %v6628_v39, %v9560_v59  ;;  %v6715_v44 = vld [vmem:[%s6793_s13 + $0xf0] sm:$0xff] }
 0x3b0   : > { %v5133_v23 = vpop.f32.mrf.mxu1 }
 0x3b1   : > { %5275 = vst.msk [vmem:[%s9570_s21 + $0x98] sm:$0xff] %vm10855_vm14, %v5243_v28  ;;  %v5242_v12 = vmax.f32 %v5210_v0, 0.0  ;;  %v5213_v25 = vadd.f32 %v6704_v52, %v5139_v34  ;;  %v5134_v16 = vadd.f32 %v9560_v59, %v5133_v23 }
 0x3b2   : > { %v6631_v42 = vpop.f32.mrf.mxu1 }
 0x3b3   : > { %5274 = vst.msk [vmem:[%s9570_s21 + $0x90] sm:$0xff] %vm10856_vm9, %v5242_v12  ;;  %v5245_v35 = vmax.f32 %v5213_v25, 0.0  ;;  %v5212_v48 = vadd.f32 %v6705_v27, %v5134_v16  ;;  %v5149_v45 = vadd.f32 %v6631_v42, %v9560_v59 }
 0x3b4   : > { %v5143_v56 = vpop.f32.mrf.mxu1 }
 0x3b5   : > { %5277 = vst.msk [vmem:[%s9570_s21 + $0xa8] sm:$0xff] %vm10841_vm0, %v5245_v35  ;;  %v5244_v31 = vmax.f32 %v5212_v48, 0.0  ;;  %v5215_v33 = vadd.f32 %v6706_v7, %v5149_v45  ;;  %v5144_v2 = vadd.f32 %v9560_v59, %v5143_v56 }
 0x3b6   : > { %v6634_v13 = vpop.f32.mrf.mxu1 }
 0x3b7   : > { %5276 = vst.msk [vmem:[%s9570_s21 + $0xa0] sm:$0xff] %vm10857_vm10, %v5244_v31  ;;  %v5247_v11 = vmax.f32 %v5215_v33, 0.0  ;;  %v5214_v14 = vadd.f32 %v6707_v50, %v5144_v2  ;;  %v5159_v55 = vadd.f32 %v6634_v13, %v9560_v59 }
 0x3b8   : > { %v5153_v9 = vpop.f32.mrf.mxu1 }
 0x3b9   : > { %5279 = vst.msk [vmem:[%s9570_s21 + $0xb8] sm:$0xff] %vm10858_vm4, %v5247_v11  ;;  %v5246_v37 = vmax.f32 %v5214_v14, 0.0  ;;  %v5217_v4 = vadd.f32 %v6708_v51, %v5159_v55  ;;  %v5154_v30 = vadd.f32 %v9560_v59, %v5153_v9 }
 0x3ba   : > { %v6637_v17 = vpop.f32.mrf.mxu1 }
 0x3bb   : > { %5278 = vst.msk [vmem:[%s9570_s21 + $0xb0] sm:$0xff] %vm10859_vm5, %v5246_v37  ;;  %v5249_v49 = vmax.f32 %v5217_v4, 0.0  ;;  %v5216_v43 = vadd.f32 %v6709_v6, %v5154_v30  ;;  %v5169_v5 = vadd.f32 %v6637_v17, %v9560_v59 }
 0x3bc   : > { %v5163_v29 = vpop.f32.mrf.mxu1 }
 0x3bd   : > { %5281 = vst.msk [vmem:[%s9570_s21 + $0xc8] sm:$0xff] %vm10860_vm13, %v5249_v49  ;;  %v5248_v24 = vmax.f32 %v5216_v43, 0.0  ;;  %v5219_v40 = vadd.f32 %v6710_v62, %v5169_v5  ;;  %v5164_v63 = vadd.f32 %v9560_v59, %v5163_v29 }
 0x3be   : > { %v6640_v10 = vpop.f32.mrf.mxu1 }
 0x3bf   : > { %5280 = vst.msk [vmem:[%s9570_s21 + $0xc0] sm:$0xff] %vm10861_vm3, %v5248_v24  ;;  %v5251_v58 = vmax.f32 %v5219_v40, 0.0  ;;  %v5218_v53 = vadd.f32 %v6711_v19, %v5164_v63  ;;  %v5179_v38 = vadd.f32 %v6640_v10, %v9560_v59 }
 0x3c0   : > { %v5173_v8 = vpop.f32.mrf.mxu1 }
 0x3c1   : > { %5283 = vst.msk [vmem:[%s9570_s21 + $0xd8] sm:$0xff] %vm10862_vm6, %v5251_v58  ;;  %v5250_v54 = vmax.f32 %v5218_v53, 0.0  ;;  %v5221_v1 = vadd.f32 %v6712_v47, %v5179_v38  ;;  %v5174_v60 = vadd.f32 %v9560_v59, %v5173_v8 }
 0x3c2   : > { %v6643_v21 = vpop.f32.mrf.mxu1 }
 0x3c3   : > { %5282 = vst.msk [vmem:[%s9570_s21 + $0xd0] sm:$0xff] %vm10863_vm15, %v5250_v54  ;;  %v5253_v3 = vmax.f32 %v5221_v1, 0.0  ;;  %v5220_v26 = vadd.f32 %v6713_v32, %v5174_v60  ;;  %v5189_v20 = vadd.f32 %v6643_v21, %v9560_v59 }
 0x3c4   : > { %v5183_v22 = vpop.f32.mrf.mxu1 }
 0x3c5   : > { %5285 = vst.msk [vmem:[%s9570_s21 + $0xe8] sm:$0xff] %vm10864_vm12, %v5253_v3  ;;  %v5252_v61 = vmax.f32 %v5220_v26, 0.0  ;;  %v5223_v57 = vadd.f32 %v6714_v18, %v5189_v20  ;;  %v5184_v36 = vadd.f32 %v9560_v59, %v5183_v22 }
 0x3c7   : > { %5284 = vst.msk [vmem:[%s9570_s21 + $0xe0] sm:$0xff] %vm10865_vm7, %v5252_v61  ;;  %v5255_v15 = vmax.f32 %v5223_v57, 0.0  ;;  %v5222_v41 = vadd.f32 %v6715_v44, %v5184_v36 }
 0x3c9   : > { %5287 = vst.msk [vmem:[%s9570_s21 + $0xf8] sm:$0xff] %vm10866_vm2, %v5255_v15  ;;  %v5254_v39 = vmax.f32 %v5222_v41, 0.0 }
 0x3cb   : > { %5286 = vst.msk [vmem:[%s9570_s21 + $0xf0] sm:$0xff] %vm10867_vm11, %v5254_v39 }
 0x3cc PF: > { %s17_s24 = sadd.s32 1, %s6722_s24  }
 0x3cd   : > { %p14_p4 = scmp.ge.s32.totalorder %s17_s24, 4  }
 0x3cf   :  { %16 = sbr.rel (!%p14_p4) target bundleno = 1 (0x1), region = 86 }

</bundles_post_ra>
